<compile_context>
chip_gen: v5e
topology: v5e:2x2
jax: 0.10.0
libtpu: 0.0.40
codegen_flags: <defaults>
</compile_context>

<pallas_src>
import jax
import jax.numpy as jnp
from jax import lax
from jax.experimental import pallas as pl
from jax.experimental.pallas import tpu as pltpu


# ----------------------------------------------------------------------------
# Helpers
# ----------------------------------------------------------------------------
def _round_up(x, m):
    return ((x + m - 1) // m) * m


def _vmem_budget():
    """(planning budget, physical VMEM) in bytes, per generation."""
    try:
        phys = int(pltpu.get_tpu_info().vmem_capacity_bytes)
    except Exception:
        phys = 64 << 20
    # ~32 MiB planning budget on v7x (64 MiB phys), ~48 MiB on v5e/v6e (128).
    return int(min(phys // 2, 48 << 20)), phys


def _pick_time_chunk(T, Bt, Dp, Hp, x_bytes, out_bytes, cap=512):
    """Pick the largest time chunk that fits the VMEM budget (tile-honest)."""
    budget, phys = _vmem_budget()
    G = 3 * Hp
    # Weights/biases (conservatively double-buffered) + hidden-state scratch.
    fixed = 2 * ((Dp + Hp) * G * 2 + G * 4 + Hp * 4) + Bt * Hp * 4
    # Per timestep of a chunk: double-buffered x/out blocks + gi scratch
    # (+ one transient copy of gi while the prologue matmul produces it).
    per_t = Bt * (2 * Dp * x_bytes + 2 * Hp * out_bytes + 2 * G * 4)
    avail = max(budget - fixed, per_t)
    tt = int(max(1, min(T, cap, avail // per_t)))
    t_pad = _round_up(T, tt)
    need = fixed + tt * per_t
    vmem_limit = int(min(max(need + (4 << 20), 16 << 20), (phys * 3) // 4))
    return tt, t_pad, vmem_limit


# ----------------------------------------------------------------------------
# Fused GRU layer kernel (input projection + serial recurrence)
# ----------------------------------------------------------------------------
def _make_gru_layer_kernel(Tt, Bt, Dp, Hp, T_valid, needs_mask, last_only,
                           unroll):
    G = 3 * Hp

    def kernel(x_ref, w_ih_ref, b_i_ref, w_hh_ref, b_hn_ref, out_ref,
               h_scr, gi_scr):
        t_idx = pl.program_id(1)                       # time-chunk index

        @pl.when(t_idx == 0)
        def _():
            h_scr[...] = jnp.zeros_like(h_scr)

        # --- chunk prologue: ONE wide MXU matmul for the input gates -------
        # Collapse (Tt, Bt, Dp) -> (Tt*Bt, Dp).  Collapse is done in f32
        # (Bt = 8 sublanes -> tile-aligned, layout-trivial) then cast to bf16
        # for the MXU; accumulation and all gate math stay f32.
        x3 = x_ref[...]
        if x3.dtype != jnp.float32:
            x3 = x3.astype(jnp.float32)
        x2d = x3.reshape(Tt * Bt, Dp).astype(jnp.bfloat16)
        gi_scr[...] = (jnp.dot(x2d, w_ih_ref[...],
                               preferred_element_type=jnp.float32)
                       + b_i_ref[...])                  # (Tt*Bt, 3*Hp) f32

        # Hoisted once per chunk (weights stay VMEM-resident across the grid).
        w_hh = w_hh_ref[...]                            # (Hp, 3*Hp) bf16
        b_hn = jnp.broadcast_to(b_hn_ref[...], (Bt, Hp))  # hoisted broadcast

        def step(t, h):
            row = pl.multiple_of(t * Bt, Bt)
            gi = gi_scr[pl.ds(row, Bt), :]              # (Bt, 3*Hp) f32
            gh = jnp.dot(h.astype(jnp.bfloat16), w_hh,
                         preferred_element_type=jnp.float32)
            # Gate slices are vreg-aligned (offsets 0 / Hp / 2*Hp, Hp = 128k).
            r = jax.nn.sigmoid(gi[:, 0:Hp] + gh[:, 0:Hp])
            z = jax.nn.sigmoid(gi[:, Hp:2 * Hp] + gh[:, Hp:2 * Hp])
            n = jnp.tanh(gi[:, 2 * Hp:3 * Hp]
                         + r * (gh[:, 2 * Hp:3 * Hp] + b_hn))
            h_new = (1.0 - z) * n + z * h
            if needs_mask:
                valid = (t_idx * Tt + t) < T_valid      # freeze h past T
                h_new = jnp.where(valid, h_new, h)
            if not last_only:
                out_ref[t] = h_new.astype(out_ref.dtype)
            return h_new

        h_final = lax.fori_loop(0, Tt, step, h_scr[...], unroll=unroll)
        h_scr[...] = h_final

        if last_only:
            @pl.when(t_idx == pl.num_programs(1) - 1)
            def _():
                out_ref[...] = h_final.astype(out_ref.dtype)

    return kernel


def gru_layer(x_seq, w_ih, b_i, w_hh, b_hn, *, Tt, T_valid, last_only,
              out_dtype, vmem_limit):
    """One fused GRU layer over a (T_pad, Bp, Dp) padded sequence."""
    T_pad, Bp, Dp = x_seq.shape
    Hp = w_hh.shape[0]
    G = 3 * Hp
    Bt = 8
    nb, nt = Bp // Bt, T_pad // Tt
    needs_mask = (T_pad != T_valid)
    unroll = True if Tt <= 16 else 8

    kernel = _make_gru_layer_kernel(Tt, Bt, Dp, Hp, T_valid, needs_mask,
                                    last_only, unroll)

    if last_only:
        out_shape = jax.ShapeDtypeStruct((Bp, Hp), out_dtype)
        out_spec = pl.BlockSpec((Bt, Hp), lambda b, t: (b, 0))
        out_elems = Bp * Hp
    else:
        out_shape = jax.ShapeDtypeStruct((T_pad, Bp, Hp), out_dtype)
        out_spec = pl.BlockSpec((Tt, Bt, Hp), lambda b, t: (t, b, 0))
        out_elems = T_pad * Bp * Hp

    cost = pl.CostEstimate(
        flops=2 * T_pad * Bp * G * (Dp + Hp) + 12 * T_pad * Bp * Hp,
        transcendentals=3 * T_pad * Bp * Hp,
        bytes_accessed=int(T_pad * Bp * Dp * x_seq.dtype.itemsize
                           + out_elems * jnp.dtype(out_dtype).itemsize
                           + (Dp + Hp) * G * 2),
    )

    return pl.pallas_call(
        kernel,
        out_shape=out_shape,
        grid_spec=pltpu.PrefetchScalarGridSpec(
            num_scalar_prefetch=0,
            grid=(nb, nt),
            in_specs=[pl.BlockSpec((Tt, Bt, Dp), lambda b, t: (t, b, 0)),
                      pl.BlockSpec((Dp, G), lambda b, t: (0, 0)),
                      pl.BlockSpec((1, G), lambda b, t: (0, 0)),
                      pl.BlockSpec((Hp, G), lambda b, t: (0, 0)),
                      pl.BlockSpec((1, Hp), lambda b, t: (0, 0))],
            out_specs=out_spec,
            scratch_shapes=[pltpu.VMEM((Bt, Hp), jnp.float32),
                            pltpu.VMEM((Tt * Bt, G), jnp.float32)]),
        compiler_params=pltpu.CompilerParams(
            dimension_semantics=("parallel", "arbitrary"),
            vmem_limit_bytes=vmem_limit),
        cost_estimate=cost,
    )(x_seq, w_ih, b_i, w_hh, b_hn)


# ----------------------------------------------------------------------------
# Head: fused LayerNorm (eps=1e-5, biased var over true H) + Linear
# ----------------------------------------------------------------------------
def _make_head_kernel(H, Hp):
    def kernel(h_ref, gamma_ref, beta_ref, w_ref, b_ref, out_ref):
        h = h_ref[...].astype(jnp.float32)              # (tile, Hp), pad cols = 0
        mask = (lax.broadcasted_iota(jnp.int32, (1, Hp), 1) < H
                ).astype(jnp.float32)
        inv_h = jnp.float32(1.0 / H)
        mean = jnp.sum(h, axis=-1, keepdims=True) * inv_h
        cent = (h - mean) * mask                         # zero the Hp padding
        var = jnp.sum(cent * cent, axis=-1, keepdims=True) * inv_h
        ln = cent * lax.rsqrt(var + 1e-5)
        ln = ln * gamma_ref[...] + beta_ref[...]
        out_ref[...] = (jnp.dot(ln.astype(jnp.bfloat16), w_ref[...],
                                preferred_element_type=jnp.float32)
                        + b_ref[...])
    return kernel


def head(h_pad, gamma, beta, w_fc, b_fc, H):
    """h_pad: (N, Hp) with zero lane padding past H.  Returns (N, Op) f32."""
    N, Hp = h_pad.shape
    Op = w_fc.shape[1]
    N8 = _round_up(max(N, 1), 8)
    tile = min(N8, 512)
    Np = _round_up(N8, tile)
    if Np != N:
        h_pad = jnp.pad(h_pad, ((0, Np - N), (0, 0)))
    out = pl.pallas_call(
        _make_head_kernel(H, Hp),
        out_shape=jax.ShapeDtypeStruct((Np, Op), jnp.float32),
        grid_spec=pltpu.PrefetchScalarGridSpec(
            num_scalar_prefetch=0,
            grid=(Np // tile,),
            in_specs=[pl.BlockSpec((tile, Hp), lambda i: (i, 0)),
                      pl.BlockSpec((1, Hp), lambda i: (0, 0)),
                      pl.BlockSpec((1, Hp), lambda i: (0, 0)),
                      pl.BlockSpec((Hp, Op), lambda i: (0, 0)),
                      pl.BlockSpec((1, Op), lambda i: (0, 0))],
            out_specs=pl.BlockSpec((tile, Op), lambda i: (i, 0))),
        compiler_params=pltpu.CompilerParams(
            dimension_semantics=("parallel",)),
    )(h_pad, gamma, beta, w_fc, b_fc)
    return out[:N]


# ----------------------------------------------------------------------------
# Model
# ----------------------------------------------------------------------------
class MMGRUePallas:
    def __init__(self, n_features, feats_dim, hidden_dim, num_layers,
                 out_dim, bidirectional, key):
        assert n_features in (2, 3)
        self.n_features = n_features
        self.H = hidden_dim
        self.num_layers = num_layers
        self.out_dim = out_dim
        # `bidirectional` lands in nn.GRU's batch_first slot in the original.
        self.batch_first = bool(bidirectional)

        in_dim = sum(feats_dim[:n_features])
        H = hidden_dim
        Hp = _round_up(H, 128)
        Dp0 = _round_up(in_dim, 128)
        Op = _round_up(out_dim, 128)
        self.in_dim, self.Hp, self.Dp0, self.Op = in_dim, Hp, Dp0, Op

        scale = 1.0 / float(H) ** 0.5
        keys = jax.random.split(key, num_layers * 4 + 2)

        self.layers = []
        d, dp = in_dim, Dp0
        for l in range(num_layers):
            kw = keys[4 * l: 4 * l + 4]
            # Packed gate layout (gate order r, z, n), each gate lane-padded
            # to Hp so every gate slice / store is 128-lane aligned.
            w_ih = jax.random.uniform(kw[0], (d, 3 * H), jnp.float32,
                                      -scale, scale)
            w_hh = jax.random.uniform(kw[1], (H, 3 * H), jnp.float32,
                                      -scale, scale)
            b_ih = jax.random.uniform(kw[2], (3 * H,), jnp.float32,
                                      -scale, scale)
            b_hh = jax.random.uniform(kw[3], (3 * H,), jnp.float32,
                                      -scale, scale)
            w_ih_p = jnp.zeros((dp, 3 * Hp), jnp.float32)
            w_hh_p = jnp.zeros((Hp, 3 * Hp), jnp.float32)
            b_i_p = jnp.zeros((1, 3 * Hp), jnp.float32)
            b_hn_p = jnp.zeros((1, Hp), jnp.float32)
            for g in range(3):
                w_ih_p = w_ih_p.at[:d, g * Hp:g * Hp + H].set(
                    w_ih[:, g * H:(g + 1) * H])
                w_hh_p = w_hh_p.at[:H, g * Hp:g * Hp + H].set(
                    w_hh[:, g * H:(g + 1) * H])
                bi = b_ih[g * H:(g + 1) * H]
                if g < 2:
                    # Fold b_hr / b_hz into the precomputed input gates; b_hn
                    # must stay inside the r-gated term, so keep it separate.
                    bi = bi + b_hh[g * H:(g + 1) * H]
                b_i_p = b_i_p.at[0, g * Hp:g * Hp + H].set(bi)
            b_hn_p = b_hn_p.at[0, :H].set(b_hh[2 * H:3 * H])
            self.layers.append((w_ih_p.astype(jnp.bfloat16), b_i_p,
                                w_hh_p.astype(jnp.bfloat16), b_hn_p))
            d, dp = H, Hp

        # LayerNorm(hidden_dim): gamma=1, beta=0 (zero in the Hp padding).
        self.gamma = jnp.zeros((1, Hp), jnp.float32).at[0, :H].set(1.0)
        self.beta = jnp.zeros((1, Hp), jnp.float32)
        # fc = Linear(hidden_dim, out_dim)  (the second assignment wins).
        w_fc = jax.random.uniform(keys[-2], (H, out_dim), jnp.float32,
                                  -scale, scale)
        b_fc = jax.random.uniform(keys[-1], (out_dim,), jnp.float32,
                                  -scale, scale)
        self.w_fc = jnp.zeros((Hp, Op), jnp.float32).at[:H, :out_dim].set(
            w_fc).astype(jnp.bfloat16)
        self.b_fc = jnp.zeros((1, Op), jnp.float32).at[0, :out_dim].set(b_fc)

    def __call__(self, xs):
        # torch.cat((x1, x2[, x3]), dim=2)
        concat = jnp.concatenate(list(xs[:self.n_features]), axis=2)

        if self.batch_first:
            seq = jnp.transpose(concat, (1, 0, 2))   # (B,T,D) -> (T,B,D)
        else:
            seq = concat                             # already (T,B,D)

        T, B, D = seq.shape
        Hp = self.Hp
        Bp = _round_up(max(B, 1), 8)
        Tt, T_pad, vmem_limit = _pick_time_chunk(
            T, 8, max(self.Dp0, Hp), Hp, x_bytes=4, out_bytes=4)

        # Pad time / batch / feature to (T_pad, Bp, Dp0) with zeros.
        x = jnp.pad(seq.astype(jnp.float32),
                    ((0, T_pad - T), (0, Bp - B), (0, self.Dp0 - D)))

        nl = len(self.layers)
        for l, (w_ih, b_i, w_hh, b_hn) in enumerate(self.layers):
            is_last = (l == nl - 1)
            # Last layer + batch_first: only the final hidden state is ever
            # used, so skip the (T,B,H) sequence writeback entirely.
            last_only = is_last and self.batch_first
            out_dtype = jnp.float32 if is_last else jnp.bfloat16
            x = gru_layer(x, w_ih, b_i, w_hh, b_hn,
                          Tt=Tt, T_valid=T, last_only=last_only,
                          out_dtype=out_dtype, vmem_limit=vmem_limit)

        if self.batch_first:
            # torch out[:, -1, :] with batch_first output (B,T,H): last step.
            logits = head(x, self.gamma, self.beta, self.w_fc, self.b_fc,
                          self.H)
            return logits[:B, :self.out_dim]
        else:
            # torch out[:, -1, :] on (T,B,H): last batch element per step.
            last = x[:T, B - 1, :]                   # (T, Hp)
            logits = head(last, self.gamma, self.beta, self.w_fc, self.b_fc,
                          self.H)
            return logits[:T, :self.out_dim]


# ----------------------------------------------------------------------------
if __name__ == "__main__":
    key = jax.random.PRNGKey(0)
    k_model, k1, k2 = jax.random.split(key, 3)

    n_features = 2
    feats_dim = [12, 20]          # concat input dim = 32
    hidden_dim = 32
    num_layers = 2
    out_dim = 8
    bidirectional = True          # -> batch_first=True in the original module
    B, T = 2, 8

    model = MMGRUePallas(n_features, feats_dim, hidden_dim, num_layers,
                         out_dim, bidirectional, k_model)

    x1 = jax.random.normal(k1, (B, T, feats_dim[0]), jnp.float32)
    x2 = jax.random.normal(k2, (B, T, feats_dim[1]), jnp.float32)

    fwd = jax.jit(lambda a, b: model([a, b]))
    out = jax.block_until_ready(fwd(x1, x2))

    assert out.shape == (B, out_dim), out.shape
    assert bool(jnp.all(jnp.isfinite(out)))
    print("KERNEL_OK")
</pallas_src>

<mosaic_0001>
module attributes {stable_mosaic.version = 11 : i64} {
  func.func @kernel(%arg0: i32, %arg1: i32, %arg2: memref<8x8x128xf32, #tpu.memory_space<vmem>>, %arg3: memref<128x384xbf16, #tpu.memory_space<vmem>>, %arg4: memref<1x384xf32, #tpu.memory_space<vmem>>, %arg5: memref<128x384xbf16, #tpu.memory_space<vmem>>, %arg6: memref<1x128xf32, #tpu.memory_space<vmem>>, %arg7: memref<8x8x128xbf16, #tpu.memory_space<vmem>>, %arg8: memref<8x128xf32, #tpu.memory_space<vmem>>, %arg9: memref<64x384xf32, #tpu.memory_space<vmem>>) attributes {dimension_semantics = [#tpu.dimension_semantics<parallel>, #tpu.dimension_semantics<arbitrary>], iteration_bounds = array<i64: 1, 1>, scalar_prefetch = 0 : i64, scratch_operands = 2 : i64, tpu.core_type = #tpu.core_type<tc>, window_params = [{transform_indices = @transform_0, window_bounds = array<i64: 8, 8, 128>}, {pipeline_mode = #tpu.pipeline_mode<synchronous>, transform_indices = @transform_1, window_bounds = array<i64: 128, 384>}, {pipeline_mode = #tpu.pipeline_mode<synchronous>, transform_indices = @transform_2, window_bounds = array<i64: 1, 384>}, {pipeline_mode = #tpu.pipeline_mode<synchronous>, transform_indices = @transform_3, window_bounds = array<i64: 128, 384>}, {pipeline_mode = #tpu.pipeline_mode<synchronous>, transform_indices = @transform_4, window_bounds = array<i64: 1, 128>}, {transform_indices = @transform_5, window_bounds = array<i64: 8, 8, 128>}]} {
    %c0_i32 = arith.constant 0 : i32
    %0 = arith.cmpi eq, %arg1, %c0_i32 : i32
    %1 = arith.extui %0 : i1 to i32
    %c0_i32_0 = arith.constant 0 : i32
    %2 = arith.cmpi ne, %1, %c0_i32_0 : i32
    scf.if %2 {
      %cst_82 = arith.constant 0.000000e+00 : f32
      %322 = vector.broadcast %cst_82 : f32 to vector<8x128xf32>
      %c0_83 = arith.constant 0 : index
      %c0_84 = arith.constant 0 : index
      %323 = vector.load %arg8[%c0_83, %c0_84] : memref<8x128xf32, #tpu.memory_space<vmem>>, vector<8x128xf32>
      tpu.vector_store %arg8[%c0_83, %c0_84], %322 {strides = array<i32>} : memref<8x128xf32, #tpu.memory_space<vmem>>, vector<8x128xf32>,
    } else {
    }
    %c0 = arith.constant 0 : index
    %c0_1 = arith.constant 0 : index
    %c0_2 = arith.constant 0 : index
    %3 = vector.load %arg2[%c0, %c0_1, %c0_2] : memref<8x8x128xf32, #tpu.memory_space<vmem>>, vector<8x8x128xf32>
    %4 = vector.shape_cast %3 : vector<8x8x128xf32> to vector<64x128xf32>
    %5 = arith.truncf %4 : vector<64x128xf32> to vector<64x128xbf16>
    %c0_3 = arith.constant 0 : index
    %c0_4 = arith.constant 0 : index
    %6 = vector.load %arg3[%c0_3, %c0_4] : memref<128x384xbf16, #tpu.memory_space<vmem>>, vector<128x384xbf16>
    %cst = arith.constant dense<0.000000e+00> : vector<64x384xf32>
    %7 = tpu.matmul %5, %6, %cst {dimension_numbers = #tpu.dot_dimension_numbers<[1], [0], [0], [1], [0, 0, 1, 1], [], []>} : vector<64x128xbf16>, vector<128x384xbf16>, vector<64x384xf32> -> vector<64x384xf32>
    %c0_5 = arith.constant 0 : index
    %c0_6 = arith.constant 0 : index
    %8 = vector.load %arg4[%c0_5, %c0_6] : memref<1x384xf32, #tpu.memory_space<vmem>>, vector<1x384xf32>
    %9 = vector.broadcast %8 : vector<1x384xf32> to vector<64x384xf32>
    %10 = arith.addf %7, %9 : vector<64x384xf32>
    %c0_7 = arith.constant 0 : index
    %c0_8 = arith.constant 0 : index
    %11 = vector.load %arg9[%c0_7, %c0_8] : memref<64x384xf32, #tpu.memory_space<vmem>>, vector<64x384xf32>
    tpu.vector_store %arg9[%c0_7, %c0_8], %10 {strides = array<i32>} : memref<64x384xf32, #tpu.memory_space<vmem>>, vector<64x384xf32>,
    %c0_9 = arith.constant 0 : index
    %c0_10 = arith.constant 0 : index
    %12 = vector.load %arg5[%c0_9, %c0_10] : memref<128x384xbf16, #tpu.memory_space<vmem>>, vector<128x384xbf16>
    %c0_11 = arith.constant 0 : index
    %c0_12 = arith.constant 0 : index
    %13 = vector.load %arg6[%c0_11, %c0_12] : memref<1x128xf32, #tpu.memory_space<vmem>>, vector<1x128xf32>
    %14 = vector.shape_cast %13 : vector<1x128xf32> to vector<1x128xf32>
    %15 = vector.broadcast %14 : vector<1x128xf32> to vector<8x128xf32>
    %c0_13 = arith.constant 0 : index
    %c0_14 = arith.constant 0 : index
    %16 = vector.load %arg8[%c0_13, %c0_14] : memref<8x128xf32, #tpu.memory_space<vmem>>, vector<8x128xf32>
    %c0_i32_15 = arith.constant 0 : i32
    %c8_i32 = arith.constant 8 : i32
    %17 = arith.muli %c0_i32_15, %c8_i32 : i32
    %18 = tpu.assume_multiple %17, 8 : i32
    %19 = arith.index_cast %18 : i32 to index
    %c0_16 = arith.constant 0 : index
    %20 = vector.load %arg9[%19, %c0_16] : memref<64x384xf32, #tpu.memory_space<vmem>>, vector<8x384xf32>
    %21 = arith.truncf %16 : vector<8x128xf32> to vector<8x128xbf16>
    %cst_17 = arith.constant dense<0.000000e+00> : vector<8x384xf32>
    %22 = tpu.matmul %21, %12, %cst_17 {dimension_numbers = #tpu.dot_dimension_numbers<[1], [0], [0], [1], [0, 0, 1, 1], [], []>} : vector<8x128xbf16>, vector<128x384xbf16>, vector<8x384xf32> -> vector<8x384xf32>
    %23 = vector.extract_strided_slice %20 {offsets = [0, 0], sizes = [8, 128], strides = [1, 1]} : vector<8x384xf32> to vector<8x128xf32>
    %24 = vector.extract_strided_slice %22 {offsets = [0, 0], sizes = [8, 128], strides = [1, 1]} : vector<8x384xf32> to vector<8x128xf32>
    %25 = arith.addf %23, %24 : vector<8x128xf32>
    %26 = arith.negf %25 : vector<8x128xf32>
    %27 = math.exp %26 : vector<8x128xf32>
    %cst_18 = arith.constant 1.000000e+00 : f32
    %28 = vector.broadcast %cst_18 : f32 to vector<8x128xf32>
    %29 = arith.addf %28, %27 : vector<8x128xf32>
    %30 = arith.divf %28, %29 : vector<8x128xf32>
    %31 = vector.extract_strided_slice %20 {offsets = [0, 128], sizes = [8, 128], strides = [1, 1]} : vector<8x384xf32> to vector<8x128xf32>
    %32 = vector.extract_strided_slice %22 {offsets = [0, 128], sizes = [8, 128], strides = [1, 1]} : vector<8x384xf32> to vector<8x128xf32>
    %33 = arith.addf %31, %32 : vector<8x128xf32>
    %34 = arith.negf %33 : vector<8x128xf32>
    %35 = math.exp %34 : vector<8x128xf32>
    %cst_19 = arith.constant 1.000000e+00 : f32
    %36 = vector.broadcast %cst_19 : f32 to vector<8x128xf32>
    %37 = arith.addf %36, %35 : vector<8x128xf32>
    %38 = arith.divf %36, %37 : vector<8x128xf32>
    %39 = vector.extract_strided_slice %20 {offsets = [0, 256], sizes = [8, 128], strides = [1, 1]} : vector<8x384xf32> to vector<8x128xf32>
    %40 = vector.extract_strided_slice %22 {offsets = [0, 256], sizes = [8, 128], strides = [1, 1]} : vector<8x384xf32> to vector<8x128xf32>
    %41 = arith.addf %40, %15 : vector<8x128xf32>
    %42 = arith.mulf %30, %41 : vector<8x128xf32>
    %43 = arith.addf %39, %42 : vector<8x128xf32>
    %44 = math.tanh %43 : vector<8x128xf32>
    %cst_20 = arith.constant 1.000000e+00 : f32
    %45 = vector.broadcast %cst_20 : f32 to vector<8x128xf32>
    %46 = arith.subf %45, %38 : vector<8x128xf32>
    %47 = arith.mulf %46, %44 : vector<8x128xf32>
    %48 = arith.mulf %38, %16 : vector<8x128xf32>
    %49 = arith.addf %47, %48 : vector<8x128xf32>
    %50 = arith.truncf %49 : vector<8x128xf32> to vector<8x128xbf16>
    %51 = arith.index_cast %c0_i32_15 : i32 to index
    %c0_21 = arith.constant 0 : index
    %c0_22 = arith.constant 0 : index
    %52 = vector.load %arg7[%51, %c0_21, %c0_22] : memref<8x8x128xbf16, #tpu.memory_space<vmem>>, vector<1x8x128xbf16>
    %53 = vector.shape_cast %52 : vector<1x8x128xbf16> to vector<8x128xbf16>
    %54 = vector.shape_cast %50 : vector<8x128xbf16> to vector<1x8x128xbf16>
    tpu.vector_store %arg7[%51, %c0_21, %c0_22], %54 {strides = array<i32>} : memref<8x8x128xbf16, #tpu.memory_space<vmem>>, vector<1x8x128xbf16>,
    %c1_i32 = arith.constant 1 : i32
    %c8_i32_23 = arith.constant 8 : i32
    %55 = arith.muli %c1_i32, %c8_i32_23 : i32
    %56 = tpu.assume_multiple %55, 8 : i32
    %57 = arith.index_cast %56 : i32 to index
    %c0_24 = arith.constant 0 : index
    %58 = vector.load %arg9[%57, %c0_24] : memref<64x384xf32, #tpu.memory_space<vmem>>, vector<8x384xf32>
    %59 = arith.truncf %49 : vector<8x128xf32> to vector<8x128xbf16>
    %cst_25 = arith.constant dense<0.000000e+00> : vector<8x384xf32>
    %60 = tpu.matmul %59, %12, %cst_25 {dimension_numbers = #tpu.dot_dimension_numbers<[1], [0], [0], [1], [0, 0, 1, 1], [], []>} : vector<8x128xbf16>, vector<128x384xbf16>, vector<8x384xf32> -> vector<8x384xf32>
    %61 = vector.extract_strided_slice %58 {offsets = [0, 0], sizes = [8, 128], strides = [1, 1]} : vector<8x384xf32> to vector<8x128xf32>
    %62 = vector.extract_strided_slice %60 {offsets = [0, 0], sizes = [8, 128], strides = [1, 1]} : vector<8x384xf32> to vector<8x128xf32>
    %63 = arith.addf %61, %62 : vector<8x128xf32>
    %64 = arith.negf %63 : vector<8x128xf32>
    %65 = math.exp %64 : vector<8x128xf32>
    %cst_26 = arith.constant 1.000000e+00 : f32
    %66 = vector.broadcast %cst_26 : f32 to vector<8x128xf32>
    %67 = arith.addf %66, %65 : vector<8x128xf32>
    %68 = arith.divf %66, %67 : vector<8x128xf32>
    %69 = vector.extract_strided_slice %58 {offsets = [0, 128], sizes = [8, 128], strides = [1, 1]} : vector<8x384xf32> to vector<8x128xf32>
    %70 = vector.extract_strided_slice %60 {offsets = [0, 128], sizes = [8, 128], strides = [1, 1]} : vector<8x384xf32> to vector<8x128xf32>
    %71 = arith.addf %69, %70 : vector<8x128xf32>
    %72 = arith.negf %71 : vector<8x128xf32>
    %73 = math.exp %72 : vector<8x128xf32>
    %cst_27 = arith.constant 1.000000e+00 : f32
    %74 = vector.broadcast %cst_27 : f32 to vector<8x128xf32>
    %75 = arith.addf %74, %73 : vector<8x128xf32>
    %76 = arith.divf %74, %75 : vector<8x128xf32>
    %77 = vector.extract_strided_slice %58 {offsets = [0, 256], sizes = [8, 128], strides = [1, 1]} : vector<8x384xf32> to vector<8x128xf32>
    %78 = vector.extract_strided_slice %60 {offsets = [0, 256], sizes = [8, 128], strides = [1, 1]} : vector<8x384xf32> to vector<8x128xf32>
    %79 = arith.addf %78, %15 : vector<8x128xf32>
    %80 = arith.mulf %68, %79 : vector<8x128xf32>
    %81 = arith.addf %77, %80 : vector<8x128xf32>
    %82 = math.tanh %81 : vector<8x128xf32>
    %cst_28 = arith.constant 1.000000e+00 : f32
    %83 = vector.broadcast %cst_28 : f32 to vector<8x128xf32>
    %84 = arith.subf %83, %76 : vector<8x128xf32>
    %85 = arith.mulf %84, %82 : vector<8x128xf32>
    %86 = arith.mulf %76, %49 : vector<8x128xf32>
    %87 = arith.addf %85, %86 : vector<8x128xf32>
    %88 = arith.truncf %87 : vector<8x128xf32> to vector<8x128xbf16>
    %89 = arith.index_cast %c1_i32 : i32 to index
    %c0_29 = arith.constant 0 : index
    %c0_30 = arith.constant 0 : index
    %90 = vector.load %arg7[%89, %c0_29, %c0_30] : memref<8x8x128xbf16, #tpu.memory_space<vmem>>, vector<1x8x128xbf16>
    %91 = vector.shape_cast %90 : vector<1x8x128xbf16> to vector<8x128xbf16>
    %92 = vector.shape_cast %88 : vector<8x128xbf16> to vector<1x8x128xbf16>
    tpu.vector_store %arg7[%89, %c0_29, %c0_30], %92 {strides = array<i32>} : memref<8x8x128xbf16, #tpu.memory_space<vmem>>, vector<1x8x128xbf16>,
    %c2_i32 = arith.constant 2 : i32
    %c8_i32_31 = arith.constant 8 : i32
    %93 = arith.muli %c2_i32, %c8_i32_31 : i32
    %94 = tpu.assume_multiple %93, 8 : i32
    %95 = arith.index_cast %94 : i32 to index
    %c0_32 = arith.constant 0 : index
    %96 = vector.load %arg9[%95, %c0_32] : memref<64x384xf32, #tpu.memory_space<vmem>>, vector<8x384xf32>
    %97 = arith.truncf %87 : vector<8x128xf32> to vector<8x128xbf16>
    %cst_33 = arith.constant dense<0.000000e+00> : vector<8x384xf32>
    %98 = tpu.matmul %97, %12, %cst_33 {dimension_numbers = #tpu.dot_dimension_numbers<[1], [0], [0], [1], [0, 0, 1, 1], [], []>} : vector<8x128xbf16>, vector<128x384xbf16>, vector<8x384xf32> -> vector<8x384xf32>
    %99 = vector.extract_strided_slice %96 {offsets = [0, 0], sizes = [8, 128], strides = [1, 1]} : vector<8x384xf32> to vector<8x128xf32>
    %100 = vector.extract_strided_slice %98 {offsets = [0, 0], sizes = [8, 128], strides = [1, 1]} : vector<8x384xf32> to vector<8x128xf32>
    %101 = arith.addf %99, %100 : vector<8x128xf32>
    %102 = arith.negf %101 : vector<8x128xf32>
    %103 = math.exp %102 : vector<8x128xf32>
    %cst_34 = arith.constant 1.000000e+00 : f32
    %104 = vector.broadcast %cst_34 : f32 to vector<8x128xf32>
    %105 = arith.addf %104, %103 : vector<8x128xf32>
    %106 = arith.divf %104, %105 : vector<8x128xf32>
    %107 = vector.extract_strided_slice %96 {offsets = [0, 128], sizes = [8, 128], strides = [1, 1]} : vector<8x384xf32> to vector<8x128xf32>
    %108 = vector.extract_strided_slice %98 {offsets = [0, 128], sizes = [8, 128], strides = [1, 1]} : vector<8x384xf32> to vector<8x128xf32>
    %109 = arith.addf %107, %108 : vector<8x128xf32>
    %110 = arith.negf %109 : vector<8x128xf32>
    %111 = math.exp %110 : vector<8x128xf32>
    %cst_35 = arith.constant 1.000000e+00 : f32
    %112 = vector.broadcast %cst_35 : f32 to vector<8x128xf32>
    %113 = arith.addf %112, %111 : vector<8x128xf32>
    %114 = arith.divf %112, %113 : vector<8x128xf32>
    %115 = vector.extract_strided_slice %96 {offsets = [0, 256], sizes = [8, 128], strides = [1, 1]} : vector<8x384xf32> to vector<8x128xf32>
    %116 = vector.extract_strided_slice %98 {offsets = [0, 256], sizes = [8, 128], strides = [1, 1]} : vector<8x384xf32> to vector<8x128xf32>
    %117 = arith.addf %116, %15 : vector<8x128xf32>
    %118 = arith.mulf %106, %117 : vector<8x128xf32>
    %119 = arith.addf %115, %118 : vector<8x128xf32>
    %120 = math.tanh %119 : vector<8x128xf32>
    %cst_36 = arith.constant 1.000000e+00 : f32
    %121 = vector.broadcast %cst_36 : f32 to vector<8x128xf32>
    %122 = arith.subf %121, %114 : vector<8x128xf32>
    %123 = arith.mulf %122, %120 : vector<8x128xf32>
    %124 = arith.mulf %114, %87 : vector<8x128xf32>
    %125 = arith.addf %123, %124 : vector<8x128xf32>
    %126 = arith.truncf %125 : vector<8x128xf32> to vector<8x128xbf16>
    %127 = arith.index_cast %c2_i32 : i32 to index
    %c0_37 = arith.constant 0 : index
    %c0_38 = arith.constant 0 : index
    %128 = vector.load %arg7[%127, %c0_37, %c0_38] : memref<8x8x128xbf16, #tpu.memory_space<vmem>>, vector<1x8x128xbf16>
    %129 = vector.shape_cast %128 : vector<1x8x128xbf16> to vector<8x128xbf16>
    %130 = vector.shape_cast %126 : vector<8x128xbf16> to vector<1x8x128xbf16>
    tpu.vector_store %arg7[%127, %c0_37, %c0_38], %130 {strides = array<i32>} : memref<8x8x128xbf16, #tpu.memory_space<vmem>>, vector<1x8x128xbf16>,
    %c3_i32 = arith.constant 3 : i32
    %c8_i32_39 = arith.constant 8 : i32
    %131 = arith.muli %c3_i32, %c8_i32_39 : i32
    %132 = tpu.assume_multiple %131, 8 : i32
    %133 = arith.index_cast %132 : i32 to index
    %c0_40 = arith.constant 0 : index
    %134 = vector.load %arg9[%133, %c0_40] : memref<64x384xf32, #tpu.memory_space<vmem>>, vector<8x384xf32>
    %135 = arith.truncf %125 : vector<8x128xf32> to vector<8x128xbf16>
    %cst_41 = arith.constant dense<0.000000e+00> : vector<8x384xf32>
    %136 = tpu.matmul %135, %12, %cst_41 {dimension_numbers = #tpu.dot_dimension_numbers<[1], [0], [0], [1], [0, 0, 1, 1], [], []>} : vector<8x128xbf16>, vector<128x384xbf16>, vector<8x384xf32> -> vector<8x384xf32>
    %137 = vector.extract_strided_slice %134 {offsets = [0, 0], sizes = [8, 128], strides = [1, 1]} : vector<8x384xf32> to vector<8x128xf32>
    %138 = vector.extract_strided_slice %136 {offsets = [0, 0], sizes = [8, 128], strides = [1, 1]} : vector<8x384xf32> to vector<8x128xf32>
    %139 = arith.addf %137, %138 : vector<8x128xf32>
    %140 = arith.negf %139 : vector<8x128xf32>
    %141 = math.exp %140 : vector<8x128xf32>
    %cst_42 = arith.constant 1.000000e+00 : f32
    %142 = vector.broadcast %cst_42 : f32 to vector<8x128xf32>
    %143 = arith.addf %142, %141 : vector<8x128xf32>
    %144 = arith.divf %142, %143 : vector<8x128xf32>
    %145 = vector.extract_strided_slice %134 {offsets = [0, 128], sizes = [8, 128], strides = [1, 1]} : vector<8x384xf32> to vector<8x128xf32>
    %146 = vector.extract_strided_slice %136 {offsets = [0, 128], sizes = [8, 128], strides = [1, 1]} : vector<8x384xf32> to vector<8x128xf32>
    %147 = arith.addf %145, %146 : vector<8x128xf32>
    %148 = arith.negf %147 : vector<8x128xf32>
    %149 = math.exp %148 : vector<8x128xf32>
    %cst_43 = arith.constant 1.000000e+00 : f32
    %150 = vector.broadcast %cst_43 : f32 to vector<8x128xf32>
    %151 = arith.addf %150, %149 : vector<8x128xf32>
    %152 = arith.divf %150, %151 : vector<8x128xf32>
    %153 = vector.extract_strided_slice %134 {offsets = [0, 256], sizes = [8, 128], strides = [1, 1]} : vector<8x384xf32> to vector<8x128xf32>
    %154 = vector.extract_strided_slice %136 {offsets = [0, 256], sizes = [8, 128], strides = [1, 1]} : vector<8x384xf32> to vector<8x128xf32>
    %155 = arith.addf %154, %15 : vector<8x128xf32>
    %156 = arith.mulf %144, %155 : vector<8x128xf32>
    %157 = arith.addf %153, %156 : vector<8x128xf32>
    %158 = math.tanh %157 : vector<8x128xf32>
    %cst_44 = arith.constant 1.000000e+00 : f32
    %159 = vector.broadcast %cst_44 : f32 to vector<8x128xf32>
    %160 = arith.subf %159, %152 : vector<8x128xf32>
    %161 = arith.mulf %160, %158 : vector<8x128xf32>
    %162 = arith.mulf %152, %125 : vector<8x128xf32>
    %163 = arith.addf %161, %162 : vector<8x128xf32>
    %164 = arith.truncf %163 : vector<8x128xf32> to vector<8x128xbf16>
    %165 = arith.index_cast %c3_i32 : i32 to index
    %c0_45 = arith.constant 0 : index
    %c0_46 = arith.constant 0 : index
    %166 = vector.load %arg7[%165, %c0_45, %c0_46] : memref<8x8x128xbf16, #tpu.memory_space<vmem>>, vector<1x8x128xbf16>
    %167 = vector.shape_cast %166 : vector<1x8x128xbf16> to vector<8x128xbf16>
    %168 = vector.shape_cast %164 : vector<8x128xbf16> to vector<1x8x128xbf16>
    tpu.vector_store %arg7[%165, %c0_45, %c0_46], %168 {strides = array<i32>} : memref<8x8x128xbf16, #tpu.memory_space<vmem>>, vector<1x8x128xbf16>,
    %c4_i32 = arith.constant 4 : i32
    %c8_i32_47 = arith.constant 8 : i32
    %169 = arith.muli %c4_i32, %c8_i32_47 : i32
    %170 = tpu.assume_multiple %169, 8 : i32
    %171 = arith.index_cast %170 : i32 to index
    %c0_48 = arith.constant 0 : index
    %172 = vector.load %arg9[%171, %c0_48] : memref<64x384xf32, #tpu.memory_space<vmem>>, vector<8x384xf32>
    %173 = arith.truncf %163 : vector<8x128xf32> to vector<8x128xbf16>
    %cst_49 = arith.constant dense<0.000000e+00> : vector<8x384xf32>
    %174 = tpu.matmul %173, %12, %cst_49 {dimension_numbers = #tpu.dot_dimension_numbers<[1], [0], [0], [1], [0, 0, 1, 1], [], []>} : vector<8x128xbf16>, vector<128x384xbf16>, vector<8x384xf32> -> vector<8x384xf32>
    %175 = vector.extract_strided_slice %172 {offsets = [0, 0], sizes = [8, 128], strides = [1, 1]} : vector<8x384xf32> to vector<8x128xf32>
    %176 = vector.extract_strided_slice %174 {offsets = [0, 0], sizes = [8, 128], strides = [1, 1]} : vector<8x384xf32> to vector<8x128xf32>
    %177 = arith.addf %175, %176 : vector<8x128xf32>
    %178 = arith.negf %177 : vector<8x128xf32>
    %179 = math.exp %178 : vector<8x128xf32>
    %cst_50 = arith.constant 1.000000e+00 : f32
    %180 = vector.broadcast %cst_50 : f32 to vector<8x128xf32>
    %181 = arith.addf %180, %179 : vector<8x128xf32>
    %182 = arith.divf %180, %181 : vector<8x128xf32>
    %183 = vector.extract_strided_slice %172 {offsets = [0, 128], sizes = [8, 128], strides = [1, 1]} : vector<8x384xf32> to vector<8x128xf32>
    %184 = vector.extract_strided_slice %174 {offsets = [0, 128], sizes = [8, 128], strides = [1, 1]} : vector<8x384xf32> to vector<8x128xf32>
    %185 = arith.addf %183, %184 : vector<8x128xf32>
    %186 = arith.negf %185 : vector<8x128xf32>
    %187 = math.exp %186 : vector<8x128xf32>
    %cst_51 = arith.constant 1.000000e+00 : f32
    %188 = vector.broadcast %cst_51 : f32 to vector<8x128xf32>
    %189 = arith.addf %188, %187 : vector<8x128xf32>
    %190 = arith.divf %188, %189 : vector<8x128xf32>
    %191 = vector.extract_strided_slice %172 {offsets = [0, 256], sizes = [8, 128], strides = [1, 1]} : vector<8x384xf32> to vector<8x128xf32>
    %192 = vector.extract_strided_slice %174 {offsets = [0, 256], sizes = [8, 128], strides = [1, 1]} : vector<8x384xf32> to vector<8x128xf32>
    %193 = arith.addf %192, %15 : vector<8x128xf32>
    %194 = arith.mulf %182, %193 : vector<8x128xf32>
    %195 = arith.addf %191, %194 : vector<8x128xf32>
    %196 = math.tanh %195 : vector<8x128xf32>
    %cst_52 = arith.constant 1.000000e+00 : f32
    %197 = vector.broadcast %cst_52 : f32 to vector<8x128xf32>
    %198 = arith.subf %197, %190 : vector<8x128xf32>
    %199 = arith.mulf %198, %196 : vector<8x128xf32>
    %200 = arith.mulf %190, %163 : vector<8x128xf32>
    %201 = arith.addf %199, %200 : vector<8x128xf32>
    %202 = arith.truncf %201 : vector<8x128xf32> to vector<8x128xbf16>
    %203 = arith.index_cast %c4_i32 : i32 to index
    %c0_53 = arith.constant 0 : index
    %c0_54 = arith.constant 0 : index
    %204 = vector.load %arg7[%203, %c0_53, %c0_54] : memref<8x8x128xbf16, #tpu.memory_space<vmem>>, vector<1x8x128xbf16>
    %205 = vector.shape_cast %204 : vector<1x8x128xbf16> to vector<8x128xbf16>
    %206 = vector.shape_cast %202 : vector<8x128xbf16> to vector<1x8x128xbf16>
    tpu.vector_store %arg7[%203, %c0_53, %c0_54], %206 {strides = array<i32>} : memref<8x8x128xbf16, #tpu.memory_space<vmem>>, vector<1x8x128xbf16>,
    %c5_i32 = arith.constant 5 : i32
    %c8_i32_55 = arith.constant 8 : i32
    %207 = arith.muli %c5_i32, %c8_i32_55 : i32
    %208 = tpu.assume_multiple %207, 8 : i32
    %209 = arith.index_cast %208 : i32 to index
    %c0_56 = arith.constant 0 : index
    %210 = vector.load %arg9[%209, %c0_56] : memref<64x384xf32, #tpu.memory_space<vmem>>, vector<8x384xf32>
    %211 = arith.truncf %201 : vector<8x128xf32> to vector<8x128xbf16>
    %cst_57 = arith.constant dense<0.000000e+00> : vector<8x384xf32>
    %212 = tpu.matmul %211, %12, %cst_57 {dimension_numbers = #tpu.dot_dimension_numbers<[1], [0], [0], [1], [0, 0, 1, 1], [], []>} : vector<8x128xbf16>, vector<128x384xbf16>, vector<8x384xf32> -> vector<8x384xf32>
    %213 = vector.extract_strided_slice %210 {offsets = [0, 0], sizes = [8, 128], strides = [1, 1]} : vector<8x384xf32> to vector<8x128xf32>
    %214 = vector.extract_strided_slice %212 {offsets = [0, 0], sizes = [8, 128], strides = [1, 1]} : vector<8x384xf32> to vector<8x128xf32>
    %215 = arith.addf %213, %214 : vector<8x128xf32>
    %216 = arith.negf %215 : vector<8x128xf32>
    %217 = math.exp %216 : vector<8x128xf32>
    %cst_58 = arith.constant 1.000000e+00 : f32
    %218 = vector.broadcast %cst_58 : f32 to vector<8x128xf32>
    %219 = arith.addf %218, %217 : vector<8x128xf32>
    %220 = arith.divf %218, %219 : vector<8x128xf32>
    %221 = vector.extract_strided_slice %210 {offsets = [0, 128], sizes = [8, 128], strides = [1, 1]} : vector<8x384xf32> to vector<8x128xf32>
    %222 = vector.extract_strided_slice %212 {offsets = [0, 128], sizes = [8, 128], strides = [1, 1]} : vector<8x384xf32> to vector<8x128xf32>
    %223 = arith.addf %221, %222 : vector<8x128xf32>
    %224 = arith.negf %223 : vector<8x128xf32>
    %225 = math.exp %224 : vector<8x128xf32>
    %cst_59 = arith.constant 1.000000e+00 : f32
    %226 = vector.broadcast %cst_59 : f32 to vector<8x128xf32>
    %227 = arith.addf %226, %225 : vector<8x128xf32>
    %228 = arith.divf %226, %227 : vector<8x128xf32>
    %229 = vector.extract_strided_slice %210 {offsets = [0, 256], sizes = [8, 128], strides = [1, 1]} : vector<8x384xf32> to vector<8x128xf32>
    %230 = vector.extract_strided_slice %212 {offsets = [0, 256], sizes = [8, 128], strides = [1, 1]} : vector<8x384xf32> to vector<8x128xf32>
    %231 = arith.addf %230, %15 : vector<8x128xf32>
    %232 = arith.mulf %220, %231 : vector<8x128xf32>
    %233 = arith.addf %229, %232 : vector<8x128xf32>
    %234 = math.tanh %233 : vector<8x128xf32>
    %cst_60 = arith.constant 1.000000e+00 : f32
    %235 = vector.broadcast %cst_60 : f32 to vector<8x128xf32>
    %236 = arith.subf %235, %228 : vector<8x128xf32>
    %237 = arith.mulf %236, %234 : vector<8x128xf32>
    %238 = arith.mulf %228, %201 : vector<8x128xf32>
    %239 = arith.addf %237, %238 : vector<8x128xf32>
    %240 = arith.truncf %239 : vector<8x128xf32> to vector<8x128xbf16>
    %241 = arith.index_cast %c5_i32 : i32 to index
    %c0_61 = arith.constant 0 : index
    %c0_62 = arith.constant 0 : index
    %242 = vector.load %arg7[%241, %c0_61, %c0_62] : memref<8x8x128xbf16, #tpu.memory_space<vmem>>, vector<1x8x128xbf16>
    %243 = vector.shape_cast %242 : vector<1x8x128xbf16> to vector<8x128xbf16>
    %244 = vector.shape_cast %240 : vector<8x128xbf16> to vector<1x8x128xbf16>
    tpu.vector_store %arg7[%241, %c0_61, %c0_62], %244 {strides = array<i32>} : memref<8x8x128xbf16, #tpu.memory_space<vmem>>, vector<1x8x128xbf16>,
    %c6_i32 = arith.constant 6 : i32
    %c8_i32_63 = arith.constant 8 : i32
    %245 = arith.muli %c6_i32, %c8_i32_63 : i32
    %246 = tpu.assume_multiple %245, 8 : i32
    %247 = arith.index_cast %246 : i32 to index
    %c0_64 = arith.constant 0 : index
    %248 = vector.load %arg9[%247, %c0_64] : memref<64x384xf32, #tpu.memory_space<vmem>>, vector<8x384xf32>
    %249 = arith.truncf %239 : vector<8x128xf32> to vector<8x128xbf16>
    %cst_65 = arith.constant dense<0.000000e+00> : vector<8x384xf32>
    %250 = tpu.matmul %249, %12, %cst_65 {dimension_numbers = #tpu.dot_dimension_numbers<[1], [0], [0], [1], [0, 0, 1, 1], [], []>} : vector<8x128xbf16>, vector<128x384xbf16>, vector<8x384xf32> -> vector<8x384xf32>
    %251 = vector.extract_strided_slice %248 {offsets = [0, 0], sizes = [8, 128], strides = [1, 1]} : vector<8x384xf32> to vector<8x128xf32>
    %252 = vector.extract_strided_slice %250 {offsets = [0, 0], sizes = [8, 128], strides = [1, 1]} : vector<8x384xf32> to vector<8x128xf32>
    %253 = arith.addf %251, %252 : vector<8x128xf32>
    %254 = arith.negf %253 : vector<8x128xf32>
    %255 = math.exp %254 : vector<8x128xf32>
    %cst_66 = arith.constant 1.000000e+00 : f32
    %256 = vector.broadcast %cst_66 : f32 to vector<8x128xf32>
    %257 = arith.addf %256, %255 : vector<8x128xf32>
    %258 = arith.divf %256, %257 : vector<8x128xf32>
    %259 = vector.extract_strided_slice %248 {offsets = [0, 128], sizes = [8, 128], strides = [1, 1]} : vector<8x384xf32> to vector<8x128xf32>
    %260 = vector.extract_strided_slice %250 {offsets = [0, 128], sizes = [8, 128], strides = [1, 1]} : vector<8x384xf32> to vector<8x128xf32>
    %261 = arith.addf %259, %260 : vector<8x128xf32>
    %262 = arith.negf %261 : vector<8x128xf32>
    %263 = math.exp %262 : vector<8x128xf32>
    %cst_67 = arith.constant 1.000000e+00 : f32
    %264 = vector.broadcast %cst_67 : f32 to vector<8x128xf32>
    %265 = arith.addf %264, %263 : vector<8x128xf32>
    %266 = arith.divf %264, %265 : vector<8x128xf32>
    %267 = vector.extract_strided_slice %248 {offsets = [0, 256], sizes = [8, 128], strides = [1, 1]} : vector<8x384xf32> to vector<8x128xf32>
    %268 = vector.extract_strided_slice %250 {offsets = [0, 256], sizes = [8, 128], strides = [1, 1]} : vector<8x384xf32> to vector<8x128xf32>
    %269 = arith.addf %268, %15 : vector<8x128xf32>
    %270 = arith.mulf %258, %269 : vector<8x128xf32>
    %271 = arith.addf %267, %270 : vector<8x128xf32>
    %272 = math.tanh %271 : vector<8x128xf32>
    %cst_68 = arith.constant 1.000000e+00 : f32
    %273 = vector.broadcast %cst_68 : f32 to vector<8x128xf32>
    %274 = arith.subf %273, %266 : vector<8x128xf32>
    %275 = arith.mulf %274, %272 : vector<8x128xf32>
    %276 = arith.mulf %266, %239 : vector<8x128xf32>
    %277 = arith.addf %275, %276 : vector<8x128xf32>
    %278 = arith.truncf %277 : vector<8x128xf32> to vector<8x128xbf16>
    %279 = arith.index_cast %c6_i32 : i32 to index
    %c0_69 = arith.constant 0 : index
    %c0_70 = arith.constant 0 : index
    %280 = vector.load %arg7[%279, %c0_69, %c0_70] : memref<8x8x128xbf16, #tpu.memory_space<vmem>>, vector<1x8x128xbf16>
    %281 = vector.shape_cast %280 : vector<1x8x128xbf16> to vector<8x128xbf16>
    %282 = vector.shape_cast %278 : vector<8x128xbf16> to vector<1x8x128xbf16>
    tpu.vector_store %arg7[%279, %c0_69, %c0_70], %282 {strides = array<i32>} : memref<8x8x128xbf16, #tpu.memory_space<vmem>>, vector<1x8x128xbf16>,
    %c7_i32 = arith.constant 7 : i32
    %c8_i32_71 = arith.constant 8 : i32
    %283 = arith.muli %c7_i32, %c8_i32_71 : i32
    %284 = tpu.assume_multiple %283, 8 : i32
    %285 = arith.index_cast %284 : i32 to index
    %c0_72 = arith.constant 0 : index
    %286 = vector.load %arg9[%285, %c0_72] : memref<64x384xf32, #tpu.memory_space<vmem>>, vector<8x384xf32>
    %287 = arith.truncf %277 : vector<8x128xf32> to vector<8x128xbf16>
    %cst_73 = arith.constant dense<0.000000e+00> : vector<8x384xf32>
    %288 = tpu.matmul %287, %12, %cst_73 {dimension_numbers = #tpu.dot_dimension_numbers<[1], [0], [0], [1], [0, 0, 1, 1], [], []>} : vector<8x128xbf16>, vector<128x384xbf16>, vector<8x384xf32> -> vector<8x384xf32>
    %289 = vector.extract_strided_slice %286 {offsets = [0, 0], sizes = [8, 128], strides = [1, 1]} : vector<8x384xf32> to vector<8x128xf32>
    %290 = vector.extract_strided_slice %288 {offsets = [0, 0], sizes = [8, 128], strides = [1, 1]} : vector<8x384xf32> to vector<8x128xf32>
    %291 = arith.addf %289, %290 : vector<8x128xf32>
    %292 = arith.negf %291 : vector<8x128xf32>
    %293 = math.exp %292 : vector<8x128xf32>
    %cst_74 = arith.constant 1.000000e+00 : f32
    %294 = vector.broadcast %cst_74 : f32 to vector<8x128xf32>
    %295 = arith.addf %294, %293 : vector<8x128xf32>
    %296 = arith.divf %294, %295 : vector<8x128xf32>
    %297 = vector.extract_strided_slice %286 {offsets = [0, 128], sizes = [8, 128], strides = [1, 1]} : vector<8x384xf32> to vector<8x128xf32>
    %298 = vector.extract_strided_slice %288 {offsets = [0, 128], sizes = [8, 128], strides = [1, 1]} : vector<8x384xf32> to vector<8x128xf32>
    %299 = arith.addf %297, %298 : vector<8x128xf32>
    %300 = arith.negf %299 : vector<8x128xf32>
    %301 = math.exp %300 : vector<8x128xf32>
    %cst_75 = arith.constant 1.000000e+00 : f32
    %302 = vector.broadcast %cst_75 : f32 to vector<8x128xf32>
    %303 = arith.addf %302, %301 : vector<8x128xf32>
    %304 = arith.divf %302, %303 : vector<8x128xf32>
    %305 = vector.extract_strided_slice %286 {offsets = [0, 256], sizes = [8, 128], strides = [1, 1]} : vector<8x384xf32> to vector<8x128xf32>
    %306 = vector.extract_strided_slice %288 {offsets = [0, 256], sizes = [8, 128], strides = [1, 1]} : vector<8x384xf32> to vector<8x128xf32>
    %307 = arith.addf %306, %15 : vector<8x128xf32>
    %308 = arith.mulf %296, %307 : vector<8x128xf32>
    %309 = arith.addf %305, %308 : vector<8x128xf32>
    %310 = math.tanh %309 : vector<8x128xf32>
    %cst_76 = arith.constant 1.000000e+00 : f32
    %311 = vector.broadcast %cst_76 : f32 to vector<8x128xf32>
    %312 = arith.subf %311, %304 : vector<8x128xf32>
    %313 = arith.mulf %312, %310 : vector<8x128xf32>
    %314 = arith.mulf %304, %277 : vector<8x128xf32>
    %315 = arith.addf %313, %314 : vector<8x128xf32>
    %316 = arith.truncf %315 : vector<8x128xf32> to vector<8x128xbf16>
    %317 = arith.index_cast %c7_i32 : i32 to index
    %c0_77 = arith.constant 0 : index
    %c0_78 = arith.constant 0 : index
    %318 = vector.load %arg7[%317, %c0_77, %c0_78] : memref<8x8x128xbf16, #tpu.memory_space<vmem>>, vector<1x8x128xbf16>
    %319 = vector.shape_cast %318 : vector<1x8x128xbf16> to vector<8x128xbf16>
    %320 = vector.shape_cast %316 : vector<8x128xbf16> to vector<1x8x128xbf16>
    tpu.vector_store %arg7[%317, %c0_77, %c0_78], %320 {strides = array<i32>} : memref<8x8x128xbf16, #tpu.memory_space<vmem>>, vector<1x8x128xbf16>,
    %c8_i32_79 = arith.constant 8 : i32
    %c0_80 = arith.constant 0 : index
    %c0_81 = arith.constant 0 : index
    %321 = vector.load %arg8[%c0_80, %c0_81] : memref<8x128xf32, #tpu.memory_space<vmem>>, vector<8x128xf32>
    tpu.vector_store %arg8[%c0_80, %c0_81], %315 {strides = array<i32>} : memref<8x128xf32, #tpu.memory_space<vmem>>, vector<8x128xf32>,
    return
  }
  func.func @transform_0(%arg0: i32, %arg1: i32) -> (i32, i32, i32) {
    %c0_i32 = arith.constant 0 : i32
    %c0_i32_0 = arith.constant 0 : i32
    return %arg1, %arg0, %c0_i32 : i32, i32, i32
  }
  func.func @transform_1(%arg0: i32, %arg1: i32) -> (i32, i32) {
    %c0_i32 = arith.constant 0 : i32
    %c0_i32_0 = arith.constant 0 : i32
    %c0_i32_1 = arith.constant 0 : i32
    return %c0_i32, %c0_i32_0 : i32, i32
  }
  func.func @transform_2(%arg0: i32, %arg1: i32) -> (i32, i32) {
    %c0_i32 = arith.constant 0 : i32
    %c0_i32_0 = arith.constant 0 : i32
    %c0_i32_1 = arith.constant 0 : i32
    return %c0_i32, %c0_i32_0 : i32, i32
  }
  func.func @transform_3(%arg0: i32, %arg1: i32) -> (i32, i32) {
    %c0_i32 = arith.constant 0 : i32
    %c0_i32_0 = arith.constant 0 : i32
    %c0_i32_1 = arith.constant 0 : i32
    return %c0_i32, %c0_i32_0 : i32, i32
  }
  func.func @transform_4(%arg0: i32, %arg1: i32) -> (i32, i32) {
    %c0_i32 = arith.constant 0 : i32
    %c0_i32_0 = arith.constant 0 : i32
    %c0_i32_1 = arith.constant 0 : i32
    return %c0_i32, %c0_i32_0 : i32, i32
  }
  func.func @transform_5(%arg0: i32, %arg1: i32) -> (i32, i32, i32) {
    %c0_i32 = arith.constant 0 : i32
    %c0_i32_0 = arith.constant 0 : i32
    return %arg1, %arg0, %c0_i32 : i32, i32, i32
  }
}

module attributes {stable_mosaic.version = 11 : i64} {
  func.func @kernel(%arg0: i32, %arg1: memref<8x128xf32, #tpu.memory_space<vmem>>, %arg2: memref<1x128xf32, #tpu.memory_space<vmem>>, %arg3: memref<1x128xf32, #tpu.memory_space<vmem>>, %arg4: memref<128x128xbf16, #tpu.memory_space<vmem>>, %arg5: memref<1x128xf32, #tpu.memory_space<vmem>>, %arg6: memref<8x128xf32, #tpu.memory_space<vmem>>) attributes {dimension_semantics = [#tpu.dimension_semantics<parallel>], iteration_bounds = array<i64: 1>, scalar_prefetch = 0 : i64, scratch_operands = 0 : i64, tpu.core_type = #tpu.core_type<tc>, window_params = [{transform_indices = @transform_0, window_bounds = array<i64: 8, 128>}, {pipeline_mode = #tpu.pipeline_mode<synchronous>, transform_indices = @transform_1, window_bounds = array<i64: 1, 128>}, {pipeline_mode = #tpu.pipeline_mode<synchronous>, transform_indices = @transform_2, window_bounds = array<i64: 1, 128>}, {pipeline_mode = #tpu.pipeline_mode<synchronous>, transform_indices = @transform_3, window_bounds = array<i64: 128, 128>}, {pipeline_mode = #tpu.pipeline_mode<synchronous>, transform_indices = @transform_4, window_bounds = array<i64: 1, 128>}, {transform_indices = @transform_5, window_bounds = array<i64: 8, 128>}]} {
    %c0 = arith.constant 0 : index
    %c0_0 = arith.constant 0 : index
    %0 = vector.load %arg1[%c0, %c0_0] : memref<8x128xf32, #tpu.memory_space<vmem>>, vector<8x128xf32>
    %1 = tpu.iota {dimensions = array<i32: 1>} : vector<1x128xi32>
    %c32_i32 = arith.constant 32 : i32
    %2 = vector.broadcast %c32_i32 : i32 to vector<1x128xi32>
    %3 = arith.cmpi slt, %1, %2 : vector<1x128xi32>
    %4 = arith.extui %3 : vector<1x128xi1> to vector<1x128xi32>
    %5 = arith.sitofp %4 : vector<1x128xi32> to vector<1x128xf32>
    %cst = arith.constant dense<0.000000e+00> : vector<8xf32>
    %6 = vector.multi_reduction <add>, %0, %cst [1] : vector<8x128xf32> to vector<8xf32>
    %7 = vector.shape_cast %6 : vector<8xf32> to vector<8x1xf32>
    %cst_1 = arith.constant 3.125000e-02 : f32
    %8 = vector.broadcast %cst_1 : f32 to vector<8x1xf32>
    %9 = arith.mulf %7, %8 : vector<8x1xf32>
    %10 = vector.broadcast %9 : vector<8x1xf32> to vector<8x128xf32>
    %11 = arith.subf %0, %10 : vector<8x128xf32>
    %12 = vector.broadcast %5 : vector<1x128xf32> to vector<8x128xf32>
    %13 = arith.mulf %11, %12 : vector<8x128xf32>
    %14 = arith.mulf %13, %13 : vector<8x128xf32>
    %cst_2 = arith.constant dense<0.000000e+00> : vector<8xf32>
    %15 = vector.multi_reduction <add>, %14, %cst_2 [1] : vector<8x128xf32> to vector<8xf32>
    %16 = vector.shape_cast %15 : vector<8xf32> to vector<8x1xf32>
    %cst_3 = arith.constant 3.125000e-02 : f32
    %17 = vector.broadcast %cst_3 : f32 to vector<8x1xf32>
    %18 = arith.mulf %16, %17 : vector<8x1xf32>
    %cst_4 = arith.constant 9.99999974E-6 : f32
    %19 = vector.broadcast %cst_4 : f32 to vector<8x1xf32>
    %20 = arith.addf %18, %19 : vector<8x1xf32>
    %21 = math.rsqrt %20 : vector<8x1xf32>
    %22 = vector.broadcast %21 : vector<8x1xf32> to vector<8x128xf32>
    %23 = arith.mulf %13, %22 : vector<8x128xf32>
    %c0_5 = arith.constant 0 : index
    %c0_6 = arith.constant 0 : index
    %24 = vector.load %arg2[%c0_5, %c0_6] : memref<1x128xf32, #tpu.memory_space<vmem>>, vector<1x128xf32>
    %25 = vector.broadcast %24 : vector<1x128xf32> to vector<8x128xf32>
    %26 = arith.mulf %23, %25 : vector<8x128xf32>
    %c0_7 = arith.constant 0 : index
    %c0_8 = arith.constant 0 : index
    %27 = vector.load %arg3[%c0_7, %c0_8] : memref<1x128xf32, #tpu.memory_space<vmem>>, vector<1x128xf32>
    %28 = vector.broadcast %27 : vector<1x128xf32> to vector<8x128xf32>
    %29 = arith.addf %26, %28 : vector<8x128xf32>
    %30 = arith.truncf %29 : vector<8x128xf32> to vector<8x128xbf16>
    %c0_9 = arith.constant 0 : index
    %c0_10 = arith.constant 0 : index
    %31 = vector.load %arg4[%c0_9, %c0_10] : memref<128x128xbf16, #tpu.memory_space<vmem>>, vector<128x128xbf16>
    %cst_11 = arith.constant dense<0.000000e+00> : vector<8x128xf32>
    %32 = tpu.matmul %30, %31, %cst_11 {dimension_numbers = #tpu.dot_dimension_numbers<[1], [0], [0], [1], [0, 0, 1, 1], [], []>} : vector<8x128xbf16>, vector<128x128xbf16>, vector<8x128xf32> -> vector<8x128xf32>
    %c0_12 = arith.constant 0 : index
    %c0_13 = arith.constant 0 : index
    %33 = vector.load %arg5[%c0_12, %c0_13] : memref<1x128xf32, #tpu.memory_space<vmem>>, vector<1x128xf32>
    %34 = vector.broadcast %33 : vector<1x128xf32> to vector<8x128xf32>
    %35 = arith.addf %32, %34 : vector<8x128xf32>
    %c0_14 = arith.constant 0 : index
    %c0_15 = arith.constant 0 : index
    %36 = vector.load %arg6[%c0_14, %c0_15] : memref<8x128xf32, #tpu.memory_space<vmem>>, vector<8x128xf32>
    tpu.vector_store %arg6[%c0_14, %c0_15], %35 {strides = array<i32>} : memref<8x128xf32, #tpu.memory_space<vmem>>, vector<8x128xf32>,
    return
  }
  func.func @transform_0(%arg0: i32) -> (i32, i32) {
    %c0_i32 = arith.constant 0 : i32
    %c0_i32_0 = arith.constant 0 : i32
    return %arg0, %c0_i32 : i32, i32
  }
  func.func @transform_1(%arg0: i32) -> (i32, i32) {
    %c0_i32 = arith.constant 0 : i32
    %c0_i32_0 = arith.constant 0 : i32
    %c0_i32_1 = arith.constant 0 : i32
    return %c0_i32, %c0_i32_0 : i32, i32
  }
  func.func @transform_2(%arg0: i32) -> (i32, i32) {
    %c0_i32 = arith.constant 0 : i32
    %c0_i32_0 = arith.constant 0 : i32
    %c0_i32_1 = arith.constant 0 : i32
    return %c0_i32, %c0_i32_0 : i32, i32
  }
  func.func @transform_3(%arg0: i32) -> (i32, i32) {
    %c0_i32 = arith.constant 0 : i32
    %c0_i32_0 = arith.constant 0 : i32
    %c0_i32_1 = arith.constant 0 : i32
    return %c0_i32, %c0_i32_0 : i32, i32
  }
  func.func @transform_4(%arg0: i32) -> (i32, i32) {
    %c0_i32 = arith.constant 0 : i32
    %c0_i32_0 = arith.constant 0 : i32
    %c0_i32_1 = arith.constant 0 : i32
    return %c0_i32, %c0_i32_0 : i32, i32
  }
  func.func @transform_5(%arg0: i32) -> (i32, i32) {
    %c0_i32 = arith.constant 0 : i32
    %c0_i32_0 = arith.constant 0 : i32
    return %arg0, %c0_i32 : i32, i32
  }
}

module attributes {stable_mosaic.version = 11 : i64} {
  func.func @kernel(%arg0: i32, %arg1: i32, %arg2: memref<8x8x128xbf16, #tpu.memory_space<vmem>>, %arg3: memref<128x384xbf16, #tpu.memory_space<vmem>>, %arg4: memref<1x384xf32, #tpu.memory_space<vmem>>, %arg5: memref<128x384xbf16, #tpu.memory_space<vmem>>, %arg6: memref<1x128xf32, #tpu.memory_space<vmem>>, %arg7: memref<8x128xf32, #tpu.memory_space<vmem>>, %arg8: memref<8x128xf32, #tpu.memory_space<vmem>>, %arg9: memref<64x384xf32, #tpu.memory_space<vmem>>) attributes {dimension_semantics = [#tpu.dimension_semantics<parallel>, #tpu.dimension_semantics<arbitrary>], iteration_bounds = array<i64: 1, 1>, scalar_prefetch = 0 : i64, scratch_operands = 2 : i64, tpu.core_type = #tpu.core_type<tc>, window_params = [{transform_indices = @transform_0, window_bounds = array<i64: 8, 8, 128>}, {pipeline_mode = #tpu.pipeline_mode<synchronous>, transform_indices = @transform_1, window_bounds = array<i64: 128, 384>}, {pipeline_mode = #tpu.pipeline_mode<synchronous>, transform_indices = @transform_2, window_bounds = array<i64: 1, 384>}, {pipeline_mode = #tpu.pipeline_mode<synchronous>, transform_indices = @transform_3, window_bounds = array<i64: 128, 384>}, {pipeline_mode = #tpu.pipeline_mode<synchronous>, transform_indices = @transform_4, window_bounds = array<i64: 1, 128>}, {transform_indices = @transform_5, window_bounds = array<i64: 8, 128>}]} {
    %c0_i32 = arith.constant 0 : i32
    %0 = arith.cmpi eq, %arg1, %c0_i32 : i32
    %1 = arith.extui %0 : i1 to i32
    %c0_i32_0 = arith.constant 0 : i32
    %2 = arith.cmpi ne, %1, %c0_i32_0 : i32
    scf.if %2 {
      %cst_68 = arith.constant 0.000000e+00 : f32
      %286 = vector.broadcast %cst_68 : f32 to vector<8x128xf32>
      %c0_69 = arith.constant 0 : index
      %c0_70 = arith.constant 0 : index
      %287 = vector.load %arg8[%c0_69, %c0_70] : memref<8x128xf32, #tpu.memory_space<vmem>>, vector<8x128xf32>
      tpu.vector_store %arg8[%c0_69, %c0_70], %286 {strides = array<i32>} : memref<8x128xf32, #tpu.memory_space<vmem>>, vector<8x128xf32>,
    } else {
    }
    %c0 = arith.constant 0 : index
    %c0_1 = arith.constant 0 : index
    %c0_2 = arith.constant 0 : index
    %3 = vector.load %arg2[%c0, %c0_1, %c0_2] : memref<8x8x128xbf16, #tpu.memory_space<vmem>>, vector<8x8x128xbf16>
    %4 = arith.extf %3 : vector<8x8x128xbf16> to vector<8x8x128xf32>
    %5 = vector.shape_cast %4 : vector<8x8x128xf32> to vector<64x128xf32>
    %6 = arith.truncf %5 : vector<64x128xf32> to vector<64x128xbf16>
    %c0_3 = arith.constant 0 : index
    %c0_4 = arith.constant 0 : index
    %7 = vector.load %arg3[%c0_3, %c0_4] : memref<128x384xbf16, #tpu.memory_space<vmem>>, vector<128x384xbf16>
    %cst = arith.constant dense<0.000000e+00> : vector<64x384xf32>
    %8 = tpu.matmul %6, %7, %cst {dimension_numbers = #tpu.dot_dimension_numbers<[1], [0], [0], [1], [0, 0, 1, 1], [], []>} : vector<64x128xbf16>, vector<128x384xbf16>, vector<64x384xf32> -> vector<64x384xf32>
    %c0_5 = arith.constant 0 : index
    %c0_6 = arith.constant 0 : index
    %9 = vector.load %arg4[%c0_5, %c0_6] : memref<1x384xf32, #tpu.memory_space<vmem>>, vector<1x384xf32>
    %10 = vector.broadcast %9 : vector<1x384xf32> to vector<64x384xf32>
    %11 = arith.addf %8, %10 : vector<64x384xf32>
    %c0_7 = arith.constant 0 : index
    %c0_8 = arith.constant 0 : index
    %12 = vector.load %arg9[%c0_7, %c0_8] : memref<64x384xf32, #tpu.memory_space<vmem>>, vector<64x384xf32>
    tpu.vector_store %arg9[%c0_7, %c0_8], %11 {strides = array<i32>} : memref<64x384xf32, #tpu.memory_space<vmem>>, vector<64x384xf32>,
    %c0_9 = arith.constant 0 : index
    %c0_10 = arith.constant 0 : index
    %13 = vector.load %arg5[%c0_9, %c0_10] : memref<128x384xbf16, #tpu.memory_space<vmem>>, vector<128x384xbf16>
    %c0_11 = arith.constant 0 : index
    %c0_12 = arith.constant 0 : index
    %14 = vector.load %arg6[%c0_11, %c0_12] : memref<1x128xf32, #tpu.memory_space<vmem>>, vector<1x128xf32>
    %15 = vector.shape_cast %14 : vector<1x128xf32> to vector<1x128xf32>
    %16 = vector.broadcast %15 : vector<1x128xf32> to vector<8x128xf32>
    %c0_13 = arith.constant 0 : index
    %c0_14 = arith.constant 0 : index
    %17 = vector.load %arg8[%c0_13, %c0_14] : memref<8x128xf32, #tpu.memory_space<vmem>>, vector<8x128xf32>
    %c0_i32_15 = arith.constant 0 : i32
    %c8_i32 = arith.constant 8 : i32
    %18 = arith.muli %c0_i32_15, %c8_i32 : i32
    %19 = tpu.assume_multiple %18, 8 : i32
    %20 = arith.index_cast %19 : i32 to index
    %c0_16 = arith.constant 0 : index
    %21 = vector.load %arg9[%20, %c0_16] : memref<64x384xf32, #tpu.memory_space<vmem>>, vector<8x384xf32>
    %22 = arith.truncf %17 : vector<8x128xf32> to vector<8x128xbf16>
    %cst_17 = arith.constant dense<0.000000e+00> : vector<8x384xf32>
    %23 = tpu.matmul %22, %13, %cst_17 {dimension_numbers = #tpu.dot_dimension_numbers<[1], [0], [0], [1], [0, 0, 1, 1], [], []>} : vector<8x128xbf16>, vector<128x384xbf16>, vector<8x384xf32> -> vector<8x384xf32>
    %24 = vector.extract_strided_slice %21 {offsets = [0, 0], sizes = [8, 128], strides = [1, 1]} : vector<8x384xf32> to vector<8x128xf32>
    %25 = vector.extract_strided_slice %23 {offsets = [0, 0], sizes = [8, 128], strides = [1, 1]} : vector<8x384xf32> to vector<8x128xf32>
    %26 = arith.addf %24, %25 : vector<8x128xf32>
    %27 = arith.negf %26 : vector<8x128xf32>
    %28 = math.exp %27 : vector<8x128xf32>
    %cst_18 = arith.constant 1.000000e+00 : f32
    %29 = vector.broadcast %cst_18 : f32 to vector<8x128xf32>
    %30 = arith.addf %29, %28 : vector<8x128xf32>
    %31 = arith.divf %29, %30 : vector<8x128xf32>
    %32 = vector.extract_strided_slice %21 {offsets = [0, 128], sizes = [8, 128], strides = [1, 1]} : vector<8x384xf32> to vector<8x128xf32>
    %33 = vector.extract_strided_slice %23 {offsets = [0, 128], sizes = [8, 128], strides = [1, 1]} : vector<8x384xf32> to vector<8x128xf32>
    %34 = arith.addf %32, %33 : vector<8x128xf32>
    %35 = arith.negf %34 : vector<8x128xf32>
    %36 = math.exp %35 : vector<8x128xf32>
    %cst_19 = arith.constant 1.000000e+00 : f32
    %37 = vector.broadcast %cst_19 : f32 to vector<8x128xf32>
    %38 = arith.addf %37, %36 : vector<8x128xf32>
    %39 = arith.divf %37, %38 : vector<8x128xf32>
    %40 = vector.extract_strided_slice %21 {offsets = [0, 256], sizes = [8, 128], strides = [1, 1]} : vector<8x384xf32> to vector<8x128xf32>
    %41 = vector.extract_strided_slice %23 {offsets = [0, 256], sizes = [8, 128], strides = [1, 1]} : vector<8x384xf32> to vector<8x128xf32>
    %42 = arith.addf %41, %16 : vector<8x128xf32>
    %43 = arith.mulf %31, %42 : vector<8x128xf32>
    %44 = arith.addf %40, %43 : vector<8x128xf32>
    %45 = math.tanh %44 : vector<8x128xf32>
    %cst_20 = arith.constant 1.000000e+00 : f32
    %46 = vector.broadcast %cst_20 : f32 to vector<8x128xf32>
    %47 = arith.subf %46, %39 : vector<8x128xf32>
    %48 = arith.mulf %47, %45 : vector<8x128xf32>
    %49 = arith.mulf %39, %17 : vector<8x128xf32>
    %50 = arith.addf %48, %49 : vector<8x128xf32>
    %c1_i32 = arith.constant 1 : i32
    %c8_i32_21 = arith.constant 8 : i32
    %51 = arith.muli %c1_i32, %c8_i32_21 : i32
    %52 = tpu.assume_multiple %51, 8 : i32
    %53 = arith.index_cast %52 : i32 to index
    %c0_22 = arith.constant 0 : index
    %54 = vector.load %arg9[%53, %c0_22] : memref<64x384xf32, #tpu.memory_space<vmem>>, vector<8x384xf32>
    %55 = arith.truncf %50 : vector<8x128xf32> to vector<8x128xbf16>
    %cst_23 = arith.constant dense<0.000000e+00> : vector<8x384xf32>
    %56 = tpu.matmul %55, %13, %cst_23 {dimension_numbers = #tpu.dot_dimension_numbers<[1], [0], [0], [1], [0, 0, 1, 1], [], []>} : vector<8x128xbf16>, vector<128x384xbf16>, vector<8x384xf32> -> vector<8x384xf32>
    %57 = vector.extract_strided_slice %54 {offsets = [0, 0], sizes = [8, 128], strides = [1, 1]} : vector<8x384xf32> to vector<8x128xf32>
    %58 = vector.extract_strided_slice %56 {offsets = [0, 0], sizes = [8, 128], strides = [1, 1]} : vector<8x384xf32> to vector<8x128xf32>
    %59 = arith.addf %57, %58 : vector<8x128xf32>
    %60 = arith.negf %59 : vector<8x128xf32>
    %61 = math.exp %60 : vector<8x128xf32>
    %cst_24 = arith.constant 1.000000e+00 : f32
    %62 = vector.broadcast %cst_24 : f32 to vector<8x128xf32>
    %63 = arith.addf %62, %61 : vector<8x128xf32>
    %64 = arith.divf %62, %63 : vector<8x128xf32>
    %65 = vector.extract_strided_slice %54 {offsets = [0, 128], sizes = [8, 128], strides = [1, 1]} : vector<8x384xf32> to vector<8x128xf32>
    %66 = vector.extract_strided_slice %56 {offsets = [0, 128], sizes = [8, 128], strides = [1, 1]} : vector<8x384xf32> to vector<8x128xf32>
    %67 = arith.addf %65, %66 : vector<8x128xf32>
    %68 = arith.negf %67 : vector<8x128xf32>
    %69 = math.exp %68 : vector<8x128xf32>
    %cst_25 = arith.constant 1.000000e+00 : f32
    %70 = vector.broadcast %cst_25 : f32 to vector<8x128xf32>
    %71 = arith.addf %70, %69 : vector<8x128xf32>
    %72 = arith.divf %70, %71 : vector<8x128xf32>
    %73 = vector.extract_strided_slice %54 {offsets = [0, 256], sizes = [8, 128], strides = [1, 1]} : vector<8x384xf32> to vector<8x128xf32>
    %74 = vector.extract_strided_slice %56 {offsets = [0, 256], sizes = [8, 128], strides = [1, 1]} : vector<8x384xf32> to vector<8x128xf32>
    %75 = arith.addf %74, %16 : vector<8x128xf32>
    %76 = arith.mulf %64, %75 : vector<8x128xf32>
    %77 = arith.addf %73, %76 : vector<8x128xf32>
    %78 = math.tanh %77 : vector<8x128xf32>
    %cst_26 = arith.constant 1.000000e+00 : f32
    %79 = vector.broadcast %cst_26 : f32 to vector<8x128xf32>
    %80 = arith.subf %79, %72 : vector<8x128xf32>
    %81 = arith.mulf %80, %78 : vector<8x128xf32>
    %82 = arith.mulf %72, %50 : vector<8x128xf32>
    %83 = arith.addf %81, %82 : vector<8x128xf32>
    %c2_i32 = arith.constant 2 : i32
    %c8_i32_27 = arith.constant 8 : i32
    %84 = arith.muli %c2_i32, %c8_i32_27 : i32
    %85 = tpu.assume_multiple %84, 8 : i32
    %86 = arith.index_cast %85 : i32 to index
    %c0_28 = arith.constant 0 : index
    %87 = vector.load %arg9[%86, %c0_28] : memref<64x384xf32, #tpu.memory_space<vmem>>, vector<8x384xf32>
    %88 = arith.truncf %83 : vector<8x128xf32> to vector<8x128xbf16>
    %cst_29 = arith.constant dense<0.000000e+00> : vector<8x384xf32>
    %89 = tpu.matmul %88, %13, %cst_29 {dimension_numbers = #tpu.dot_dimension_numbers<[1], [0], [0], [1], [0, 0, 1, 1], [], []>} : vector<8x128xbf16>, vector<128x384xbf16>, vector<8x384xf32> -> vector<8x384xf32>
    %90 = vector.extract_strided_slice %87 {offsets = [0, 0], sizes = [8, 128], strides = [1, 1]} : vector<8x384xf32> to vector<8x128xf32>
    %91 = vector.extract_strided_slice %89 {offsets = [0, 0], sizes = [8, 128], strides = [1, 1]} : vector<8x384xf32> to vector<8x128xf32>
    %92 = arith.addf %90, %91 : vector<8x128xf32>
    %93 = arith.negf %92 : vector<8x128xf32>
    %94 = math.exp %93 : vector<8x128xf32>
    %cst_30 = arith.constant 1.000000e+00 : f32
    %95 = vector.broadcast %cst_30 : f32 to vector<8x128xf32>
    %96 = arith.addf %95, %94 : vector<8x128xf32>
    %97 = arith.divf %95, %96 : vector<8x128xf32>
    %98 = vector.extract_strided_slice %87 {offsets = [0, 128], sizes = [8, 128], strides = [1, 1]} : vector<8x384xf32> to vector<8x128xf32>
    %99 = vector.extract_strided_slice %89 {offsets = [0, 128], sizes = [8, 128], strides = [1, 1]} : vector<8x384xf32> to vector<8x128xf32>
    %100 = arith.addf %98, %99 : vector<8x128xf32>
    %101 = arith.negf %100 : vector<8x128xf32>
    %102 = math.exp %101 : vector<8x128xf32>
    %cst_31 = arith.constant 1.000000e+00 : f32
    %103 = vector.broadcast %cst_31 : f32 to vector<8x128xf32>
    %104 = arith.addf %103, %102 : vector<8x128xf32>
    %105 = arith.divf %103, %104 : vector<8x128xf32>
    %106 = vector.extract_strided_slice %87 {offsets = [0, 256], sizes = [8, 128], strides = [1, 1]} : vector<8x384xf32> to vector<8x128xf32>
    %107 = vector.extract_strided_slice %89 {offsets = [0, 256], sizes = [8, 128], strides = [1, 1]} : vector<8x384xf32> to vector<8x128xf32>
    %108 = arith.addf %107, %16 : vector<8x128xf32>
    %109 = arith.mulf %97, %108 : vector<8x128xf32>
    %110 = arith.addf %106, %109 : vector<8x128xf32>
    %111 = math.tanh %110 : vector<8x128xf32>
    %cst_32 = arith.constant 1.000000e+00 : f32
    %112 = vector.broadcast %cst_32 : f32 to vector<8x128xf32>
    %113 = arith.subf %112, %105 : vector<8x128xf32>
    %114 = arith.mulf %113, %111 : vector<8x128xf32>
    %115 = arith.mulf %105, %83 : vector<8x128xf32>
    %116 = arith.addf %114, %115 : vector<8x128xf32>
    %c3_i32 = arith.constant 3 : i32
    %c8_i32_33 = arith.constant 8 : i32
    %117 = arith.muli %c3_i32, %c8_i32_33 : i32
    %118 = tpu.assume_multiple %117, 8 : i32
    %119 = arith.index_cast %118 : i32 to index
    %c0_34 = arith.constant 0 : index
    %120 = vector.load %arg9[%119, %c0_34] : memref<64x384xf32, #tpu.memory_space<vmem>>, vector<8x384xf32>
    %121 = arith.truncf %116 : vector<8x128xf32> to vector<8x128xbf16>
    %cst_35 = arith.constant dense<0.000000e+00> : vector<8x384xf32>
    %122 = tpu.matmul %121, %13, %cst_35 {dimension_numbers = #tpu.dot_dimension_numbers<[1], [0], [0], [1], [0, 0, 1, 1], [], []>} : vector<8x128xbf16>, vector<128x384xbf16>, vector<8x384xf32> -> vector<8x384xf32>
    %123 = vector.extract_strided_slice %120 {offsets = [0, 0], sizes = [8, 128], strides = [1, 1]} : vector<8x384xf32> to vector<8x128xf32>
    %124 = vector.extract_strided_slice %122 {offsets = [0, 0], sizes = [8, 128], strides = [1, 1]} : vector<8x384xf32> to vector<8x128xf32>
    %125 = arith.addf %123, %124 : vector<8x128xf32>
    %126 = arith.negf %125 : vector<8x128xf32>
    %127 = math.exp %126 : vector<8x128xf32>
    %cst_36 = arith.constant 1.000000e+00 : f32
    %128 = vector.broadcast %cst_36 : f32 to vector<8x128xf32>
    %129 = arith.addf %128, %127 : vector<8x128xf32>
    %130 = arith.divf %128, %129 : vector<8x128xf32>
    %131 = vector.extract_strided_slice %120 {offsets = [0, 128], sizes = [8, 128], strides = [1, 1]} : vector<8x384xf32> to vector<8x128xf32>
    %132 = vector.extract_strided_slice %122 {offsets = [0, 128], sizes = [8, 128], strides = [1, 1]} : vector<8x384xf32> to vector<8x128xf32>
    %133 = arith.addf %131, %132 : vector<8x128xf32>
    %134 = arith.negf %133 : vector<8x128xf32>
    %135 = math.exp %134 : vector<8x128xf32>
    %cst_37 = arith.constant 1.000000e+00 : f32
    %136 = vector.broadcast %cst_37 : f32 to vector<8x128xf32>
    %137 = arith.addf %136, %135 : vector<8x128xf32>
    %138 = arith.divf %136, %137 : vector<8x128xf32>
    %139 = vector.extract_strided_slice %120 {offsets = [0, 256], sizes = [8, 128], strides = [1, 1]} : vector<8x384xf32> to vector<8x128xf32>
    %140 = vector.extract_strided_slice %122 {offsets = [0, 256], sizes = [8, 128], strides = [1, 1]} : vector<8x384xf32> to vector<8x128xf32>
    %141 = arith.addf %140, %16 : vector<8x128xf32>
    %142 = arith.mulf %130, %141 : vector<8x128xf32>
    %143 = arith.addf %139, %142 : vector<8x128xf32>
    %144 = math.tanh %143 : vector<8x128xf32>
    %cst_38 = arith.constant 1.000000e+00 : f32
    %145 = vector.broadcast %cst_38 : f32 to vector<8x128xf32>
    %146 = arith.subf %145, %138 : vector<8x128xf32>
    %147 = arith.mulf %146, %144 : vector<8x128xf32>
    %148 = arith.mulf %138, %116 : vector<8x128xf32>
    %149 = arith.addf %147, %148 : vector<8x128xf32>
    %c4_i32 = arith.constant 4 : i32
    %c8_i32_39 = arith.constant 8 : i32
    %150 = arith.muli %c4_i32, %c8_i32_39 : i32
    %151 = tpu.assume_multiple %150, 8 : i32
    %152 = arith.index_cast %151 : i32 to index
    %c0_40 = arith.constant 0 : index
    %153 = vector.load %arg9[%152, %c0_40] : memref<64x384xf32, #tpu.memory_space<vmem>>, vector<8x384xf32>
    %154 = arith.truncf %149 : vector<8x128xf32> to vector<8x128xbf16>
    %cst_41 = arith.constant dense<0.000000e+00> : vector<8x384xf32>
    %155 = tpu.matmul %154, %13, %cst_41 {dimension_numbers = #tpu.dot_dimension_numbers<[1], [0], [0], [1], [0, 0, 1, 1], [], []>} : vector<8x128xbf16>, vector<128x384xbf16>, vector<8x384xf32> -> vector<8x384xf32>
    %156 = vector.extract_strided_slice %153 {offsets = [0, 0], sizes = [8, 128], strides = [1, 1]} : vector<8x384xf32> to vector<8x128xf32>
    %157 = vector.extract_strided_slice %155 {offsets = [0, 0], sizes = [8, 128], strides = [1, 1]} : vector<8x384xf32> to vector<8x128xf32>
    %158 = arith.addf %156, %157 : vector<8x128xf32>
    %159 = arith.negf %158 : vector<8x128xf32>
    %160 = math.exp %159 : vector<8x128xf32>
    %cst_42 = arith.constant 1.000000e+00 : f32
    %161 = vector.broadcast %cst_42 : f32 to vector<8x128xf32>
    %162 = arith.addf %161, %160 : vector<8x128xf32>
    %163 = arith.divf %161, %162 : vector<8x128xf32>
    %164 = vector.extract_strided_slice %153 {offsets = [0, 128], sizes = [8, 128], strides = [1, 1]} : vector<8x384xf32> to vector<8x128xf32>
    %165 = vector.extract_strided_slice %155 {offsets = [0, 128], sizes = [8, 128], strides = [1, 1]} : vector<8x384xf32> to vector<8x128xf32>
    %166 = arith.addf %164, %165 : vector<8x128xf32>
    %167 = arith.negf %166 : vector<8x128xf32>
    %168 = math.exp %167 : vector<8x128xf32>
    %cst_43 = arith.constant 1.000000e+00 : f32
    %169 = vector.broadcast %cst_43 : f32 to vector<8x128xf32>
    %170 = arith.addf %169, %168 : vector<8x128xf32>
    %171 = arith.divf %169, %170 : vector<8x128xf32>
    %172 = vector.extract_strided_slice %153 {offsets = [0, 256], sizes = [8, 128], strides = [1, 1]} : vector<8x384xf32> to vector<8x128xf32>
    %173 = vector.extract_strided_slice %155 {offsets = [0, 256], sizes = [8, 128], strides = [1, 1]} : vector<8x384xf32> to vector<8x128xf32>
    %174 = arith.addf %173, %16 : vector<8x128xf32>
    %175 = arith.mulf %163, %174 : vector<8x128xf32>
    %176 = arith.addf %172, %175 : vector<8x128xf32>
    %177 = math.tanh %176 : vector<8x128xf32>
    %cst_44 = arith.constant 1.000000e+00 : f32
    %178 = vector.broadcast %cst_44 : f32 to vector<8x128xf32>
    %179 = arith.subf %178, %171 : vector<8x128xf32>
    %180 = arith.mulf %179, %177 : vector<8x128xf32>
    %181 = arith.mulf %171, %149 : vector<8x128xf32>
    %182 = arith.addf %180, %181 : vector<8x128xf32>
    %c5_i32 = arith.constant 5 : i32
    %c8_i32_45 = arith.constant 8 : i32
    %183 = arith.muli %c5_i32, %c8_i32_45 : i32
    %184 = tpu.assume_multiple %183, 8 : i32
    %185 = arith.index_cast %184 : i32 to index
    %c0_46 = arith.constant 0 : index
    %186 = vector.load %arg9[%185, %c0_46] : memref<64x384xf32, #tpu.memory_space<vmem>>, vector<8x384xf32>
    %187 = arith.truncf %182 : vector<8x128xf32> to vector<8x128xbf16>
    %cst_47 = arith.constant dense<0.000000e+00> : vector<8x384xf32>
    %188 = tpu.matmul %187, %13, %cst_47 {dimension_numbers = #tpu.dot_dimension_numbers<[1], [0], [0], [1], [0, 0, 1, 1], [], []>} : vector<8x128xbf16>, vector<128x384xbf16>, vector<8x384xf32> -> vector<8x384xf32>
    %189 = vector.extract_strided_slice %186 {offsets = [0, 0], sizes = [8, 128], strides = [1, 1]} : vector<8x384xf32> to vector<8x128xf32>
    %190 = vector.extract_strided_slice %188 {offsets = [0, 0], sizes = [8, 128], strides = [1, 1]} : vector<8x384xf32> to vector<8x128xf32>
    %191 = arith.addf %189, %190 : vector<8x128xf32>
    %192 = arith.negf %191 : vector<8x128xf32>
    %193 = math.exp %192 : vector<8x128xf32>
    %cst_48 = arith.constant 1.000000e+00 : f32
    %194 = vector.broadcast %cst_48 : f32 to vector<8x128xf32>
    %195 = arith.addf %194, %193 : vector<8x128xf32>
    %196 = arith.divf %194, %195 : vector<8x128xf32>
    %197 = vector.extract_strided_slice %186 {offsets = [0, 128], sizes = [8, 128], strides = [1, 1]} : vector<8x384xf32> to vector<8x128xf32>
    %198 = vector.extract_strided_slice %188 {offsets = [0, 128], sizes = [8, 128], strides = [1, 1]} : vector<8x384xf32> to vector<8x128xf32>
    %199 = arith.addf %197, %198 : vector<8x128xf32>
    %200 = arith.negf %199 : vector<8x128xf32>
    %201 = math.exp %200 : vector<8x128xf32>
    %cst_49 = arith.constant 1.000000e+00 : f32
    %202 = vector.broadcast %cst_49 : f32 to vector<8x128xf32>
    %203 = arith.addf %202, %201 : vector<8x128xf32>
    %204 = arith.divf %202, %203 : vector<8x128xf32>
    %205 = vector.extract_strided_slice %186 {offsets = [0, 256], sizes = [8, 128], strides = [1, 1]} : vector<8x384xf32> to vector<8x128xf32>
    %206 = vector.extract_strided_slice %188 {offsets = [0, 256], sizes = [8, 128], strides = [1, 1]} : vector<8x384xf32> to vector<8x128xf32>
    %207 = arith.addf %206, %16 : vector<8x128xf32>
    %208 = arith.mulf %196, %207 : vector<8x128xf32>
    %209 = arith.addf %205, %208 : vector<8x128xf32>
    %210 = math.tanh %209 : vector<8x128xf32>
    %cst_50 = arith.constant 1.000000e+00 : f32
    %211 = vector.broadcast %cst_50 : f32 to vector<8x128xf32>
    %212 = arith.subf %211, %204 : vector<8x128xf32>
    %213 = arith.mulf %212, %210 : vector<8x128xf32>
    %214 = arith.mulf %204, %182 : vector<8x128xf32>
    %215 = arith.addf %213, %214 : vector<8x128xf32>
    %c6_i32 = arith.constant 6 : i32
    %c8_i32_51 = arith.constant 8 : i32
    %216 = arith.muli %c6_i32, %c8_i32_51 : i32
    %217 = tpu.assume_multiple %216, 8 : i32
    %218 = arith.index_cast %217 : i32 to index
    %c0_52 = arith.constant 0 : index
    %219 = vector.load %arg9[%218, %c0_52] : memref<64x384xf32, #tpu.memory_space<vmem>>, vector<8x384xf32>
    %220 = arith.truncf %215 : vector<8x128xf32> to vector<8x128xbf16>
    %cst_53 = arith.constant dense<0.000000e+00> : vector<8x384xf32>
    %221 = tpu.matmul %220, %13, %cst_53 {dimension_numbers = #tpu.dot_dimension_numbers<[1], [0], [0], [1], [0, 0, 1, 1], [], []>} : vector<8x128xbf16>, vector<128x384xbf16>, vector<8x384xf32> -> vector<8x384xf32>
    %222 = vector.extract_strided_slice %219 {offsets = [0, 0], sizes = [8, 128], strides = [1, 1]} : vector<8x384xf32> to vector<8x128xf32>
    %223 = vector.extract_strided_slice %221 {offsets = [0, 0], sizes = [8, 128], strides = [1, 1]} : vector<8x384xf32> to vector<8x128xf32>
    %224 = arith.addf %222, %223 : vector<8x128xf32>
    %225 = arith.negf %224 : vector<8x128xf32>
    %226 = math.exp %225 : vector<8x128xf32>
    %cst_54 = arith.constant 1.000000e+00 : f32
    %227 = vector.broadcast %cst_54 : f32 to vector<8x128xf32>
    %228 = arith.addf %227, %226 : vector<8x128xf32>
    %229 = arith.divf %227, %228 : vector<8x128xf32>
    %230 = vector.extract_strided_slice %219 {offsets = [0, 128], sizes = [8, 128], strides = [1, 1]} : vector<8x384xf32> to vector<8x128xf32>
    %231 = vector.extract_strided_slice %221 {offsets = [0, 128], sizes = [8, 128], strides = [1, 1]} : vector<8x384xf32> to vector<8x128xf32>
    %232 = arith.addf %230, %231 : vector<8x128xf32>
    %233 = arith.negf %232 : vector<8x128xf32>
    %234 = math.exp %233 : vector<8x128xf32>
    %cst_55 = arith.constant 1.000000e+00 : f32
    %235 = vector.broadcast %cst_55 : f32 to vector<8x128xf32>
    %236 = arith.addf %235, %234 : vector<8x128xf32>
    %237 = arith.divf %235, %236 : vector<8x128xf32>
    %238 = vector.extract_strided_slice %219 {offsets = [0, 256], sizes = [8, 128], strides = [1, 1]} : vector<8x384xf32> to vector<8x128xf32>
    %239 = vector.extract_strided_slice %221 {offsets = [0, 256], sizes = [8, 128], strides = [1, 1]} : vector<8x384xf32> to vector<8x128xf32>
    %240 = arith.addf %239, %16 : vector<8x128xf32>
    %241 = arith.mulf %229, %240 : vector<8x128xf32>
    %242 = arith.addf %238, %241 : vector<8x128xf32>
    %243 = math.tanh %242 : vector<8x128xf32>
    %cst_56 = arith.constant 1.000000e+00 : f32
    %244 = vector.broadcast %cst_56 : f32 to vector<8x128xf32>
    %245 = arith.subf %244, %237 : vector<8x128xf32>
    %246 = arith.mulf %245, %243 : vector<8x128xf32>
    %247 = arith.mulf %237, %215 : vector<8x128xf32>
    %248 = arith.addf %246, %247 : vector<8x128xf32>
    %c7_i32 = arith.constant 7 : i32
    %c8_i32_57 = arith.constant 8 : i32
    %249 = arith.muli %c7_i32, %c8_i32_57 : i32
    %250 = tpu.assume_multiple %249, 8 : i32
    %251 = arith.index_cast %250 : i32 to index
    %c0_58 = arith.constant 0 : index
    %252 = vector.load %arg9[%251, %c0_58] : memref<64x384xf32, #tpu.memory_space<vmem>>, vector<8x384xf32>
    %253 = arith.truncf %248 : vector<8x128xf32> to vector<8x128xbf16>
    %cst_59 = arith.constant dense<0.000000e+00> : vector<8x384xf32>
    %254 = tpu.matmul %253, %13, %cst_59 {dimension_numbers = #tpu.dot_dimension_numbers<[1], [0], [0], [1], [0, 0, 1, 1], [], []>} : vector<8x128xbf16>, vector<128x384xbf16>, vector<8x384xf32> -> vector<8x384xf32>
    %255 = vector.extract_strided_slice %252 {offsets = [0, 0], sizes = [8, 128], strides = [1, 1]} : vector<8x384xf32> to vector<8x128xf32>
    %256 = vector.extract_strided_slice %254 {offsets = [0, 0], sizes = [8, 128], strides = [1, 1]} : vector<8x384xf32> to vector<8x128xf32>
    %257 = arith.addf %255, %256 : vector<8x128xf32>
    %258 = arith.negf %257 : vector<8x128xf32>
    %259 = math.exp %258 : vector<8x128xf32>
    %cst_60 = arith.constant 1.000000e+00 : f32
    %260 = vector.broadcast %cst_60 : f32 to vector<8x128xf32>
    %261 = arith.addf %260, %259 : vector<8x128xf32>
    %262 = arith.divf %260, %261 : vector<8x128xf32>
    %263 = vector.extract_strided_slice %252 {offsets = [0, 128], sizes = [8, 128], strides = [1, 1]} : vector<8x384xf32> to vector<8x128xf32>
    %264 = vector.extract_strided_slice %254 {offsets = [0, 128], sizes = [8, 128], strides = [1, 1]} : vector<8x384xf32> to vector<8x128xf32>
    %265 = arith.addf %263, %264 : vector<8x128xf32>
    %266 = arith.negf %265 : vector<8x128xf32>
    %267 = math.exp %266 : vector<8x128xf32>
    %cst_61 = arith.constant 1.000000e+00 : f32
    %268 = vector.broadcast %cst_61 : f32 to vector<8x128xf32>
    %269 = arith.addf %268, %267 : vector<8x128xf32>
    %270 = arith.divf %268, %269 : vector<8x128xf32>
    %271 = vector.extract_strided_slice %252 {offsets = [0, 256], sizes = [8, 128], strides = [1, 1]} : vector<8x384xf32> to vector<8x128xf32>
    %272 = vector.extract_strided_slice %254 {offsets = [0, 256], sizes = [8, 128], strides = [1, 1]} : vector<8x384xf32> to vector<8x128xf32>
    %273 = arith.addf %272, %16 : vector<8x128xf32>
    %274 = arith.mulf %262, %273 : vector<8x128xf32>
    %275 = arith.addf %271, %274 : vector<8x128xf32>
    %276 = math.tanh %275 : vector<8x128xf32>
    %cst_62 = arith.constant 1.000000e+00 : f32
    %277 = vector.broadcast %cst_62 : f32 to vector<8x128xf32>
    %278 = arith.subf %277, %270 : vector<8x128xf32>
    %279 = arith.mulf %278, %276 : vector<8x128xf32>
    %280 = arith.mulf %270, %248 : vector<8x128xf32>
    %281 = arith.addf %279, %280 : vector<8x128xf32>
    %c8_i32_63 = arith.constant 8 : i32
    %c0_64 = arith.constant 0 : index
    %c0_65 = arith.constant 0 : index
    %282 = vector.load %arg8[%c0_64, %c0_65] : memref<8x128xf32, #tpu.memory_space<vmem>>, vector<8x128xf32>
    tpu.vector_store %arg8[%c0_64, %c0_65], %281 {strides = array<i32>} : memref<8x128xf32, #tpu.memory_space<vmem>>, vector<8x128xf32>,
    %c0_i32_66 = arith.constant 0 : i32
    %283 = arith.cmpi eq, %arg1, %c0_i32_66 : i32
    %284 = arith.extui %283 : i1 to i32
    %c0_i32_67 = arith.constant 0 : i32
    %285 = arith.cmpi ne, %284, %c0_i32_67 : i32
    scf.if %285 {
      %c0_68 = arith.constant 0 : index
      %c0_69 = arith.constant 0 : index
      %286 = vector.load %arg7[%c0_68, %c0_69] : memref<8x128xf32, #tpu.memory_space<vmem>>, vector<8x128xf32>
      tpu.vector_store %arg7[%c0_68, %c0_69], %281 {strides = array<i32>} : memref<8x128xf32, #tpu.memory_space<vmem>>, vector<8x128xf32>,
    } else {
    }
    return
  }
  func.func @transform_0(%arg0: i32, %arg1: i32) -> (i32, i32, i32) {
    %c0_i32 = arith.constant 0 : i32
    %c0_i32_0 = arith.constant 0 : i32
    return %arg1, %arg0, %c0_i32 : i32, i32, i32
  }
  func.func @transform_1(%arg0: i32, %arg1: i32) -> (i32, i32) {
    %c0_i32 = arith.constant 0 : i32
    %c0_i32_0 = arith.constant 0 : i32
    %c0_i32_1 = arith.constant 0 : i32
    return %c0_i32, %c0_i32_0 : i32, i32
  }
  func.func @transform_2(%arg0: i32, %arg1: i32) -> (i32, i32) {
    %c0_i32 = arith.constant 0 : i32
    %c0_i32_0 = arith.constant 0 : i32
    %c0_i32_1 = arith.constant 0 : i32
    return %c0_i32, %c0_i32_0 : i32, i32
  }
  func.func @transform_3(%arg0: i32, %arg1: i32) -> (i32, i32) {
    %c0_i32 = arith.constant 0 : i32
    %c0_i32_0 = arith.constant 0 : i32
    %c0_i32_1 = arith.constant 0 : i32
    return %c0_i32, %c0_i32_0 : i32, i32
  }
  func.func @transform_4(%arg0: i32, %arg1: i32) -> (i32, i32) {
    %c0_i32 = arith.constant 0 : i32
    %c0_i32_0 = arith.constant 0 : i32
    %c0_i32_1 = arith.constant 0 : i32
    return %c0_i32, %c0_i32_0 : i32, i32
  }
  func.func @transform_5(%arg0: i32, %arg1: i32) -> (i32, i32) {
    %c0_i32 = arith.constant 0 : i32
    %c0_i32_0 = arith.constant 0 : i32
    return %arg0, %c0_i32 : i32, i32
  }
}

</mosaic_0001>

<bundles_post_ra>
// kernel: _lambda_.5
= control target key start
LH: loop header
LB: loop body
LE: loop exit
PB: predicated region body
PF: predicated region fallthrough
CT: control target
= control target key end

     0   :  { %v21_v2 = vlaneseq  ;;  %v191_v6 = vmov 0.0   ;;  %s261_s0 = inlined_call_operand.vmem [shape: f32[8,128], index: 0, kind: input, shape index: {}]   ;;  %s262_s3 = inlined_call_operand.vmem [shape: bf16[128,128], index: 3, kind: input, shape index: {}]   ;;  %s263_s1 = inlined_call_operand.vmem [shape: f32[1,128], index: 1, kind: input, shape index: {}]   ;;  %s264_s2 = inlined_call_operand.vmem [shape: f32[1,128], index: 2, kind: input, shape index: {}]   ;;  %s265_s4 = inlined_call_operand.vmem [shape: f32[1,128], index: 4, kind: input, shape index: {}]   ;;  %s266_s5 = inlined_call_operand.vmem [shape: f32[8,128], index: 5, kind: output, shape index: {}]  }
   0x1   :  { %v20_v0 = vld [vmem:[%s261_s0] sm:$0xff]  ;;  %v184_v1 = vld [vmem:[%s262_s3 + $0x38] sm:$0xff]  ;;  %v183_v11 = vld [vmem:[%s262_s3 + $0x30] sm:$0xff] }
   0x2   :  { %26 = vadd.xlane.f32.xlu0 %v20_v0  ;;  %126 = vmatpush.bf16.msra.mxu0 %v184_v1  ;;  %v22_v3 = vand.u32 127, %v21_v2  ;;  %v182_v12 = vld [vmem:[%s262_s3 + $0x28] sm:$0xff]  ;;  %v181_v13 = vld [vmem:[%s262_s3 + $0x20] sm:$0xff]  ;;  %v180_v14 = vld [vmem:[%s262_s3 + $0x18] sm:$0xff] }
   0x3   :  { %v179_v15 = vld [vmem:[%s262_s3 + $0x10] sm:$0xff]  ;;  %v178_v16 = vld [vmem:[%s262_s3 + $0x8] sm:$0xff]  ;;  %v177_v17 = vld [vmem:[%s262_s3] sm:$0xff] }
   0x4   :  { %vm23_vm0 = vcmp.lt.s32.totalorder %v22_v3, 32  ;;  %v186_v27 = vld [vmem:[%s263_s1] ss:$0 sm:$0xff] }
   0x5   :  { %v144_v7 = vsel %vm23_vm0, 1.0, %v191_v6  ;;  %v187_v30 = vld [vmem:[%s264_s2] ss:$0 sm:$0xff] }
   0x6   :  { %127 = vmatpush.bf16.msra.mxu0 %v183_v11  ;;  %v188_v34 = vld [vmem:[%s265_s4] ss:$0 sm:$0xff] }
   0xa   :  { %128 = vmatpush.bf16.msra.mxu0 %v182_v12 }
   0xe   :  { %129 = vmatpush.bf16.msra.mxu0 %v181_v13 }
  0x12   :  { %130 = vmatpush.bf16.msra.mxu0 %v180_v14 }
  0x16   :  { %131 = vmatpush.bf16.msra.mxu0 %v179_v15 }
  0x1a   :  { %132 = vmatpush.bf16.msra.mxu0 %v178_v16 }
  0x1e   :  { %133 = vmatpush.bf16.msra.mxu0 %v177_v17 }
  0x75   :  { %v27_v4 = vpop.xlane.xlu0 %26 }
  0x76   :  { %v28_v5 = vmul.f32 0.03125, %v27_v4 }
  0x78   :  { %v29_v8 = vsub.f32 %v20_v0, %v28_v5 }
  0x7a   :  { %v30_v9 = vmul.f32 %v144_v7, %v29_v8 }
  0x7c   :  { %v31_v10 = vmul.f32 %v30_v9, %v30_v9 }
  0x7e   :  { %32 = vadd.xlane.f32.xlu0 %v31_v10 }
  0xf1   :  { %v33_v18 = vpop.xlane.xlu0 %32 }
  0xf2   :  { %v34_v19 = vmul.f32 0.03125, %v33_v18 }
  0xf4   :  { %v35_v20 = vadd.f32 1e-05, %v34_v19 }
  0xf6   :  { %189 = vrsqrt.f32 %v35_v20  ;;  %vm42_vm2 = vweird.f32 %v35_v20 }
  0xfc   :  { %v190_v21 = vpop.eup %189 }
  0xfd   :  { %v37_v22 = vmul.f32 %v190_v21, %v35_v20  ;;  %vm43_vm1 = vweird.f32 %v190_v21 }
  0xfe   :  { %vm44_vm3 = vmor %vm42_vm2, %vm43_vm1 }
  0xff   :  { %v38_v23 = vmul.f32 %v190_v21, %v37_v22 }
 0x101   :  { %v39_v24 = vmul.f32 0.5, %v38_v23 }
 0x103   :  { %v40_v25 = vsub.f32 1.5, %v39_v24 }
 0x105   :  { %v41_v26 = vmul.f32 %v190_v21, %v40_v25 }
 0x107   :  { %v45_v28 = vsel %vm44_vm3, %v190_v21, %v41_v26 }
 0x108   :  { %v46_v29 = vmul.f32 %v45_v28, %v30_v9 }
 0x10a   :  { %v51_v31 = vmul.f32 %v186_v27, %v46_v29 }
 0x10c   :  { %v56_v32 = vadd.f32 %v187_v30, %v51_v31 }
 0x10e   :  { %v57_v33 = vpack.c.bf16 %v56_v32, %v56_v32 }
 0x110   :  { %134 = vmatmul.bf16.vlgmr.msra.gmra.mxu0 %v57_v33 }
 0x18d   :  { %v135_v35 = vpop.f32.mrf.mxu0 }
 0x18e   :  { %v136_v36 = vadd.f32 %v188_v34, %v135_v35 }
 0x190   :  { %139 = vst [vmem:[%s266_s5] sm:$0xff] %v136_v36 }
 0x195   :  { %v137_v37 = vpop.f32.mrf.mxu0 }

// kernel: _lambda_.3
= control target key start
LH: loop header
LB: loop body
LE: loop exit
PB: predicated region body
PF: predicated region fallthrough
CT: control target
= control target key end

     0   :  { %10 = vsyncpa [#allocation5], 0  ;;  %s1653_s21 = smov [#allocation4]   ;;  %s1654_s23 = smov 192   ;;  %s2253_s0 = inlined_call_operand.vmem [shape: f32[8,8,128], index: 0, kind: input, shape index: {}]   ;;  %s2254_s1 = inlined_call_operand.vmem [shape: bf16[128,384], index: 1, kind: input, shape index: {}]   ;;  %s2255_s2 = inlined_call_operand.vmem [shape: f32[1,384], index: 2, kind: input, shape index: {}]   ;;  %s2256_s3 = inlined_call_operand.hbm [shape: bf16[128,384], index: 3, kind: input, shape index: {}]   ;;  %s2257_s4 = inlined_call_operand.vmem [shape: f32[1,128], index: 4, kind: input, shape index: {}]   ;;  %s2258_s5 = inlined_call_operand.vmem [shape: bf16[8,8,128], index: 5, kind: output, shape index: {}]  }
   0x1   :  { %s21_s20 = sshll.u32 %s2256_s3, 4  ;;  %s23_s22 = sshll.u32 %s1653_s21, 4  ;;  %s22_s20 = int_to_ptr.hbm [resolvable:$true] %s21_s20  ;;  %s24_s22 = int_to_ptr.vmem [resolvable:$true] %s23_s22 }
   0x2   :  { %s1655_s24 = smov 12  }
   0x3   :  { %29 = dma.hbm_to_vmem [thread:$0]  %s22_s20, 3072, %s24_s22, [#allocation5], %s1654_s23, %s1654_s23, %s1655_s24  }
   0x4   :  { %1651 = dma.done.wait [#allocation5], 3072  }
   0x5   :  { %1652 = vsyncadd [#allocation5], 4294964224  ;;  %v1364_v0 = vld [vmem:[%s2254_s1 + $0xa8] sm:$0xf]  ;;  %v1515_v1 = vld [vmem:[%s2254_s1 + $0xb0] sm:$0xf0] }
   0x6   :  { %v1460_v2 = vld [vmem:[#allocation4 + $0xa8] sm:$0xf]  ;;  %v1365_v3 = vor.u32 %v1515_v1, %v1364_v0  ;;  %v1539_v4 = vld [vmem:[#allocation4 + $0xb0] sm:$0xf0]  ;;  %v1352_v5 = vld [vmem:[%s2254_s1 + $0x90] sm:$0xf] }
   0x7   :  { %v1512_v6 = vld [vmem:[%s2254_s1 + $0x98] sm:$0xf0]  ;;  %v1702_v7 = vor.u32 %v1539_v4, %v1460_v2  ;;  %v1448_v8 = vld [vmem:[#allocation4 + $0x90] sm:$0xf]  ;;  %v1340_v12 = vld [vmem:[%s2254_s1 + $0x78] sm:$0xf] }
   0x8   :  { %v1536_v9 = vld [vmem:[#allocation4 + $0x98] sm:$0xf0]  ;;  %221 = vmatpush.bf16.msra.mxu0 %v1365_v3  ;;  %v1353_v10 = vor.u32 %v1512_v6, %v1352_v5  ;;  %v1509_v13 = vld [vmem:[%s2254_s1 + $0x80] sm:$0xf0]  ;;  %v1436_v14 = vld [vmem:[#allocation4 + $0x78] sm:$0xf] }
   0x9   :  { %504 = vmatpush.bf16.msra.mxu3 %v1702_v7  ;;  %v1705_v11 = vor.u32 %v1536_v9, %v1448_v8  ;;  %v1533_v15 = vld [vmem:[#allocation4 + $0x80] sm:$0xf0]  ;;  %v1341_v16 = vor.u32 %v1509_v13, %v1340_v12  ;;  %v1328_v18 = vld [vmem:[%s2254_s1 + $0x60] sm:$0xf]  ;;  %v1506_v19 = vld [vmem:[%s2254_s1 + $0x68] sm:$0xf0] }
   0xa   :  { %v1714_v17 = vor.u32 %v1533_v15, %v1436_v14  ;;  %v1424_v20 = vld [vmem:[#allocation4 + $0x60] sm:$0xf]  ;;  %v1530_v21 = vld [vmem:[#allocation4 + $0x68] sm:$0xf0]  ;;  %v1329_v22 = vor.u32 %v1506_v19, %v1328_v18  ;;  %v1316_v24 = vld [vmem:[%s2254_s1 + $0x48] sm:$0xf] }
   0xb   :  { %v1723_v23 = vor.u32 %v1530_v21, %v1424_v20  ;;  %v1503_v25 = vld [vmem:[%s2254_s1 + $0x50] sm:$0xf0]  ;;  %v1514_v26 = vld [vmem:[%s2254_s1 + $0xac] sm:$0xf]  ;;  %v1412_v27 = vld [vmem:[#allocation4 + $0x48] sm:$0xf] }
   0xc   :  { %222 = vmatpush.bf16.msra.mxu0 %v1353_v10  ;;  %v1527_v28 = vld [vmem:[#allocation4 + $0x50] sm:$0xf0]  ;;  %v1366_v29 = vld [vmem:[%s2254_s1 + $0xb4] sm:$0xf0]  ;;  %v1354_v32 = vld [vmem:[%s2254_s1 + $0x9c] sm:$0xf0]  ;;  %v1317_v33 = vor.u32 %v1503_v25, %v1316_v24 }
   0xd   :  { %505 = vmatpush.bf16.msra.mxu3 %v1705_v11  ;;  %v1369_v30 = vor.u32 %v1514_v26, %v1366_v29  ;;  %v1511_v31 = vld [vmem:[%s2254_s1 + $0x94] sm:$0xf]  ;;  %v1744_v34 = vor.u32 %v1527_v28, %v1412_v27  ;;  %v1304_v35 = vld [vmem:[%s2254_s1 + $0x30] sm:$0xf]  ;;  %v1500_v36 = vld [vmem:[%s2254_s1 + $0x38] sm:$0xf0] }
   0xe   :  { %v1400_v37 = vld [vmem:[#allocation4 + $0x30] sm:$0xf]  ;;  %v1357_v38 = vor.u32 %v1511_v31, %v1354_v32  ;;  %v1524_v39 = vld [vmem:[#allocation4 + $0x38] sm:$0xf0]  ;;  %v1342_v41 = vld [vmem:[%s2254_s1 + $0x84] sm:$0xf0]  ;;  %v1305_v42 = vor.u32 %v1500_v36, %v1304_v35 }
   0xf   :  { %250 = vmatpush.bf16.msra.mxu1 %v1369_v30  ;;  %v1508_v40 = vld [vmem:[%s2254_s1 + $0x7c] sm:$0xf]  ;;  %v1292_v43 = vld [vmem:[%s2254_s1 + $0x18] sm:$0xf]  ;;  %v1497_v44 = vld [vmem:[%s2254_s1 + $0x20] sm:$0xf0]  ;;  %v1765_v45 = vor.u32 %v1524_v39, %v1400_v37 }
  0x10   :  { %223 = vmatpush.bf16.msra.mxu0 %v1341_v16  ;;  %v1388_v46 = vld [vmem:[#allocation4 + $0x18] sm:$0xf]  ;;  %v1521_v47 = vld [vmem:[#allocation4 + $0x20] sm:$0xf0]  ;;  %v1345_v48 = vor.u32 %v1508_v40, %v1342_v41  ;;  %v1330_v50 = vld [vmem:[%s2254_s1 + $0x6c] sm:$0xf0]  ;;  %v1293_v55 = vor.u32 %v1497_v44, %v1292_v43 }
  0x11   :  { %506 = vmatpush.bf16.msra.mxu3 %v1714_v17  ;;  %v1505_v49 = vld [vmem:[%s2254_s1 + $0x64] sm:$0xf]  ;;  %v1372_v51 = vld [vmem:[%s2254_s1 + $0xb0] sm:$0xf]  ;;  %v1516_v52 = vld [vmem:[%s2254_s1 + $0xb8] sm:$0xf0]  ;;  %v1786_v58 = vor.u32 %v1521_v47, %v1388_v46 }
  0x12   :  { %v1280_v53 = vld [vmem:[%s2254_s1] sm:$0xf]  ;;  %v1373_v54 = vor.u32 %v1516_v52, %v1372_v51  ;;  %v1494_v56 = vld [vmem:[%s2254_s1 + $0x8] sm:$0xf0]  ;;  %v1462_v61 = vld [vmem:[#allocation4 + $0xb4] sm:$0xf0]  ;;  %v1333_v62 = vor.u32 %v1505_v49, %v1330_v50 }
  0x13   :  { %251 = vmatpush.bf16.msra.mxu1 %v1357_v38  ;;  %v1376_v57 = vld [vmem:[#allocation4] sm:$0xf]  ;;  %v1518_v59 = vld [vmem:[#allocation4 + $0x8] sm:$0xf0]  ;;  %v1468_v63 = vld [vmem:[#allocation4 + $0xb0] sm:$0xf]  ;;  %v1281_v5 = vor.u32 %v1494_v56, %v1280_v53 }
  0x14   :  { %224 = vmatpush.bf16.msra.mxu0 %v1329_v22  ;;  %v1538_v60 = vld [vmem:[#allocation4 + $0xac] sm:$0xf]  ;;  %v1540_v0 = vld [vmem:[#allocation4 + $0xb8] sm:$0xf0]  ;;  %279 = vmatpush.bf16.msra.mxu2 %v1373_v54  ;;  %v1360_v1 = vld [vmem:[%s2254_s1 + $0x98] sm:$0xf]  ;;  %v1807_v10 = vor.u32 %v1518_v59, %v1376_v57 }
  0x15   :  { %507 = vmatpush.bf16.msra.mxu3 %v1723_v23  ;;  %v1502_v2 = vld [vmem:[%s2254_s1 + $0x4c] sm:$0xf]  ;;  %v1318_v3 = vld [vmem:[%s2254_s1 + $0x54] sm:$0xf0]  ;;  %v1513_v4 = vld [vmem:[%s2254_s1 + $0xa0] sm:$0xf0]  ;;  %v1809_v12 = vor.u32 %v1540_v0, %v1468_v63  ;;  %v1811_v15 = vor.u32 %v1538_v60, %v1462_v61 }
  0x16   :  { %v41_v6 = vld [vmem:[%s2253_s0] sm:$0xff]  ;;  %v42_v8 = vld [vmem:[%s2253_s0 + $0x8] sm:$0xff]  ;;  %v1361_v9 = vor.u32 %v1513_v4, %v1360_v1  ;;  %v1535_v13 = vld [vmem:[#allocation4 + $0x94] sm:$0xf]  ;;  %v1321_v18 = vor.u32 %v1502_v2, %v1318_v3  ;;  %v1656_v40 = vmov 0.0|0.0  }
  0x17   :  { %252 = vmatpush.bf16.msra.mxu1 %v1345_v48  ;;  %v1456_v14 = vld [vmem:[#allocation4 + $0x98] sm:$0xf]  ;;  %v1537_v16 = vld [vmem:[#allocation4 + $0xa0] sm:$0xf0]  ;;  %v1348_v19 = vld [vmem:[%s2254_s1 + $0x80] sm:$0xf]  ;;  %v1819_v21 = vpack.c.bf16 %v42_v8, %v41_v6 }
  0x18   :  { %225 = vmatpush.bf16.msra.mxu0 %v1317_v33  ;;  %280 = vmatpush.bf16.msra.mxu2 %v1361_v9  ;;  %v1510_v20 = vld [vmem:[%s2254_s1 + $0x88] sm:$0xf0]  ;;  %v1450_v22 = vld [vmem:[#allocation4 + $0x9c] sm:$0xf0]  ;;  %v1499_v24 = vld [vmem:[%s2254_s1 + $0x34] sm:$0xf]  ;;  %v1829_v28 = vor.u32 %v1537_v16, %v1456_v14 }
  0x19   :  { %508 = vmatpush.bf16.msra.mxu3 %v1744_v34  ;;  %v1306_v25 = vld [vmem:[%s2254_s1 + $0x3c] sm:$0xf0]  ;;  %v1349_v26 = vor.u32 %v1510_v20, %v1348_v19  ;;  %v1532_v27 = vld [vmem:[#allocation4 + $0x7c] sm:$0xf]  ;;  %v1832_v30 = vor.u32 %v1535_v13, %v1450_v22  ;;  %v1534_v31 = vld [vmem:[#allocation4 + $0x88] sm:$0xf0] }
  0x1a   :  { %v1444_v29 = vld [vmem:[#allocation4 + $0x80] sm:$0xf]  ;;  %v1309_v32 = vor.u32 %v1499_v24, %v1306_v25  ;;  %v1336_v33 = vld [vmem:[%s2254_s1 + $0x68] sm:$0xf]  ;;  %v1507_v35 = vld [vmem:[%s2254_s1 + $0x70] sm:$0xf0] }
  0x1b   :  { %253 = vmatpush.bf16.msra.mxu1 %v1333_v62  ;;  %v1438_v36 = vld [vmem:[#allocation4 + $0x84] sm:$0xf0]  ;;  %v1496_v37 = vld [vmem:[%s2254_s1 + $0x1c] sm:$0xf]  ;;  %v1337_v39 = vor.u32 %v1507_v35, %v1336_v33  ;;  %v1324_v41 = vld [vmem:[%s2254_s1 + $0x50] sm:$0xf]  ;;  %v1855_v43 = vor.u32 %v1534_v31, %v1444_v29 }
  0x1c   :  { %226 = vmatpush.bf16.msra.mxu0 %v1305_v42  ;;  %v1294_v38 = vld [vmem:[%s2254_s1 + $0x24] sm:$0xf0]  ;;  %281 = vmatpush.bf16.msra.mxu2 %v1349_v26  ;;  %v1504_v42 = vld [vmem:[%s2254_s1 + $0x58] sm:$0xf0]  ;;  %v1858_v44 = vor.u32 %v1532_v27, %v1438_v36  ;;  %v1529_v46 = vld [vmem:[#allocation4 + $0x64] sm:$0xf] }
  0x1d   :  { %509 = vmatpush.bf16.msra.mxu3 %v1765_v45  ;;  %v1432_v47 = vld [vmem:[#allocation4 + $0x68] sm:$0xf]  ;;  %v1531_v48 = vld [vmem:[#allocation4 + $0x70] sm:$0xf0]  ;;  %v1297_v49 = vor.u32 %v1496_v37, %v1294_v38  ;;  %v1426_v50 = vld [vmem:[#allocation4 + $0x6c] sm:$0xf0]  ;;  %v1325_v53 = vor.u32 %v1504_v42, %v1324_v41 }
  0x1e   :  { %v1493_v51 = vld [vmem:[%s2254_s1 + $0x4] sm:$0xf]  ;;  %v1282_v52 = vld [vmem:[%s2254_s1 + $0xc] sm:$0xf0]  ;;  %v1312_v54 = vld [vmem:[%s2254_s1 + $0x38] sm:$0xf]  ;;  %v1873_v56 = vor.u32 %v1531_v48, %v1432_v47  ;;  %v1876_v57 = vor.u32 %v1529_v46, %v1426_v50 }
  0x1f   :  { %254 = vmatpush.bf16.msra.mxu1 %v1321_v18  ;;  %v1285_v59 = vor.u32 %v1493_v51, %v1282_v52  ;;  %v1420_v60 = vld [vmem:[#allocation4 + $0x50] sm:$0xf]  ;;  %v1528_v61 = vld [vmem:[#allocation4 + $0x58] sm:$0xf0]  ;;  %v1526_v62 = vld [vmem:[#allocation4 + $0x4c] sm:$0xf] }
  0x20   :  { %227 = vmatpush.bf16.msra.mxu0 %v1293_v55  ;;  %282 = vmatpush.bf16.msra.mxu2 %v1337_v39  ;;  %v1501_v55 = vld [vmem:[%s2254_s1 + $0x40] sm:$0xf0]  ;;  %v1414_v63 = vld [vmem:[#allocation4 + $0x54] sm:$0xf0]  ;;  %v43_v0 = vld [vmem:[%s2253_s0 + $0x10] sm:$0xff] }
  0x21   :  { %510 = vmatpush.bf16.msra.mxu3 %v1786_v58  ;;  %v1313_v1 = vor.u32 %v1501_v55, %v1312_v54  ;;  %v44_v2 = vld [vmem:[%s2253_s0 + $0x18] sm:$0xff]  ;;  %v1300_v3 = vld [vmem:[%s2254_s1 + $0x20] sm:$0xf]  ;;  %v1498_v4 = vld [vmem:[%s2254_s1 + $0x28] sm:$0xf0]  ;;  %v1894_v6 = vor.u32 %v1526_v62, %v1414_v63 }
  0x22   :  { %v1408_v8 = vld [vmem:[#allocation4 + $0x38] sm:$0xf]  ;;  %v1525_v9 = vld [vmem:[#allocation4 + $0x40] sm:$0xf0]  ;;  %v50_v13 = vpack.c.bf16 %v44_v2, %v43_v0  ;;  %v1523_v14 = vld [vmem:[#allocation4 + $0x34] sm:$0xf]  ;;  %v1301_v18 = vor.u32 %v1498_v4, %v1300_v3 }
  0x23   :  { %255 = vmatpush.bf16.msra.mxu1 %v1309_v32  ;;  %v1402_v16 = vld [vmem:[#allocation4 + $0x3c] sm:$0xf0]  ;;  %v1899_v19 = vor.u32 %v1525_v9, %v1408_v8  ;;  %v1520_v22 = vld [vmem:[#allocation4 + $0x1c] sm:$0xf]  ;;  %v1288_v24 = vld [vmem:[%s2254_s1 + $0x8] sm:$0xf] }
  0x24   :  { %228 = vmatpush.bf16.msra.mxu0 %v1281_v5  ;;  %283 = vmatpush.bf16.msra.mxu2 %v1325_v53  ;;  %v1891_v5 = vor.u32 %v1528_v61, %v1420_v60  ;;  %v1902_v20 = vor.u32 %v1523_v14, %v1402_v16  ;;  %v1495_v25 = vld [vmem:[%s2254_s1 + $0x10] sm:$0xf0]  ;;  %v1390_v26 = vld [vmem:[#allocation4 + $0x24] sm:$0xf0]  ;;  %v1396_v27 = vld [vmem:[#allocation4 + $0x20] sm:$0xf] }
  0x25   :  { %511 = vmatpush.bf16.msra.mxu3 %v1807_v10  ;;  %v1522_v29 = vld [vmem:[#allocation4 + $0x28] sm:$0xf0]  ;;  %v1289_v31 = vor.u32 %v1495_v25, %v1288_v24  ;;  %v1915_v33 = vor.u32 %v1520_v22, %v1390_v26  ;;  %v1384_v35 = vld [vmem:[#allocation4 + $0x8] sm:$0xf]  ;;  %v1519_v36 = vld [vmem:[#allocation4 + $0x10] sm:$0xf0] }
  0x26   :  { %v1912_v32 = vor.u32 %v1522_v29, %v1396_v27  ;;  %v1517_v37 = vld [vmem:[#allocation4 + $0x4] sm:$0xf]  ;;  %v1378_v38 = vld [vmem:[#allocation4 + $0xc] sm:$0xf0]  ;;  %v1920_v39 = vor.u32 %v1519_v36, %v1384_v35  ;;  %v46_v46 = vld [vmem:[%s2253_s0 + $0x28] sm:$0xff] }
  0x27   :  { %229 = vmatmul.bf16.vlgmr.msra.gmra.mxu0 %v1819_v21  ;;  %256 = vmatpush.bf16.msra.mxu1 %v1297_v49  ;;  %v1923_v41 = vor.u32 %v1517_v37, %v1378_v38  ;;  %v45_v42 = vld [vmem:[%s2253_s0 + $0x20] sm:$0xff]  ;;  %v48_v48 = vld [vmem:[%s2253_s0 + $0x38] sm:$0xff] }
  0x28   :  { %530 = vmatpush.bf16.msrb.mxu0 %v1809_v12  ;;  %512 = vmatmul.bf16.vlgmr.msra.gmra.mxu3 %v1656_v40  ;;  %v51_v47 = vpack.c.bf16 %v46_v46, %v45_v42  ;;  %v85_v50 = vld [vmem:[%s2255_s2] sm:$0x7] }
  0x29   :  { %517 = vmatpush.bf16.msrb.mxu3 %v1811_v15  ;;  %284 = vmatpush.bf16.msra.mxu2 %v1313_v1  ;;  %v87_v51 = vperm.slane %v85_v50, 0  ;;  %v2011_v2 = vperm.slane %v85_v50, 1 }
  0x2b   :  { %257 = vmatpush.bf16.msra.mxu1 %v1285_v59 }
  0x2c   :  { %531 = vmatpush.bf16.msrb.mxu0 %v1829_v28 }
  0x2d   :  { %518 = vmatpush.bf16.msrb.mxu3 %v1832_v30  ;;  %285 = vmatpush.bf16.msra.mxu2 %v1301_v18  ;;  %v2016_v18 = vperm.slane %v85_v50, 2 }
  0x2e   :  { %258 = vmatmul.bf16.vlgmr.msra.gmra.mxu1 %v1819_v21 }
  0x2f   :  { %599 = vmatpush.bf16.msrb.mxu1 %v1702_v7  ;;  %2260 = vst [vmem:[#allocation7_spill] sm:$0xff] %v2016_v18 }
  0x30   :  { %532 = vmatpush.bf16.msrb.mxu0 %v1855_v43 }
  0x31   :  { %519 = vmatpush.bf16.msrb.mxu3 %v1858_v44  ;;  %286 = vmatpush.bf16.msra.mxu2 %v1289_v31 }
  0x33   :  { %600 = vmatpush.bf16.msrb.mxu1 %v1705_v11 }
  0x34   :  { %533 = vmatpush.bf16.msrb.mxu0 %v1873_v56  ;;  %287 = vmatmul.bf16.vlgmr.msra.gmra.mxu2 %v1819_v21  ;;  %v47_v21 = vld [vmem:[%s2253_s0 + $0x30] sm:$0xff] }
  0x35   :  { %520 = vmatpush.bf16.msrb.mxu3 %v1876_v57  ;;  %612 = vmatpush.bf16.msrb.mxu2 %v1811_v15  ;;  %v52_v49 = vpack.c.bf16 %v48_v48, %v47_v21 }
  0x37   :  { %234 = vmatmul.bf16.gmra.mxu0 %v50_v13  ;;  %601 = vmatpush.bf16.msrb.mxu1 %v1714_v17 }
  0x38   :  { %534 = vmatpush.bf16.msrb.mxu0 %v1891_v5 }
  0x39   :  { %521 = vmatpush.bf16.msrb.mxu3 %v1894_v6  ;;  %613 = vmatpush.bf16.msrb.mxu2 %v1832_v30 }
  0x3b   :  { %602 = vmatpush.bf16.msrb.mxu1 %v1723_v23 }
  0x3c   :  { %535 = vmatpush.bf16.msrb.mxu0 %v1899_v19 }
  0x3d   :  { %522 = vmatpush.bf16.msrb.mxu3 %v1902_v20  ;;  %614 = vmatpush.bf16.msrb.mxu2 %v1858_v44 }
  0x3e   :  { %263 = vmatmul.bf16.gmra.mxu1 %v50_v13 }
  0x3f   :  { %603 = vmatpush.bf16.msrb.mxu1 %v1744_v34 }
  0x40   :  { %536 = vmatpush.bf16.msrb.mxu0 %v1912_v32 }
  0x41   :  { %523 = vmatpush.bf16.msrb.mxu3 %v1915_v33  ;;  %615 = vmatpush.bf16.msrb.mxu2 %v1876_v57 }
  0x43   :  { %604 = vmatpush.bf16.msrb.mxu1 %v1765_v45 }
  0x44   :  { %537 = vmatpush.bf16.msrb.mxu0 %v1920_v39  ;;  %292 = vmatmul.bf16.gmra.mxu2 %v50_v13 }
  0x45   :  { %524 = vmatpush.bf16.msrb.mxu3 %v1923_v41  ;;  %616 = vmatpush.bf16.msrb.mxu2 %v1894_v6 }
  0x47   :  { %239 = vmatmul.bf16.gmra.mxu0 %v51_v47  ;;  %605 = vmatpush.bf16.msrb.mxu1 %v1786_v58 }
  0x48   :  { %695 = vmatpush.bf16.msra.mxu0 %v1702_v7  ;;  %525 = vmatmul.bf16.vlgmr.msrb.gmra.mxu3 %v1656_v40 }
  0x49   :  { %625 = vmatpush.bf16.msra.mxu3 %v1809_v12  ;;  %617 = vmatpush.bf16.msrb.mxu2 %v1902_v20 }
  0x4b   :  { %606 = vmatpush.bf16.msrb.mxu1 %v1807_v10 }
  0x4c   :  { %696 = vmatpush.bf16.msra.mxu0 %v1705_v11 }
  0x4d   :  { %626 = vmatpush.bf16.msra.mxu3 %v1829_v28  ;;  %618 = vmatpush.bf16.msrb.mxu2 %v1915_v33 }
  0x4e   :  { %268 = vmatmul.bf16.gmra.mxu1 %v51_v47 }
  0x4f   :  { %708 = vmatpush.bf16.msra.mxu1 %v1811_v15 }
  0x50   :  { %697 = vmatpush.bf16.msra.mxu0 %v1714_v17 }
  0x51   :  { %627 = vmatpush.bf16.msra.mxu3 %v1855_v43  ;;  %619 = vmatpush.bf16.msrb.mxu2 %v1923_v41 }
  0x53   :  { %709 = vmatpush.bf16.msra.mxu1 %v1832_v30 }
  0x54   :  { %698 = vmatpush.bf16.msra.mxu0 %v1723_v23  ;;  %297 = vmatmul.bf16.gmra.mxu2 %v51_v47 }
  0x55   :  { %628 = vmatpush.bf16.msra.mxu3 %v1873_v56  ;;  %721 = vmatpush.bf16.msra.mxu2 %v1809_v12 }
  0x57   :  { %244 = vmatmul.bf16.gmra.mxu0 %v52_v49  ;;  %710 = vmatpush.bf16.msra.mxu1 %v1858_v44 }
  0x58   :  { %699 = vmatpush.bf16.msra.mxu0 %v1744_v34 }
  0x59   :  { %629 = vmatpush.bf16.msra.mxu3 %v1891_v5  ;;  %722 = vmatpush.bf16.msra.mxu2 %v1829_v28 }
  0x5b   :  { %711 = vmatpush.bf16.msra.mxu1 %v1876_v57 }
  0x5c   :  { %700 = vmatpush.bf16.msra.mxu0 %v1765_v45 }
  0x5d   :  { %630 = vmatpush.bf16.msra.mxu3 %v1899_v19  ;;  %723 = vmatpush.bf16.msra.mxu2 %v1855_v43 }
  0x5e   :  { %273 = vmatmul.bf16.gmra.mxu1 %v52_v49 }
  0x5f   :  { %712 = vmatpush.bf16.msra.mxu1 %v1894_v6 }
  0x60   :  { %701 = vmatpush.bf16.msra.mxu0 %v1786_v58 }
  0x61   :  { %631 = vmatpush.bf16.msra.mxu3 %v1912_v32  ;;  %724 = vmatpush.bf16.msra.mxu2 %v1873_v56 }
  0x63   :  { %713 = vmatpush.bf16.msra.mxu1 %v1902_v20 }
  0x64   :  { %702 = vmatpush.bf16.msra.mxu0 %v1807_v10  ;;  %302 = vmatmul.bf16.gmra.mxu2 %v52_v49 }
  0x65   :  { %632 = vmatpush.bf16.msra.mxu3 %v1920_v39  ;;  %725 = vmatpush.bf16.msra.mxu2 %v1891_v5 }
  0x67   :  { %538 = vmatmul.bf16.vlgmr.msrb.gmra.mxu0 %v1656_v40  ;;  %714 = vmatpush.bf16.msra.mxu1 %v1915_v33 }
  0x68   :  { %804 = vmatpush.bf16.msrb.mxu0 %v1811_v15 }
  0x69   :  { %791 = vmatpush.bf16.msrb.mxu3 %v1702_v7  ;;  %726 = vmatpush.bf16.msra.mxu2 %v1899_v19 }
  0x6b   :  { %715 = vmatpush.bf16.msra.mxu1 %v1923_v41 }
  0x6c   :  { %805 = vmatpush.bf16.msrb.mxu0 %v1832_v30 }
  0x6d   :  { %792 = vmatpush.bf16.msrb.mxu3 %v1705_v11  ;;  %727 = vmatpush.bf16.msra.mxu2 %v1912_v32 }
  0x70   :  { %806 = vmatpush.bf16.msrb.mxu0 %v1858_v44 }
  0x71   :  { %793 = vmatpush.bf16.msrb.mxu3 %v1714_v17  ;;  %728 = vmatpush.bf16.msra.mxu2 %v1920_v39 }
  0x74   :  { %807 = vmatpush.bf16.msrb.mxu0 %v1876_v57 }
  0x75   :  { %794 = vmatpush.bf16.msrb.mxu3 %v1723_v23 }
  0x78   :  { %808 = vmatpush.bf16.msrb.mxu0 %v1894_v6 }
  0x79   :  { %795 = vmatpush.bf16.msrb.mxu3 %v1744_v34 }
  0x7c   :  { %809 = vmatpush.bf16.msrb.mxu0 %v1902_v20 }
  0x7d   :  { %796 = vmatpush.bf16.msrb.mxu3 %v1765_v45 }
  0x80   :  { %810 = vmatpush.bf16.msrb.mxu0 %v1915_v33 }
  0x81   :  { %797 = vmatpush.bf16.msrb.mxu3 %v1786_v58 }
  0x84   :  { %811 = vmatpush.bf16.msrb.mxu0 %v1923_v41 }
  0x85   :  { %798 = vmatpush.bf16.msrb.mxu3 %v1807_v10 }
  0xa4   :  { %v230_v40 = vpop.f32.mrf.mxu0 }
  0xa5   :  { %v231_v55 = vadd.f32 %v230_v40, %v87_v51 }
  0xab   :  { %v513_v52 = vpop.f32.mrf.mxu3  ;;  %v259_v4 = vpop.f32.mrf.mxu1 }
  0xac   :  { %v232_v53 = vpop.f32.mrf.mxu0  ;;  %v543_v61 = vadd.f32 %v513_v52, %v231_v55  ;;  %v260_v14 = vadd.f32 %v259_v4, %v2011_v2 }
  0xad   :  { %v2005_v54 = vadd.f32 %v232_v53, %v87_v51 }
  0xae   :  { %v1470_v63 = vmul.f32 -1.442695, %v543_v61 }
  0xb0   :  { %1546 = vpow2.f32 %v1470_v63  ;;  %v2033_v63 = vld [vmem:[%s2257_s4] ss:$0 sm:$0xff] }
  0xb3   :  { %v515_v59 = vpop.f32.mrf.mxu3 }
  0xb4   :  { %v235_v60 = vpop.f32.mrf.mxu0 }
  0xb5   :  { %v2007_v62 = vadd.f32 %v235_v60, %v87_v51 }
  0xb6   :  { %v1547_v8 = vpop.eup %1546 }
  0xb7   :  { %v288_v3 = vpop.f32.mrf.mxu2  ;;  %v547_v16 = vadd.f32 1.0, %v1547_v8 }
  0xb9   :  { %1548 = vrcp.f32 %v547_v16  ;;  %v559_v61 = vand.u32 2147483648, %v547_v16  ;;  %vm553_vm1 = vweird.f32 %v547_v16 }
  0xbc   :  { %v237_v0 = vpop.f32.mrf.mxu0 }
  0xbd   :  { %v2009_v1 = vadd.f32 %v237_v0, %v87_v51  ;;  %v557_v0 = vand.u32 2147483647, %v547_v16 }
  0xbf   :  { %v290_v25 = vpop.f32.mrf.mxu2  ;;  %v1549_v35 = vpop.eup %1548  ;;  %vm558_vm3 = vcmp.eq.f32.partialorder %v557_v0, 8.507059e+37 }
  0xc0   :  { %v2019_v26 = vadd.f32 %v290_v25, %v2016_v18  ;;  %v549_v38 = vmul.f32 %v1549_v35, %v547_v16  ;;  %vm554_vm0 = vweird.f32 %v1549_v35 }
  0xc1   :  { %vm555_vm2 = vmor %vm553_vm1, %vm554_vm0 }
  0xc2   :  { %v550_v21 = vsub.f32 1.0, %v549_v38 }
  0xc4   :  { %v240_v9 = vpop.f32.mrf.mxu0  ;;  %v551_v40 = vmul.f32 %v1549_v35, %v550_v21 }
  0xc5   :  { %v2013_v13 = vadd.f32 %v240_v9, %v87_v51 }
  0xc6   :  { %v552_v60 = vadd.f32 %v1549_v35, %v551_v40 }
  0xc7   :  { %v293_v48 = vpop.f32.mrf.mxu2 }
  0xc8   :  { %v2026_v49 = vadd.f32 %v293_v48, %v2016_v18 }
  0xcb   :  { %v526_v22 = vpop.f32.mrf.mxu3 }
  0xcc   :  { %v563_v24 = vadd.f32 %v526_v22, %v260_v14  ;;  %v242_v29 = vpop.f32.mrf.mxu0  ;;  %v556_v14 = vsel %vm555_vm2, %v1549_v35, %v552_v60  ;;  %v560_v22 = vor.u32 1.1754944e-38, %v559_v61 }
  0xcd   :  { %v2021_v31 = vadd.f32 %v242_v29, %v87_v51 }
  0xce   :  { %v1471_v27 = vmul.f32 -1.442695, %v563_v24  ;;  %v289_v24 = vadd.f32 %v288_v3, %v2016_v18 }
  0xcf   :  { %v295_v4 = vpop.f32.mrf.mxu2 }
  0xd0   :  { %1550 = vpow2.f32 %v1471_v27  ;;  %v2036_v9 = vadd.f32 %v295_v4, %v2016_v18  ;;  %v561_v27 = vsel %vm558_vm3, %v560_v22, %v556_v14  ;;  %v261_v14 = vpop.f32.mrf.mxu1 }
  0xd3   :  { %v528_v36 = vpop.f32.mrf.mxu3 }
  0xd4   :  { %v245_v46 = vpop.f32.mrf.mxu0 }
  0xd5   :  { %v2023_v47 = vadd.f32 %v245_v46, %v87_v51 }
  0xd6   :  { %v1551_v37 = vpop.eup %1550 }
  0xd7   :  { %v567_v42 = vadd.f32 1.0, %v1551_v37  ;;  %v298_v46 = vpop.f32.mrf.mxu2 }
  0xd8   :  { %v2041_v35 = vadd.f32 %v298_v46, %v2016_v18  ;;  %v262_v46 = vadd.f32 %v261_v14, %v2011_v2 }
  0xd9   :  { %1552 = vrcp.f32 %v567_v42  ;;  %vm573_vm4 = vweird.f32 %v567_v42  ;;  %v579_v36 = vand.u32 2147483648, %v567_v42  ;;  %v577_v37 = vand.u32 2147483647, %v567_v42 }
  0xdb   :  { %v580_v48 = vor.u32 1.1754944e-38, %v579_v36  ;;  %vm578_vm7 = vcmp.eq.f32.partialorder %v577_v37, 8.507059e+37 }
  0xdc   :  { %v247_v52 = vpop.f32.mrf.mxu0 }
  0xdd   :  { %v2028_v55 = vadd.f32 %v247_v52, %v87_v51 }
  0xdf   :  { %v1553_v50 = vpop.eup %1552  ;;  %2261 = vst [vmem:[#allocation8_spill] sm:$0xff] %v2028_v55 }
  0xe0   :  { %v569_v53 = vmul.f32 %v1553_v50, %v567_v42  ;;  %vm574_vm5 = vweird.f32 %v1553_v50 }
  0xe1   :  { %vm575_vm6 = vmor %vm573_vm4, %vm574_vm5 }
  0xe2   :  { %v570_v59 = vsub.f32 1.0, %v569_v53 }
  0xe4   :  { %v571_v8 = vmul.f32 %v1553_v50, %v570_v59  ;;  %v539_v51 = vpop.f32.mrf.mxu0  ;;  %v300_v59 = vpop.f32.mrf.mxu2 }
  0xe5   :  { %v583_v25 = vadd.f32 %v2033_v63, %v539_v51  ;;  %v2044_v0 = vadd.f32 %v300_v59, %v2016_v18  ;;  %v2080_v51 = vpop.f32.mrf.mxu1 }
  0xe6   :  { %v572_v29 = vadd.f32 %v1553_v50, %v571_v8 }
  0xe7   :  { %v584_v16 = vmul.f32 %v583_v25, %v561_v27 }
  0xe8   :  { %v576_v21 = vsel %vm575_vm6, %v1553_v50, %v572_v29 }
  0xe9   :  { %v585_v38 = vadd.f32 %v584_v16, %v289_v24  ;;  %v581_v40 = vsel %vm578_vm7, %v580_v48, %v576_v21 }
  0xea   :  { %v587_v52 = vsub.f32 1.0, %v581_v40  ;;  %v589_v61 = vmul.f32 0.0, %v581_v40 }
  0xeb   :  { %1554 = vtanh.f32 %v585_v38 }
  0xec   :  { %v541_v3 = vpop.f32.mrf.mxu0  ;;  %v303_v4 = vpop.f32.mrf.mxu2 }
  0xed   :  { %v2055_v8 = vadd.f32 %v303_v4, %v2016_v18  ;;  %v2082_v22 = vpop.f32.mrf.mxu1 }
  0xf1   :  { %v1555_v53 = vpop.eup %1554 }
  0xf2   :  { %v588_v60 = vmul.f32 %v1555_v53, %v587_v52 }
  0xf4   :  { %v2046_v42 = vadd.f32 %v589_v61, %v588_v60  ;;  %v2092_v36 = vpop.f32.mrf.mxu2 }
  0xf5   :  { %v2084_v24 = vpop.f32.mrf.mxu1  ;;  %2263 = vst [vmem:[#allocation10_spill] sm:$0xff] %v2092_v36 }
  0xf6   :  { %v591_v50 = vpack.c.bf16 %v2046_v42, %v2046_v42 }
  0xf8   :  { %592 = vst [vmem:[%s2258_s5] sm:$0xf] %v591_v50  ;;  %607 = vmatmul.bf16.vlgmr.msrb.gmra.mxu1 %v591_v50  ;;  %620 = vmatmul.bf16.vlgmr.msrb.gmra.mxu2 %v591_v50 }
  0xf9   :  { %633 = vmatmul.bf16.vlgmr.msra.gmra.mxu3 %v591_v50  ;;  %817 = vmatpush.bf16.msrb.mxu1 %v1809_v12 }
  0xfa   :  { %887 = vmatpush.bf16.msrb.mxu2 %v1702_v7  ;;  %900 = vmatpush.bf16.msra.mxu3 %v1811_v15 }
  0xfd   :  { %818 = vmatpush.bf16.msrb.mxu1 %v1829_v28  ;;  %v2086_v25 = vpop.f32.mrf.mxu1 }
  0xfe   :  { %888 = vmatpush.bf16.msrb.mxu2 %v1705_v11  ;;  %901 = vmatpush.bf16.msra.mxu3 %v1832_v30 }
 0x101   :  { %819 = vmatpush.bf16.msrb.mxu1 %v1855_v43 }
 0x102   :  { %889 = vmatpush.bf16.msrb.mxu2 %v1714_v17  ;;  %902 = vmatpush.bf16.msra.mxu3 %v1858_v44 }
 0x105   :  { %820 = vmatpush.bf16.msrb.mxu1 %v1873_v56  ;;  %v2088_v27 = vpop.f32.mrf.mxu1 }
 0x106   :  { %890 = vmatpush.bf16.msrb.mxu2 %v1723_v23  ;;  %903 = vmatpush.bf16.msra.mxu3 %v1876_v57 }
 0x109   :  { %821 = vmatpush.bf16.msrb.mxu1 %v1891_v5 }
 0x10a   :  { %891 = vmatpush.bf16.msrb.mxu2 %v1744_v34  ;;  %904 = vmatpush.bf16.msra.mxu3 %v1894_v6 }
 0x10d   :  { %822 = vmatpush.bf16.msrb.mxu1 %v1899_v19  ;;  %v2090_v29 = vpop.f32.mrf.mxu1 }
 0x10e   :  { %892 = vmatpush.bf16.msrb.mxu2 %v1765_v45  ;;  %905 = vmatpush.bf16.msra.mxu3 %v1902_v20  ;;  %2262 = vst [vmem:[#allocation9_spill] sm:$0xff] %v2090_v29 }
 0x111   :  { %823 = vmatpush.bf16.msrb.mxu1 %v1912_v32 }
 0x112   :  { %893 = vmatpush.bf16.msrb.mxu2 %v1786_v58  ;;  %906 = vmatpush.bf16.msra.mxu3 %v1915_v33 }
 0x115   :  { %824 = vmatpush.bf16.msrb.mxu1 %v1920_v39 }
 0x116   :  { %894 = vmatpush.bf16.msrb.mxu2 %v1807_v10  ;;  %907 = vmatpush.bf16.msra.mxu3 %v1923_v41 }
 0x175   :  { %v608_v16 = vpop.f32.mrf.mxu1 }
 0x176   :  { %v638_v37 = vadd.f32 %v608_v16, %v2005_v54 }
 0x178   :  { %v1472_v38 = vmul.f32 -1.442695, %v638_v37 }
 0x17a   :  { %1556 = vpow2.f32 %v1472_v38 }
 0x17b   :  { %v621_v21 = vpop.f32.mrf.mxu2 }
 0x17c   :  { %v658_v48 = vadd.f32 %v621_v21, %v262_v46  ;;  %v634_v3 = vpop.f32.mrf.mxu3 }
 0x17d   :  { %v610_v40 = vpop.f32.mrf.mxu1 }
 0x17e   :  { %v1473_v52 = vmul.f32 -1.442695, %v658_v48 }
 0x180   :  { %v1557_v53 = vpop.eup %1556  ;;  %1558 = vpow2.f32 %v1473_v52 }
 0x181   :  { %v642_v59 = vadd.f32 1.0, %v1557_v53 }
 0x183   :  { %1560 = vrcp.f32 %v642_v59  ;;  %v623_v60 = vpop.f32.mrf.mxu2  ;;  %v654_v37 = vand.u32 2147483648, %v642_v59  ;;  %v652_v38 = vand.u32 2147483647, %v642_v59  ;;  %vm648_vm9 = vweird.f32 %v642_v59 }
 0x184   :  { %v636_v61 = vpop.f32.mrf.mxu3  ;;  %v678_v60 = vadd.f32 %v2033_v63, %v634_v3 }
 0x185   :  { %v655_v48 = vor.u32 1.1754944e-38, %v654_v37  ;;  %vm653_vm11 = vcmp.eq.f32.partialorder %v652_v38, 8.507059e+37 }
 0x186   :  { %v1559_v50 = vpop.eup %1558 }
 0x187   :  { %v662_v4 = vadd.f32 1.0, %v1559_v50 }
 0x189   :  { %v1561_v36 = vpop.eup %1560  ;;  %1562 = vrcp.f32 %v662_v4  ;;  %v674_v18 = vand.u32 2147483648, %v662_v4  ;;  %v672_v55 = vand.u32 2147483647, %v662_v4  ;;  %vm668_vm13 = vweird.f32 %v662_v4 }
 0x18a   :  { %v644_v54 = vmul.f32 %v1561_v36, %v642_v59  ;;  %vm649_vm8 = vweird.f32 %v1561_v36 }
 0x18b   :  { %vm650_vm10 = vmor %vm648_vm9, %vm649_vm8  ;;  %vm673_vm15 = vcmp.eq.f32.partialorder %v672_v55, 8.507059e+37 }
 0x18c   :  { %v645_v16 = vsub.f32 1.0, %v644_v54 }
 0x18e   :  { %v646_v14 = vmul.f32 %v1561_v36, %v645_v16 }
 0x18f   :  { %v1563_v46 = vpop.eup %1562 }
 0x190   :  { %v664_v21 = vmul.f32 %v1563_v46, %v662_v4  ;;  %v647_v40 = vadd.f32 %v1561_v36, %v646_v14  ;;  %vm669_vm12 = vweird.f32 %v1563_v46  ;;  %v675_v14 = vor.u32 1.1754944e-38, %v674_v18 }
 0x191   :  { %vm670_vm14 = vmor %vm668_vm13, %vm669_vm12  ;;  %v265_v18 = vadd.f32 %v2080_v51, %v2011_v2 }
 0x192   :  { %v665_v52 = vsub.f32 1.0, %v664_v21  ;;  %v651_v53 = vsel %vm650_vm10, %v1561_v36, %v647_v40 }
 0x193   :  { %v656_v61 = vsel %vm653_vm11, %v655_v48, %v651_v53 }
 0x194   :  { %v666_v50 = vmul.f32 %v1563_v46, %v665_v52  ;;  %v679_v54 = vmul.f32 %v678_v60, %v656_v61 }
 0x196   :  { %v680_v16 = vadd.f32 %v679_v54, %v2019_v26  ;;  %v667_v29 = vadd.f32 %v1563_v46, %v666_v50 }
 0x198   :  { %1564 = vtanh.f32 %v680_v16  ;;  %v671_v59 = vsel %vm670_vm14, %v1563_v46, %v667_v29 }
 0x199   :  { %v676_v37 = vsel %vm673_vm15, %v675_v14, %v671_v59 }
 0x19a   :  { %v682_v36 = vsub.f32 1.0, %v676_v37  ;;  %v684_v3 = vmul.f32 %v676_v37, %v2046_v42 }
 0x19e   :  { %v1565_v38 = vpop.eup %1564 }
 0x19f   :  { %v683_v21 = vmul.f32 %v1565_v38, %v682_v36 }
 0x1a1   :  { %v2099_v40 = vadd.f32 %v684_v3, %v683_v21 }
 0x1a3   :  { %v686_v48 = vpack.c.bf16 %v2099_v40, %v2099_v40 }
 0x1a5   :  { %1474 = vst [vmem:[%s2258_s5 + $0x4] sm:$0xf] %v686_v48  ;;  %703 = vmatmul.bf16.vlgmr.msra.gmra.mxu0 %v686_v48  ;;  %716 = vmatmul.bf16.vlgmr.msra.gmra.mxu1 %v686_v48 }
 0x1a6   :  { %729 = vmatmul.bf16.vlgmr.msra.gmra.mxu2 %v686_v48  ;;  %913 = vmatpush.bf16.msra.mxu0 %v1809_v12 }
 0x1a7   :  { %983 = vmatpush.bf16.msra.mxu1 %v1702_v7  ;;  %996 = vmatpush.bf16.msra.mxu2 %v1811_v15 }
 0x1aa   :  { %914 = vmatpush.bf16.msra.mxu0 %v1829_v28 }
 0x1ab   :  { %984 = vmatpush.bf16.msra.mxu1 %v1705_v11  ;;  %997 = vmatpush.bf16.msra.mxu2 %v1832_v30 }
 0x1ae   :  { %915 = vmatpush.bf16.msra.mxu0 %v1855_v43 }
 0x1af   :  { %985 = vmatpush.bf16.msra.mxu1 %v1714_v17  ;;  %998 = vmatpush.bf16.msra.mxu2 %v1858_v44 }
 0x1b2   :  { %916 = vmatpush.bf16.msra.mxu0 %v1873_v56 }
 0x1b3   :  { %986 = vmatpush.bf16.msra.mxu1 %v1723_v23  ;;  %999 = vmatpush.bf16.msra.mxu2 %v1876_v57 }
 0x1b6   :  { %917 = vmatpush.bf16.msra.mxu0 %v1891_v5 }
 0x1b7   :  { %987 = vmatpush.bf16.msra.mxu1 %v1744_v34  ;;  %1000 = vmatpush.bf16.msra.mxu2 %v1894_v6 }
 0x1ba   :  { %918 = vmatpush.bf16.msra.mxu0 %v1899_v19 }
 0x1bb   :  { %988 = vmatpush.bf16.msra.mxu1 %v1765_v45  ;;  %1001 = vmatpush.bf16.msra.mxu2 %v1902_v20 }
 0x1be   :  { %919 = vmatpush.bf16.msra.mxu0 %v1912_v32 }
 0x1bf   :  { %989 = vmatpush.bf16.msra.mxu1 %v1786_v58  ;;  %1002 = vmatpush.bf16.msra.mxu2 %v1915_v33 }
 0x1c2   :  { %920 = vmatpush.bf16.msra.mxu0 %v1920_v39 }
 0x1c3   :  { %990 = vmatpush.bf16.msra.mxu1 %v1807_v10  ;;  %1003 = vmatpush.bf16.msra.mxu2 %v1923_v41 }
 0x222   :  { %v704_v26 = vpop.f32.mrf.mxu0  ;;  %v717_v55 = vpop.f32.mrf.mxu1 }
 0x223   :  { %v734_v42 = vadd.f32 %v704_v26, %v2007_v62  ;;  %v754_v29 = vadd.f32 %v717_v55, %v265_v18 }
 0x225   :  { %v1475_v4 = vmul.f32 -1.442695, %v734_v42  ;;  %v1476_v46 = vmul.f32 -1.442695, %v754_v29 }
 0x227   :  { %1566 = vpow2.f32 %v1475_v4 }
 0x228   :  { %1568 = vpow2.f32 %v1476_v46 }
 0x229   :  { %v730_v52 = vpop.f32.mrf.mxu2 }
 0x22a   :  { %v706_v53 = vpop.f32.mrf.mxu0  ;;  %v719_v60 = vpop.f32.mrf.mxu1  ;;  %v774_v29 = vadd.f32 %v2033_v63, %v730_v52 }
 0x22d   :  { %v1567_v61 = vpop.eup %1566 }
 0x22e   :  { %v1569_v50 = vpop.eup %1568  ;;  %v738_v54 = vadd.f32 1.0, %v1567_v61 }
 0x22f   :  { %v758_v16 = vadd.f32 1.0, %v1569_v50 }
 0x230   :  { %1570 = vrcp.f32 %v738_v54  ;;  %v750_v21 = vand.u32 2147483648, %v738_v54  ;;  %v748_v48 = vand.u32 2147483647, %v738_v54  ;;  %vm744_vm1 = vweird.f32 %v738_v54 }
 0x231   :  { %1572 = vrcp.f32 %v758_v16  ;;  %v732_v14 = vpop.f32.mrf.mxu2  ;;  %v770_v53 = vand.u32 2147483648, %v758_v16  ;;  %vm764_vm5 = vweird.f32 %v758_v16  ;;  %v768_v61 = vand.u32 2147483647, %v758_v16 }
 0x232   :  { %v751_v55 = vor.u32 1.1754944e-38, %v750_v21  ;;  %vm749_vm3 = vcmp.eq.f32.partialorder %v748_v48, 8.507059e+37 }
 0x233   :  { %vm769_vm7 = vcmp.eq.f32.partialorder %v768_v61, 8.507059e+37 }
 0x236   :  { %v1571_v51 = vpop.eup %1570 }
 0x237   :  { %v1573_v59 = vpop.eup %1572  ;;  %v740_v37 = vmul.f32 %v1571_v51, %v738_v54  ;;  %vm745_vm0 = vweird.f32 %v1571_v51 }
 0x238   :  { %v760_v36 = vmul.f32 %v1573_v59, %v758_v16  ;;  %vm746_vm2 = vmor %vm744_vm1, %vm745_vm0  ;;  %vm765_vm4 = vweird.f32 %v1573_v59 }
 0x239   :  { %v741_v62 = vsub.f32 1.0, %v740_v37  ;;  %vm766_vm6 = vmor %vm764_vm5, %vm765_vm4  ;;  %v771_v37 = vor.u32 1.1754944e-38, %v770_v53 }
 0x23a   :  { %v761_v38 = vsub.f32 1.0, %v760_v36 }
 0x23b   :  { %v742_v3 = vmul.f32 %v1571_v51, %v741_v62 }
 0x23c   :  { %v762_v18 = vmul.f32 %v1573_v59, %v761_v38 }
 0x23d   :  { %v743_v26 = vadd.f32 %v1571_v51, %v742_v3 }
 0x23e   :  { %v763_v46 = vadd.f32 %v1573_v59, %v762_v18 }
 0x23f   :  { %v747_v42 = vsel %vm746_vm2, %v1571_v51, %v743_v26 }
 0x240   :  { %v752_v4 = vsel %vm749_vm3, %v751_v55, %v747_v42  ;;  %v767_v14 = vsel %vm766_vm6, %v1573_v59, %v763_v46 }
 0x241   :  { %v775_v60 = vmul.f32 %v774_v29, %v752_v4  ;;  %v772_v54 = vsel %vm769_vm7, %v771_v37, %v767_v14 }
 0x242   :  { %v778_v36 = vsub.f32 1.0, %v772_v54  ;;  %v780_v52 = vmul.f32 %v772_v54, %v2099_v40 }
 0x243   :  { %v776_v50 = vadd.f32 %v775_v60, %v2026_v49  ;;  %v267_v49 = vadd.f32 %v2082_v22, %v2011_v2 }
 0x245   :  { %1574 = vtanh.f32 %v776_v50 }
 0x24b   :  { %v1575_v51 = vpop.eup %1574 }
 0x24c   :  { %v779_v62 = vmul.f32 %v1575_v51, %v778_v36 }
 0x24e   :  { %v2136_v38 = vadd.f32 %v780_v52, %v779_v62 }
 0x250   :  { %v782_v21 = vpack.c.bf16 %v2136_v38, %v2136_v38 }
 0x252   :  { %1477 = vst [vmem:[%s2258_s5 + $0x8] sm:$0xf] %v782_v21  ;;  %799 = vmatmul.bf16.vlgmr.msrb.gmra.mxu3 %v782_v21  ;;  %812 = vmatmul.bf16.vlgmr.msrb.gmra.mxu0 %v782_v21 }
 0x253   :  { %825 = vmatmul.bf16.vlgmr.msrb.gmra.mxu1 %v782_v21  ;;  %1009 = vmatpush.bf16.msrb.mxu3 %v1809_v12 }
 0x254   :  { %1079 = vmatpush.bf16.msrb.mxu0 %v1702_v7  ;;  %1092 = vmatpush.bf16.msrb.mxu1 %v1811_v15 }
 0x257   :  { %1010 = vmatpush.bf16.msrb.mxu3 %v1829_v28 }
 0x258   :  { %1080 = vmatpush.bf16.msrb.mxu0 %v1705_v11  ;;  %1093 = vmatpush.bf16.msrb.mxu1 %v1832_v30 }
 0x25b   :  { %1011 = vmatpush.bf16.msrb.mxu3 %v1855_v43 }
 0x25c   :  { %1081 = vmatpush.bf16.msrb.mxu0 %v1714_v17  ;;  %1094 = vmatpush.bf16.msrb.mxu1 %v1858_v44 }
 0x25f   :  { %1012 = vmatpush.bf16.msrb.mxu3 %v1873_v56 }
 0x260   :  { %1082 = vmatpush.bf16.msrb.mxu0 %v1723_v23  ;;  %1095 = vmatpush.bf16.msrb.mxu1 %v1876_v57 }
 0x263   :  { %1013 = vmatpush.bf16.msrb.mxu3 %v1891_v5 }
 0x264   :  { %1083 = vmatpush.bf16.msrb.mxu0 %v1744_v34  ;;  %1096 = vmatpush.bf16.msrb.mxu1 %v1894_v6 }
 0x267   :  { %1014 = vmatpush.bf16.msrb.mxu3 %v1899_v19 }
 0x268   :  { %1084 = vmatpush.bf16.msrb.mxu0 %v1765_v45  ;;  %1097 = vmatpush.bf16.msrb.mxu1 %v1902_v20 }
 0x26b   :  { %1015 = vmatpush.bf16.msrb.mxu3 %v1912_v32 }
 0x26c   :  { %1085 = vmatpush.bf16.msrb.mxu0 %v1786_v58  ;;  %1098 = vmatpush.bf16.msrb.mxu1 %v1915_v33 }
 0x26f   :  { %1016 = vmatpush.bf16.msrb.mxu3 %v1920_v39 }
 0x270   :  { %1086 = vmatpush.bf16.msrb.mxu0 %v1807_v10  ;;  %1099 = vmatpush.bf16.msrb.mxu1 %v1923_v41 }
 0x2cf   :  { %v813_v40 = vpop.f32.mrf.mxu0 }
 0x2d0   :  { %v850_v16 = vadd.f32 %v813_v40, %v267_v49  ;;  %v826_v59 = vpop.f32.mrf.mxu1 }
 0x2d1   :  { %v870_v49 = vadd.f32 %v2033_v63, %v826_v59 }
 0x2d2   :  { %v1479_v3 = vmul.f32 -1.442695, %v850_v16 }
 0x2d4   :  { %1576 = vpow2.f32 %v1479_v3 }
 0x2d5   :  { %v800_v48 = vpop.f32.mrf.mxu3 }
 0x2d6   :  { %v830_v18 = vadd.f32 %v800_v48, %v2009_v1 }
 0x2d7   :  { %v815_v26 = vpop.f32.mrf.mxu0 }
 0x2d8   :  { %v1478_v55 = vmul.f32 -1.442695, %v830_v18  ;;  %v828_v42 = vpop.f32.mrf.mxu1 }
 0x2da   :  { %v1577_v29 = vpop.eup %1576  ;;  %1578 = vpow2.f32 %v1478_v55 }
 0x2db   :  { %v854_v4 = vadd.f32 1.0, %v1577_v29 }
 0x2dd   :  { %v802_v46 = vpop.f32.mrf.mxu3  ;;  %1580 = vrcp.f32 %v854_v4  ;;  %v866_v48 = vand.u32 2147483648, %v854_v4  ;;  %vm860_vm13 = vweird.f32 %v854_v4  ;;  %v864_v26 = vand.u32 2147483647, %v854_v4 }
 0x2df   :  { %v867_v29 = vor.u32 1.1754944e-38, %v866_v48  ;;  %vm865_vm15 = vcmp.eq.f32.partialorder %v864_v26, 8.507059e+37 }
 0x2e0   :  { %v1579_v53 = vpop.eup %1578 }
 0x2e1   :  { %v834_v60 = vadd.f32 1.0, %v1579_v53 }
 0x2e3   :  { %1582 = vrcp.f32 %v834_v60  ;;  %v1581_v22 = vpop.eup %1580  ;;  %v846_v36 = vand.u32 2147483648, %v834_v60  ;;  %v844_v1 = vand.u32 2147483647, %v834_v60  ;;  %vm840_vm9 = vweird.f32 %v834_v60 }
 0x2e4   :  { %v856_v61 = vmul.f32 %v1581_v22, %v854_v4  ;;  %vm861_vm12 = vweird.f32 %v1581_v22 }
 0x2e5   :  { %v847_v21 = vor.u32 1.1754944e-38, %v846_v36  ;;  %vm845_vm11 = vcmp.eq.f32.partialorder %v844_v1, 8.507059e+37  ;;  %vm862_vm14 = vmor %vm860_vm13, %vm861_vm12 }
 0x2e6   :  { %v857_v37 = vsub.f32 1.0, %v856_v61 }
 0x2e8   :  { %v858_v62 = vmul.f32 %v1581_v22, %v857_v37 }
 0x2e9   :  { %v1583_v50 = vpop.eup %1582 }
 0x2ea   :  { %v836_v14 = vmul.f32 %v1583_v50, %v834_v60  ;;  %vm841_vm8 = vweird.f32 %v1583_v50  ;;  %v859_v3 = vadd.f32 %v1581_v22, %v858_v62 }
 0x2eb   :  { %vm842_vm10 = vmor %vm840_vm9, %vm841_vm8 }
 0x2ec   :  { %v837_v54 = vsub.f32 1.0, %v836_v14  ;;  %v863_v42 = vsel %vm862_vm14, %v1581_v22, %v859_v3 }
 0x2ed   :  { %v868_v46 = vsel %vm865_vm15, %v867_v29, %v863_v42 }
 0x2ee   :  { %v838_v51 = vmul.f32 %v1583_v50, %v837_v54  ;;  %v874_v53 = vsub.f32 1.0, %v868_v46  ;;  %v876_v61 = vmul.f32 %v868_v46, %v2136_v38 }
 0x2f0   :  { %v839_v52 = vadd.f32 %v1583_v50, %v838_v51 }
 0x2f2   :  { %v843_v40 = vsel %vm842_vm10, %v1583_v50, %v839_v52 }
 0x2f3   :  { %v848_v16 = vsel %vm845_vm11, %v847_v21, %v843_v40 }
 0x2f4   :  { %v871_v18 = vmul.f32 %v870_v49, %v848_v16 }
 0x2f6   :  { %v872_v55 = vadd.f32 %v871_v18, %v2036_v9 }
 0x2f8   :  { %1584 = vtanh.f32 %v872_v55 }
 0x2fe   :  { %v1585_v60 = vpop.eup %1584 }
 0x2ff   :  { %v875_v59 = vmul.f32 %v1585_v60, %v874_v53 }
 0x301   :  { %v2173_v50 = vadd.f32 %v876_v61, %v875_v59 }
 0x303   :  { %v878_v14 = vpack.c.bf16 %v2173_v50, %v2173_v50 }
 0x305   :  { %1480 = vst [vmem:[%s2258_s5 + $0xc] sm:$0xf] %v878_v14  ;;  %895 = vmatmul.bf16.vlgmr.msrb.gmra.mxu2 %v878_v14  ;;  %908 = vmatmul.bf16.vlgmr.msra.gmra.mxu3 %v878_v14 }
 0x306   :  { %921 = vmatmul.bf16.vlgmr.msra.gmra.mxu0 %v878_v14  ;;  %1105 = vmatpush.bf16.msrb.mxu2 %v1809_v12 }
 0x307   :  { %1175 = vmatpush.bf16.msra.mxu3 %v1702_v7  ;;  %1188 = vmatpush.bf16.msra.mxu0 %v1811_v15 }
 0x30a   :  { %1106 = vmatpush.bf16.msrb.mxu2 %v1829_v28 }
 0x30b   :  { %1176 = vmatpush.bf16.msra.mxu3 %v1705_v11  ;;  %1189 = vmatpush.bf16.msra.mxu0 %v1832_v30  ;;  %v270_v11 = vadd.f32 %v2084_v24, %v2011_v2 }
 0x30e   :  { %1107 = vmatpush.bf16.msrb.mxu2 %v1855_v43 }
 0x30f   :  { %1177 = vmatpush.bf16.msra.mxu3 %v1714_v17  ;;  %1190 = vmatpush.bf16.msra.mxu0 %v1858_v44 }
 0x312   :  { %1108 = vmatpush.bf16.msrb.mxu2 %v1873_v56 }
 0x313   :  { %1178 = vmatpush.bf16.msra.mxu3 %v1723_v23  ;;  %1191 = vmatpush.bf16.msra.mxu0 %v1876_v57 }
 0x316   :  { %1109 = vmatpush.bf16.msrb.mxu2 %v1891_v5 }
 0x317   :  { %1179 = vmatpush.bf16.msra.mxu3 %v1744_v34  ;;  %1192 = vmatpush.bf16.msra.mxu0 %v1894_v6 }
 0x31a   :  { %1110 = vmatpush.bf16.msrb.mxu2 %v1899_v19 }
 0x31b   :  { %1180 = vmatpush.bf16.msra.mxu3 %v1765_v45  ;;  %1193 = vmatpush.bf16.msra.mxu0 %v1902_v20 }
 0x31e   :  { %1111 = vmatpush.bf16.msrb.mxu2 %v1912_v32 }
 0x31f   :  { %1181 = vmatpush.bf16.msra.mxu3 %v1786_v58  ;;  %1194 = vmatpush.bf16.msra.mxu0 %v1915_v33 }
 0x322   :  { %1112 = vmatpush.bf16.msrb.mxu2 %v1920_v39 }
 0x323   :  { %1182 = vmatpush.bf16.msra.mxu3 %v1807_v10  ;;  %1195 = vmatpush.bf16.msra.mxu0 %v1923_v41 }
 0x383   :  { %v922_v7 = vpop.f32.mrf.mxu0 }
 0x384   :  { %v966_v62 = vadd.f32 %v2033_v63, %v922_v7 }
 0x388   :  { %v896_v17 = vpop.f32.mrf.mxu2  ;;  %v909_v23 = vpop.f32.mrf.mxu3 }
 0x389   :  { %v926_v34 = vadd.f32 %v896_v17, %v2013_v13  ;;  %v946_v45 = vadd.f32 %v909_v23, %v270_v11 }
 0x38b   :  { %v1481_v15 = vmul.f32 -1.442695, %v926_v34  ;;  %v1482_v30 = vmul.f32 -1.442695, %v946_v45  ;;  %v924_v58 = vpop.f32.mrf.mxu0 }
 0x38d   :  { %1586 = vpow2.f32 %v1481_v15 }
 0x38e   :  { %1588 = vpow2.f32 %v1482_v30 }
 0x390   :  { %v898_v44 = vpop.f32.mrf.mxu2  ;;  %v911_v57 = vpop.f32.mrf.mxu3 }
 0x393   :  { %v1587_v6 = vpop.eup %1586 }
 0x394   :  { %v1589_v10 = vpop.eup %1588  ;;  %v930_v20 = vadd.f32 1.0, %v1587_v6 }
 0x395   :  { %v950_v33 = vadd.f32 1.0, %v1589_v10 }
 0x396   :  { %1590 = vrcp.f32 %v930_v20  ;;  %v942_v13 = vand.u32 2147483648, %v930_v20  ;;  %v940_v54 = vand.u32 2147483647, %v930_v20  ;;  %vm936_vm1 = vweird.f32 %v930_v20 }
 0x397   :  { %1592 = vrcp.f32 %v950_v33  ;;  %v962_v16 = vand.u32 2147483648, %v950_v33  ;;  %vm956_vm5 = vweird.f32 %v950_v33  ;;  %v960_v3 = vand.u32 2147483647, %v950_v33 }
 0x398   :  { %v943_v1 = vor.u32 1.1754944e-38, %v942_v13  ;;  %vm941_vm3 = vcmp.eq.f32.partialorder %v940_v54, 8.507059e+37 }
 0x399   :  { %v963_v26 = vor.u32 1.1754944e-38, %v962_v16  ;;  %vm961_vm7 = vcmp.eq.f32.partialorder %v960_v3, 8.507059e+37 }
 0x39c   :  { %v1591_v41 = vpop.eup %1590 }
 0x39d   :  { %v1593_v9 = vpop.eup %1592  ;;  %v932_v24 = vmul.f32 %v1591_v41, %v930_v20  ;;  %vm937_vm0 = vweird.f32 %v1591_v41 }
 0x39e   :  { %v952_v38 = vmul.f32 %v1593_v9, %v950_v33  ;;  %vm938_vm2 = vmor %vm936_vm1, %vm937_vm0  ;;  %vm957_vm4 = vweird.f32 %v1593_v9 }
 0x39f   :  { %v933_v4 = vsub.f32 1.0, %v932_v24  ;;  %vm958_vm6 = vmor %vm956_vm5, %vm957_vm4 }
 0x3a0   :  { %v953_v22 = vsub.f32 1.0, %v952_v38 }
 0x3a1   :  { %v934_v37 = vmul.f32 %v1591_v41, %v933_v4 }
 0x3a2   :  { %v954_v36 = vmul.f32 %v1593_v9, %v953_v22 }
 0x3a3   :  { %v935_v51 = vadd.f32 %v1591_v41, %v934_v37 }
 0x3a4   :  { %v955_v49 = vadd.f32 %v1593_v9, %v954_v36 }
 0x3a5   :  { %v939_v52 = vsel %vm938_vm2, %v1591_v41, %v935_v51 }
 0x3a6   :  { %v944_v21 = vsel %vm941_vm3, %v943_v1, %v939_v52  ;;  %v959_v18 = vsel %vm958_vm6, %v1593_v9, %v955_v49 }
 0x3a7   :  { %v967_v40 = vmul.f32 %v966_v62, %v944_v21  ;;  %v964_v55 = vsel %vm961_vm7, %v963_v26, %v959_v18 }
 0x3a8   :  { %v970_v42 = vsub.f32 1.0, %v964_v55  ;;  %v972_v53 = vmul.f32 %v964_v55, %v2173_v50 }
 0x3a9   :  { %v968_v48 = vadd.f32 %v967_v40, %v2041_v35 }
 0x3ab   :  { %1594 = vtanh.f32 %v968_v48 }
 0x3b1   :  { %v1595_v29 = vpop.eup %1594 }
 0x3b2   :  { %v971_v46 = vmul.f32 %v1595_v29, %v970_v42 }
 0x3b4   :  { %v2210_v60 = vadd.f32 %v972_v53, %v971_v46 }
 0x3b6   :  { %v974_v59 = vpack.c.bf16 %v2210_v60, %v2210_v60 }
 0x3b8   :  { %1483 = vst [vmem:[%s2258_s5 + $0x10] sm:$0xf] %v974_v59  ;;  %991 = vmatmul.bf16.vlgmr.msra.gmra.mxu1 %v974_v59  ;;  %1004 = vmatmul.bf16.vlgmr.msra.gmra.mxu2 %v974_v59 }
 0x3b9   :  { %1017 = vmatmul.bf16.vlgmr.msrb.gmra.mxu3 %v974_v59  ;;  %1201 = vmatpush.bf16.msra.mxu1 %v1809_v12  ;;  %v272_v12 = vadd.f32 %v2086_v25, %v2011_v2 }
 0x3bd   :  { %1202 = vmatpush.bf16.msra.mxu1 %v1829_v28 }
 0x3c1   :  { %1203 = vmatpush.bf16.msra.mxu1 %v1855_v43 }
 0x3c5   :  { %1204 = vmatpush.bf16.msra.mxu1 %v1873_v56 }
 0x3c9   :  { %1205 = vmatpush.bf16.msra.mxu1 %v1891_v5 }
 0x3cd   :  { %1206 = vmatpush.bf16.msra.mxu1 %v1899_v19 }
 0x3d1   :  { %1207 = vmatpush.bf16.msra.mxu1 %v1912_v32 }
 0x3d5   :  { %1208 = vmatpush.bf16.msra.mxu1 %v1920_v39 }
 0x435   :  { %v992_v35 = vpop.f32.mrf.mxu1 }
 0x436   :  { %v1022_v61 = vadd.f32 %v992_v35, %v2021_v31 }
 0x438   :  { %v1484_v50 = vmul.f32 -1.442695, %v1022_v61 }
 0x43a   :  { %1596 = vpow2.f32 %v1484_v50 }
 0x43b   :  { %v1005_v28 = vpop.f32.mrf.mxu2 }
 0x43c   :  { %v1042_v43 = vadd.f32 %v1005_v28, %v272_v12  ;;  %v1018_v14 = vpop.f32.mrf.mxu3 }
 0x43d   :  { %v994_v56 = vpop.f32.mrf.mxu1  ;;  %v1062_v20 = vadd.f32 %v2033_v63, %v1018_v14 }
 0x43e   :  { %v1485_v7 = vmul.f32 -1.442695, %v1042_v43 }
 0x440   :  { %v1597_v5 = vpop.eup %1596  ;;  %1598 = vpow2.f32 %v1485_v7 }
 0x441   :  { %v1026_v19 = vadd.f32 1.0, %v1597_v5 }
 0x443   :  { %1600 = vrcp.f32 %v1026_v19  ;;  %v1007_v32 = vpop.f32.mrf.mxu2  ;;  %v1038_v45 = vand.u32 2147483648, %v1026_v19  ;;  %v1036_v15 = vand.u32 2147483647, %v1026_v19  ;;  %vm1032_vm9 = vweird.f32 %v1026_v19 }
 0x444   :  { %v1020_v11 = vpop.f32.mrf.mxu3 }
 0x445   :  { %v1039_v57 = vor.u32 1.1754944e-38, %v1038_v45  ;;  %vm1037_vm11 = vcmp.eq.f32.partialorder %v1036_v15, 8.507059e+37 }
 0x446   :  { %v1599_v39 = vpop.eup %1598 }
 0x447   :  { %v1046_v17 = vadd.f32 1.0, %v1599_v39 }
 0x449   :  { %v1601_v23 = vpop.eup %1600  ;;  %1602 = vrcp.f32 %v1046_v17  ;;  %v1058_v9 = vand.u32 2147483648, %v1046_v17  ;;  %v1056_v38 = vand.u32 2147483647, %v1046_v17  ;;  %vm1052_vm13 = vweird.f32 %v1046_v17 }
 0x44a   :  { %v1028_v31 = vmul.f32 %v1601_v23, %v1026_v19  ;;  %vm1033_vm8 = vweird.f32 %v1601_v23 }
 0x44b   :  { %vm1034_vm10 = vmor %vm1032_vm9, %vm1033_vm8  ;;  %v1059_v22 = vor.u32 1.1754944e-38, %v1058_v9  ;;  %vm1057_vm15 = vcmp.eq.f32.partialorder %v1056_v38, 8.507059e+37  ;;  %v2265_v38 = vld [vmem:[#allocation8_spill] sm:$0xff] }
 0x44c   :  { %v1029_v34 = vsub.f32 1.0, %v1028_v31 }
 0x44e   :  { %v1030_v25 = vmul.f32 %v1601_v23, %v1029_v34 }
 0x44f   :  { %v1603_v30 = vpop.eup %1602 }
 0x450   :  { %v1048_v58 = vmul.f32 %v1603_v30, %v1046_v17  ;;  %v1031_v44 = vadd.f32 %v1601_v23, %v1030_v25  ;;  %vm1053_vm12 = vweird.f32 %v1603_v30 }
 0x451   :  { %vm1054_vm14 = vmor %vm1052_vm13, %vm1053_vm12 }
 0x452   :  { %v1049_v6 = vsub.f32 1.0, %v1048_v58  ;;  %v1035_v10 = vsel %vm1034_vm10, %v1601_v23, %v1031_v44 }
 0x453   :  { %v1040_v33 = vsel %vm1037_vm11, %v1039_v57, %v1035_v10 }
 0x454   :  { %v1050_v41 = vmul.f32 %v1603_v30, %v1049_v6  ;;  %v1063_v24 = vmul.f32 %v1062_v20, %v1040_v33 }
 0x456   :  { %v1064_v4 = vadd.f32 %v1063_v24, %v2044_v0  ;;  %v1051_v13 = vadd.f32 %v1603_v30, %v1050_v41  ;;  %v275_v0 = vadd.f32 %v2088_v27, %v2011_v2 }
 0x458   :  { %1604 = vtanh.f32 %v1064_v4  ;;  %v1055_v37 = vsel %vm1054_vm14, %v1603_v30, %v1051_v13 }
 0x459   :  { %v1060_v54 = vsel %vm1057_vm15, %v1059_v22, %v1055_v37 }
 0x45a   :  { %v1066_v36 = vsub.f32 1.0, %v1060_v54  ;;  %v1068_v62 = vmul.f32 %v1060_v54, %v2210_v60 }
 0x45e   :  { %v1605_v51 = vpop.eup %1604 }
 0x45f   :  { %v1067_v1 = vmul.f32 %v1605_v51, %v1066_v36 }
 0x461   :  { %v1069_v52 = vadd.f32 %v1068_v62, %v1067_v1 }
 0x463   :  { %v1070_v21 = vpack.c.bf16 %v1069_v52, %v1069_v52 }
 0x465   :  { %1486 = vst [vmem:[%s2258_s5 + $0x14] sm:$0xf] %v1070_v21  ;;  %1087 = vmatmul.bf16.vlgmr.msrb.gmra.mxu0 %v1070_v21  ;;  %1100 = vmatmul.bf16.vlgmr.msrb.gmra.mxu1 %v1070_v21 }
 0x466   :  { %1113 = vmatmul.bf16.vlgmr.msrb.gmra.mxu2 %v1070_v21 }
 0x4e2   :  { %v1088_v49 = vpop.f32.mrf.mxu0  ;;  %v1101_v40 = vpop.f32.mrf.mxu1 }
 0x4e3   :  { %v1118_v16 = vadd.f32 %v1088_v49, %v2023_v47  ;;  %v1138_v3 = vadd.f32 %v1101_v40, %v275_v0 }
 0x4e5   :  { %v1487_v48 = vmul.f32 -1.442695, %v1118_v16  ;;  %v1488_v18 = vmul.f32 -1.442695, %v1138_v3 }
 0x4e7   :  { %1606 = vpow2.f32 %v1487_v48 }
 0x4e8   :  { %1608 = vpow2.f32 %v1488_v18 }
 0x4e9   :  { %v1114_v26 = vpop.f32.mrf.mxu2 }
 0x4ea   :  { %v1090_v55 = vpop.f32.mrf.mxu0  ;;  %v1103_v42 = vpop.f32.mrf.mxu1  ;;  %v1158_v32 = vadd.f32 %v2033_v63, %v1114_v26 }
 0x4eb   :  { %v1626_v42 = vld [vmem:[%s2257_s4] ss:$0 sm:$0xff] }
 0x4ed   :  { %v1607_v29 = vpop.eup %1606 }
 0x4ee   :  { %v1609_v46 = vpop.eup %1608  ;;  %v1122_v53 = vadd.f32 1.0, %v1607_v29 }
 0x4ef   :  { %v1142_v60 = vadd.f32 1.0, %v1609_v46 }
 0x4f0   :  { %1610 = vrcp.f32 %v1122_v53  ;;  %v1134_v28 = vand.u32 2147483648, %v1122_v53  ;;  %v1132_v14 = vand.u32 2147483647, %v1122_v53  ;;  %vm1128_vm1 = vweird.f32 %v1122_v53 }
 0x4f1   :  { %1612 = vrcp.f32 %v1142_v60  ;;  %v1116_v59 = vpop.f32.mrf.mxu2  ;;  %v1154_v17 = vand.u32 2147483648, %v1142_v60  ;;  %vm1148_vm5 = vweird.f32 %v1142_v60  ;;  %v1152_v31 = vand.u32 2147483647, %v1142_v60 }
 0x4f2   :  { %v1135_v5 = vor.u32 1.1754944e-38, %v1134_v28  ;;  %vm1133_vm3 = vcmp.eq.f32.partialorder %v1132_v14, 8.507059e+37  ;;  %v2266_v59 = vld [vmem:[#allocation7_spill] sm:$0xff] }
 0x4f3   :  { %v1155_v25 = vor.u32 1.1754944e-38, %v1154_v17  ;;  %vm1153_vm7 = vcmp.eq.f32.partialorder %v1152_v31, 8.507059e+37 }
 0x4f6   :  { %v1611_v27 = vpop.eup %1610 }
 0x4f7   :  { %v1613_v35 = vpop.eup %1612  ;;  %v1124_v61 = vmul.f32 %v1611_v27, %v1122_v53  ;;  %vm1129_vm0 = vweird.f32 %v1611_v27 }
 0x4f8   :  { %v1144_v50 = vmul.f32 %v1613_v35, %v1142_v60  ;;  %vm1130_vm2 = vmor %vm1128_vm1, %vm1129_vm0  ;;  %vm1149_vm4 = vweird.f32 %v1613_v35 }
 0x4f9   :  { %v1125_v47 = vsub.f32 1.0, %v1124_v61  ;;  %vm1150_vm6 = vmor %vm1148_vm5, %vm1149_vm4 }
 0x4fa   :  { %v1145_v12 = vsub.f32 1.0, %v1144_v50 }
 0x4fb   :  { %v1126_v43 = vmul.f32 %v1611_v27, %v1125_v47 }
 0x4fc   :  { %v1146_v56 = vmul.f32 %v1613_v35, %v1145_v12 }
 0x4fd   :  { %v1127_v7 = vadd.f32 %v1611_v27, %v1126_v43 }
 0x4fe   :  { %v1147_v39 = vadd.f32 %v1613_v35, %v1146_v56 }
 0x4ff   :  { %v1131_v19 = vsel %vm1130_vm2, %v1611_v27, %v1127_v7  ;;  %v2267_v27 = vld [vmem:[#allocation10_spill] sm:$0xff] }
 0x500   :  { %v1136_v11 = vsel %vm1133_vm3, %v1135_v5, %v1131_v19  ;;  %v1151_v45 = vsel %vm1150_vm6, %v1613_v35, %v1147_v39  ;;  %v306_v35 = vadd.f32 %v2267_v27, %v2266_v59 }
 0x501   :  { %v1159_v23 = vmul.f32 %v1158_v32, %v1136_v11  ;;  %v1156_v15 = vsel %vm1153_vm7, %v1155_v25, %v1151_v45 }
 0x502   :  { %v1162_v30 = vsub.f32 1.0, %v1156_v15  ;;  %v1164_v57 = vmul.f32 %v1156_v15, %v1069_v52 }
 0x503   :  { %v1160_v34 = vadd.f32 %v1159_v23, %v2055_v8  ;;  %v2264_v8 = vld [vmem:[#allocation9_spill] sm:$0xff] }
 0x504   :  { %v277_v10 = vadd.f32 %v2264_v8, %v2011_v2 }
 0x505   :  { %1614 = vtanh.f32 %v1160_v34 }
 0x50b   :  { %v1615_v58 = vpop.eup %1614 }
 0x50c   :  { %v1163_v44 = vmul.f32 %v1615_v58, %v1162_v30 }
 0x50e   :  { %v1165_v63 = vadd.f32 %v1164_v57, %v1163_v44 }
 0x510   :  { %v1166_v6 = vpack.c.bf16 %v1165_v63, %v1165_v63 }
 0x512   :  { %1489 = vst [vmem:[%s2258_s5 + $0x18] sm:$0xf] %v1166_v6  ;;  %1183 = vmatmul.bf16.vlgmr.msra.gmra.mxu3 %v1166_v6  ;;  %1196 = vmatmul.bf16.vlgmr.msra.gmra.mxu0 %v1166_v6 }
 0x513   :  { %1209 = vmatmul.bf16.vlgmr.msra.gmra.mxu1 %v1166_v6 }
 0x58f   :  { %v1197_v20 = vpop.f32.mrf.mxu0 }
 0x590   :  { %v1234_v33 = vadd.f32 %v1197_v20, %v277_v10  ;;  %v1210_v41 = vpop.f32.mrf.mxu1 }
 0x591   :  { %v1254_v29 = vadd.f32 %v1626_v42, %v1210_v41 }
 0x592   :  { %v1491_v9 = vmul.f32 -1.442695, %v1234_v33 }
 0x594   :  { %1616 = vpow2.f32 %v1491_v9 }
 0x595   :  { %v1184_v24 = vpop.f32.mrf.mxu3 }
 0x596   :  { %v1214_v4 = vadd.f32 %v1184_v24, %v2265_v38 }
 0x597   :  { %v1199_v13 = vpop.f32.mrf.mxu0 }
 0x598   :  { %v1490_v22 = vmul.f32 -1.442695, %v1214_v4  ;;  %v1212_v37 = vpop.f32.mrf.mxu1 }
 0x59a   :  { %v1617_v54 = vpop.eup %1616  ;;  %1618 = vpow2.f32 %v1490_v22 }
 0x59b   :  { %v1238_v36 = vadd.f32 1.0, %v1617_v54 }
 0x59d   :  { %v1186_v51 = vpop.f32.mrf.mxu3  ;;  %1620 = vrcp.f32 %v1238_v36  ;;  %v1250_v61 = vand.u32 2147483648, %v1238_v36  ;;  %vm1244_vm13 = vweird.f32 %v1238_v36  ;;  %v1248_v47 = vand.u32 2147483647, %v1238_v36 }
 0x59f   :  { %v1251_v43 = vor.u32 1.1754944e-38, %v1250_v61  ;;  %vm1249_vm15 = vcmp.eq.f32.partialorder %v1248_v47, 8.507059e+37 }
 0x5a0   :  { %v1619_v1 = vpop.eup %1618 }
 0x5a1   :  { %v1218_v62 = vadd.f32 1.0, %v1619_v1 }
 0x5a3   :  { %1622 = vrcp.f32 %v1218_v62  ;;  %v1621_v2 = vpop.eup %1620  ;;  %v1230_v16 = vand.u32 2147483648, %v1218_v62  ;;  %v1228_v48 = vand.u32 2147483647, %v1218_v62  ;;  %vm1224_vm9 = vweird.f32 %v1218_v62 }
 0x5a4   :  { %v1240_v52 = vmul.f32 %v1621_v2, %v1238_v36  ;;  %vm1245_vm12 = vweird.f32 %v1621_v2 }
 0x5a5   :  { %v1231_v55 = vor.u32 1.1754944e-38, %v1230_v16  ;;  %vm1229_vm11 = vcmp.eq.f32.partialorder %v1228_v48, 8.507059e+37  ;;  %vm1246_vm14 = vmor %vm1244_vm13, %vm1245_vm12 }
 0x5a6   :  { %v1241_v49 = vsub.f32 1.0, %v1240_v52 }
 0x5a8   :  { %v1242_v18 = vmul.f32 %v1621_v2, %v1241_v49 }
 0x5a9   :  { %v1623_v21 = vpop.eup %1622 }
 0x5aa   :  { %v1220_v0 = vmul.f32 %v1623_v21, %v1218_v62  ;;  %vm1225_vm8 = vweird.f32 %v1623_v21  ;;  %v1243_v53 = vadd.f32 %v1621_v2, %v1242_v18 }
 0x5ab   :  { %vm1226_vm10 = vmor %vm1224_vm9, %vm1225_vm8 }
 0x5ac   :  { %v1221_v40 = vsub.f32 1.0, %v1220_v0  ;;  %v1247_v28 = vsel %vm1246_vm14, %v1621_v2, %v1243_v53 }
 0x5ad   :  { %v1252_v14 = vsel %vm1249_vm15, %v1251_v43, %v1247_v28 }
 0x5ae   :  { %v1222_v3 = vmul.f32 %v1623_v21, %v1221_v40  ;;  %v1258_v56 = vsub.f32 1.0, %v1252_v14  ;;  %v1260_v5 = vmul.f32 %v1252_v14, %v1165_v63 }
 0x5b0   :  { %v1223_v26 = vadd.f32 %v1623_v21, %v1222_v3 }
 0x5b2   :  { %v1227_v46 = vsel %vm1226_vm10, %v1623_v21, %v1223_v26 }
 0x5b3   :  { %v1232_v60 = vsel %vm1229_vm11, %v1231_v55, %v1227_v46 }
 0x5b4   :  { %v1255_v50 = vmul.f32 %v1254_v29, %v1232_v60 }
 0x5b6   :  { %v1256_v12 = vadd.f32 %v1255_v50, %v306_v35 }
 0x5b8   :  { %1624 = vtanh.f32 %v1256_v12 }
 0x5be   :  { %v1625_v7 = vpop.eup %1624 }
 0x5bf   :  { %v1259_v19 = vmul.f32 %v1625_v7, %v1258_v56 }
 0x5c1   :  { %v1261_v32 = vadd.f32 %v1260_v5, %v1259_v19 }
 0x5c3   :  { %v1262_v11 = vpack.c.bf16 %v1261_v32, %v1261_v32 }
 0x5c5   :  { %1492 = vst [vmem:[%s2258_s5 + $0x1c] sm:$0xf] %v1262_v11 }
 0x5c6   :  { %1270 = vsyncpa [#allocation5], 1 }

// kernel: _lambda_.4
= control target key start
LH: loop header
LB: loop body
LE: loop exit
PB: predicated region body
PF: predicated region fallthrough
CT: control target
= control target key end

     0   :  { %s2318_s1 = inlined_call_operand.vmem [shape: bf16[128,384], index: 1, kind: input, shape index: {}]   ;;  %s2319_s3 = inlined_call_operand.vmem [shape: bf16[128,384], index: 3, kind: input, shape index: {}]   ;;  %s2320_s0 = inlined_call_operand.vmem [shape: bf16[8,8,128], index: 0, kind: input, shape index: {}]   ;;  %s2321_s4 = inlined_call_operand.vmem [shape: f32[1,128], index: 4, kind: input, shape index: {}]   ;;  %s2322_s2 = inlined_call_operand.vmem [shape: f32[1,384], index: 2, kind: input, shape index: {}]   ;;  %s2323_s5 = inlined_call_operand.vmem [shape: f32[8,128], index: 5, kind: output, shape index: {}]  }
   0x1   :  { %v1359_v0 = vld [vmem:[%s2318_s1 + $0xa8] sm:$0xf]  ;;  %v1507_v1 = vld [vmem:[%s2318_s1 + $0xb0] sm:$0xf0]  ;;  %v1347_v5 = vld [vmem:[%s2318_s1 + $0x90] sm:$0xf] }
   0x2   :  { %v1455_v2 = vld [vmem:[%s2319_s3 + $0xa8] sm:$0xf]  ;;  %v1360_v3 = vor.u32 %v1507_v1, %v1359_v0  ;;  %v1531_v4 = vld [vmem:[%s2319_s3 + $0xb0] sm:$0xf0]  ;;  %v1504_v6 = vld [vmem:[%s2318_s1 + $0x98] sm:$0xf0] }
   0x3   :  { %v1665_v7 = vor.u32 %v1531_v4, %v1455_v2  ;;  %v1443_v8 = vld [vmem:[%s2319_s3 + $0x90] sm:$0xf]  ;;  %v1528_v9 = vld [vmem:[%s2319_s3 + $0x98] sm:$0xf0]  ;;  %v1348_v10 = vor.u32 %v1504_v6, %v1347_v5  ;;  %v1335_v12 = vld [vmem:[%s2318_s1 + $0x78] sm:$0xf] }
   0x4   :  { %213 = vmatpush.bf16.msra.mxu0 %v1360_v3  ;;  %v1674_v11 = vor.u32 %v1528_v9, %v1443_v8  ;;  %v1501_v13 = vld [vmem:[%s2318_s1 + $0x80] sm:$0xf0]  ;;  %v1431_v14 = vld [vmem:[%s2319_s3 + $0x78] sm:$0xf]  ;;  %v1323_v18 = vld [vmem:[%s2318_s1 + $0x60] sm:$0xf] }
   0x5   :  { %496 = vmatpush.bf16.msra.mxu3 %v1665_v7  ;;  %v1525_v15 = vld [vmem:[%s2319_s3 + $0x80] sm:$0xf0]  ;;  %v1336_v16 = vor.u32 %v1501_v13, %v1335_v12  ;;  %v1498_v19 = vld [vmem:[%s2318_s1 + $0x68] sm:$0xf0]  ;;  %v1419_v20 = vld [vmem:[%s2319_s3 + $0x60] sm:$0xf] }
   0x6   :  { %v1689_v17 = vor.u32 %v1525_v15, %v1431_v14  ;;  %v1522_v21 = vld [vmem:[%s2319_s3 + $0x68] sm:$0xf0]  ;;  %v1324_v22 = vor.u32 %v1498_v19, %v1323_v18  ;;  %v1311_v23 = vld [vmem:[%s2318_s1 + $0x48] sm:$0xf]  ;;  %v1495_v25 = vld [vmem:[%s2318_s1 + $0x50] sm:$0xf0] }
   0x7   :  { %v1707_v24 = vor.u32 %v1522_v21, %v1419_v20  ;;  %v1506_v26 = vld [vmem:[%s2318_s1 + $0xac] sm:$0xf]  ;;  %v1361_v27 = vld [vmem:[%s2318_s1 + $0xb4] sm:$0xf0]  ;;  %v1407_v28 = vld [vmem:[%s2319_s3 + $0x48] sm:$0xf]  ;;  %v1312_v33 = vor.u32 %v1495_v25, %v1311_v23 }
   0x8   :  { %214 = vmatpush.bf16.msra.mxu0 %v1348_v10  ;;  %v1519_v29 = vld [vmem:[%s2319_s3 + $0x50] sm:$0xf0]  ;;  %v1364_v30 = vor.u32 %v1506_v26, %v1361_v27  ;;  %v1349_v32 = vld [vmem:[%s2318_s1 + $0x9c] sm:$0xf0]  ;;  %v1299_v34 = vld [vmem:[%s2318_s1 + $0x30] sm:$0xf] }
   0x9   :  { %497 = vmatpush.bf16.msra.mxu3 %v1674_v11  ;;  %v1503_v31 = vld [vmem:[%s2318_s1 + $0x94] sm:$0xf]  ;;  %v1734_v36 = vor.u32 %v1519_v29, %v1407_v28  ;;  %v1492_v37 = vld [vmem:[%s2318_s1 + $0x38] sm:$0xf0]  ;;  %v1337_v39 = vld [vmem:[%s2318_s1 + $0x84] sm:$0xf0] }
   0xa   :  { %242 = vmatpush.bf16.msra.mxu1 %v1364_v30  ;;  %v1352_v35 = vor.u32 %v1503_v31, %v1349_v32  ;;  %v1500_v38 = vld [vmem:[%s2318_s1 + $0x7c] sm:$0xf]  ;;  %v1395_v40 = vld [vmem:[%s2319_s3 + $0x30] sm:$0xf]  ;;  %v1300_v42 = vor.u32 %v1492_v37, %v1299_v34  ;;  %v1287_v43 = vld [vmem:[%s2318_s1 + $0x18] sm:$0xf] }
   0xb   :  { %v1516_v41 = vld [vmem:[%s2319_s3 + $0x38] sm:$0xf0]  ;;  %v1489_v44 = vld [vmem:[%s2318_s1 + $0x20] sm:$0xf0]  ;;  %v1340_v45 = vor.u32 %v1500_v38, %v1337_v39  ;;  %v1383_v47 = vld [vmem:[%s2319_s3 + $0x18] sm:$0xf] }
   0xc   :  { %215 = vmatpush.bf16.msra.mxu0 %v1336_v16  ;;  %v1758_v46 = vor.u32 %v1516_v41, %v1395_v40  ;;  %v1497_v48 = vld [vmem:[%s2318_s1 + $0x64] sm:$0xf]  ;;  %v1325_v49 = vld [vmem:[%s2318_s1 + $0x6c] sm:$0xf0]  ;;  %v1508_v52 = vld [vmem:[%s2318_s1 + $0xb8] sm:$0xf0]  ;;  %v1288_v54 = vor.u32 %v1489_v44, %v1287_v43 }
   0xd   :  { %498 = vmatpush.bf16.msra.mxu3 %v1689_v17  ;;  %v1513_v50 = vld [vmem:[%s2319_s3 + $0x20] sm:$0xf0]  ;;  %v1367_v51 = vld [vmem:[%s2318_s1 + $0xb0] sm:$0xf]  ;;  %v1275_v55 = vld [vmem:[%s2318_s1] sm:$0xf]  ;;  %v1328_v58 = vor.u32 %v1497_v48, %v1325_v49 }
   0xe   :  { %243 = vmatpush.bf16.msra.mxu1 %v1352_v35  ;;  %v1368_v53 = vor.u32 %v1508_v52, %v1367_v51  ;;  %v1486_v56 = vld [vmem:[%s2318_s1 + $0x8] sm:$0xf0]  ;;  %v1371_v57 = vld [vmem:[%s2319_s3] sm:$0xf]  ;;  %v1788_v59 = vor.u32 %v1513_v50, %v1383_v47  ;;  %v1313_v62 = vld [vmem:[%s2318_s1 + $0x54] sm:$0xf0] }
   0xf   :  { %v1510_v60 = vld [vmem:[%s2319_s3 + $0x8] sm:$0xf0]  ;;  %v1463_v63 = vld [vmem:[%s2319_s3 + $0xb0] sm:$0xf]  ;;  %v1532_v0 = vld [vmem:[%s2319_s3 + $0xb8] sm:$0xf0]  ;;  %v1276_v5 = vor.u32 %v1486_v56, %v1275_v55 }
  0x10   :  { %216 = vmatpush.bf16.msra.mxu0 %v1324_v22  ;;  %v1494_v61 = vld [vmem:[%s2318_s1 + $0x4c] sm:$0xf]  ;;  %271 = vmatpush.bf16.msra.mxu2 %v1368_v53  ;;  %v1355_v1 = vld [vmem:[%s2318_s1 + $0x98] sm:$0xf]  ;;  %v1505_v4 = vld [vmem:[%s2318_s1 + $0xa0] sm:$0xf0]  ;;  %v1818_v9 = vor.u32 %v1510_v60, %v1371_v57  ;;  %v1820_v10 = vor.u32 %v1532_v0, %v1463_v63 }
  0x11   :  { %499 = vmatpush.bf16.msra.mxu3 %v1707_v24  ;;  %v1530_v2 = vld [vmem:[%s2319_s3 + $0xac] sm:$0xf]  ;;  %v1457_v3 = vld [vmem:[%s2319_s3 + $0xb4] sm:$0xf0]  ;;  %v1316_v6 = vor.u32 %v1494_v61, %v1313_v62  ;;  %v1356_v8 = vor.u32 %v1505_v4, %v1355_v1  ;;  %v1491_v13 = vld [vmem:[%s2318_s1 + $0x34] sm:$0xf] }
  0x12   :  { %244 = vmatpush.bf16.msra.mxu1 %v1340_v45  ;;  %v1451_v12 = vld [vmem:[%s2319_s3 + $0x98] sm:$0xf]  ;;  %v1301_v14 = vld [vmem:[%s2318_s1 + $0x3c] sm:$0xf0]  ;;  %v1831_v15 = vor.u32 %v1530_v2, %v1457_v3  ;;  %v1529_v16 = vld [vmem:[%s2319_s3 + $0xa0] sm:$0xf0] }
  0x13   :  { %v1343_v18 = vld [vmem:[%s2318_s1 + $0x80] sm:$0xf]  ;;  %v1502_v19 = vld [vmem:[%s2318_s1 + $0x88] sm:$0xf0]  ;;  %v1527_v21 = vld [vmem:[%s2319_s3 + $0x94] sm:$0xf]  ;;  %v1304_v25 = vor.u32 %v1491_v13, %v1301_v14  ;;  %v1855_v26 = vor.u32 %v1529_v16, %v1451_v12 }
  0x14   :  { %217 = vmatpush.bf16.msra.mxu0 %v1312_v33  ;;  %272 = vmatpush.bf16.msra.mxu2 %v1356_v8  ;;  %v1845_v20 = vld [vmem:[%s2320_s0] sm:$0xff]  ;;  %v1344_v23 = vor.u32 %v1502_v19, %v1343_v18  ;;  %v1488_v28 = vld [vmem:[%s2318_s1 + $0x1c] sm:$0xf]  ;;  %v1289_v29 = vld [vmem:[%s2318_s1 + $0x24] sm:$0xf0]  ;;  %v1616_v39 = vmov 0.0|0.0  }
  0x15   :  { %500 = vmatpush.bf16.msra.mxu3 %v1734_v36  ;;  %v1445_v22 = vld [vmem:[%s2319_s3 + $0x9c] sm:$0xf0]  ;;  %v1526_v31 = vld [vmem:[%s2319_s3 + $0x88] sm:$0xf0]  ;;  %v1331_v32 = vld [vmem:[%s2318_s1 + $0x68] sm:$0xf]  ;;  %v1292_v40 = vor.u32 %v1488_v28, %v1289_v29 }
  0x16   :  { %245 = vmatpush.bf16.msra.mxu1 %v1328_v58  ;;  %v1439_v27 = vld [vmem:[%s2319_s3 + $0x80] sm:$0xf]  ;;  %v1867_v30 = vor.u32 %v1527_v21, %v1445_v22  ;;  %v1499_v33 = vld [vmem:[%s2318_s1 + $0x70] sm:$0xf0]  ;;  %v1524_v34 = vld [vmem:[%s2319_s3 + $0x7c] sm:$0xf] }
  0x17   :  { %v1433_v35 = vld [vmem:[%s2319_s3 + $0x84] sm:$0xf0]  ;;  %v1332_v37 = vor.u32 %v1499_v33, %v1331_v32  ;;  %v1319_v38 = vld [vmem:[%s2318_s1 + $0x50] sm:$0xf]  ;;  %v1496_v41 = vld [vmem:[%s2318_s1 + $0x58] sm:$0xf0] }
  0x18   :  { %218 = vmatpush.bf16.msra.mxu0 %v1300_v42  ;;  %273 = vmatpush.bf16.msra.mxu2 %v1344_v23  ;;  %v1893_v42 = vor.u32 %v1526_v31, %v1439_v27  ;;  %v1485_v43 = vld [vmem:[%s2318_s1 + $0x4] sm:$0xf]  ;;  %v1277_v44 = vld [vmem:[%s2318_s1 + $0xc] sm:$0xf0]  ;;  %v1902_v45 = vor.u32 %v1524_v34, %v1433_v35  ;;  %v1427_v48 = vld [vmem:[%s2319_s3 + $0x68] sm:$0xf]  ;;  %v1320_v50 = vor.u32 %v1496_v41, %v1319_v38 }
  0x19   :  { %501 = vmatpush.bf16.msra.mxu3 %v1758_v46  ;;  %v1521_v47 = vld [vmem:[%s2319_s3 + $0x64] sm:$0xf]  ;;  %v1523_v49 = vld [vmem:[%s2319_s3 + $0x70] sm:$0xf0]  ;;  %v1421_v51 = vld [vmem:[%s2319_s3 + $0x6c] sm:$0xf0] }
  0x1a   :  { %246 = vmatpush.bf16.msra.mxu1 %v1316_v6  ;;  %v1307_v52 = vld [vmem:[%s2318_s1 + $0x38] sm:$0xf]  ;;  %v1493_v53 = vld [vmem:[%s2318_s1 + $0x40] sm:$0xf0]  ;;  %v1923_v55 = vor.u32 %v1523_v49, %v1427_v48  ;;  %v1926_v56 = vor.u32 %v1521_v47, %v1421_v51  ;;  %v1518_v57 = vld [vmem:[%s2319_s3 + $0x4c] sm:$0xf] }
  0x1b   :  { %v1415_v58 = vld [vmem:[%s2319_s3 + $0x50] sm:$0xf]  ;;  %v1520_v60 = vld [vmem:[%s2319_s3 + $0x58] sm:$0xf0]  ;;  %v1308_v61 = vor.u32 %v1493_v53, %v1307_v52  ;;  %v1409_v62 = vld [vmem:[%s2319_s3 + $0x54] sm:$0xf0] }
  0x1c   :  { %219 = vmatpush.bf16.msra.mxu0 %v1288_v54  ;;  %274 = vmatpush.bf16.msra.mxu2 %v1332_v37  ;;  %v1280_v54 = vor.u32 %v1485_v43, %v1277_v44  ;;  %v1295_v63 = vld [vmem:[%s2318_s1 + $0x20] sm:$0xf]  ;;  %v1490_v0 = vld [vmem:[%s2318_s1 + $0x28] sm:$0xf0]  ;;  %v1947_v1 = vor.u32 %v1520_v60, %v1415_v58  ;;  %v1951_v2 = vor.u32 %v1518_v57, %v1409_v62  ;;  %v1403_v3 = vld [vmem:[%s2319_s3 + $0x38] sm:$0xf] }
  0x1d   :  { %502 = vmatpush.bf16.msra.mxu3 %v1788_v59  ;;  %v1517_v4 = vld [vmem:[%s2319_s3 + $0x40] sm:$0xf0]  ;;  %v1482_v6 = vld [vmem:[%s2320_s0 + $0x8] sm:$0xff]  ;;  %v1515_v8 = vld [vmem:[%s2319_s3 + $0x34] sm:$0xf] }
  0x1e   :  { %247 = vmatpush.bf16.msra.mxu1 %v1304_v25  ;;  %v1397_v12 = vld [vmem:[%s2319_s3 + $0x3c] sm:$0xf0]  ;;  %v1970_v13 = vor.u32 %v1517_v4, %v1403_v3  ;;  %v1512_v16 = vld [vmem:[%s2319_s3 + $0x1c] sm:$0xf]  ;;  %v1283_v18 = vld [vmem:[%s2318_s1 + $0x8] sm:$0xf] }
  0x1f   :  { %v1974_v14 = vor.u32 %v1515_v8, %v1397_v12  ;;  %v1487_v19 = vld [vmem:[%s2318_s1 + $0x10] sm:$0xf0]  ;;  %v1385_v21 = vld [vmem:[%s2319_s3 + $0x24] sm:$0xf0]  ;;  %v1391_v22 = vld [vmem:[%s2319_s3 + $0x20] sm:$0xf] }
  0x20   :  { %220 = vmatpush.bf16.msra.mxu0 %v1276_v5  ;;  %275 = vmatpush.bf16.msra.mxu2 %v1320_v50  ;;  %v1296_v5 = vor.u32 %v1490_v0, %v1295_v63  ;;  %v1514_v23 = vld [vmem:[%s2319_s3 + $0x28] sm:$0xf0]  ;;  %v1284_v25 = vor.u32 %v1487_v19, %v1283_v18  ;;  %v1999_v28 = vor.u32 %v1512_v16, %v1385_v21  ;;  %v1379_v29 = vld [vmem:[%s2319_s3 + $0x8] sm:$0xf]  ;;  %v1511_v31 = vld [vmem:[%s2319_s3 + $0x10] sm:$0xf0] }
  0x21   :  { %503 = vmatpush.bf16.msra.mxu3 %v1818_v9  ;;  %v1995_v27 = vor.u32 %v1514_v23, %v1391_v22  ;;  %v1509_v32 = vld [vmem:[%s2319_s3 + $0x4] sm:$0xf]  ;;  %v1373_v33 = vld [vmem:[%s2319_s3 + $0xc] sm:$0xf0]  ;;  %v2016_v34 = vor.u32 %v1511_v31, %v1379_v29  ;;  %v1484_v37 = vld [vmem:[%s2320_s0 + $0x18] sm:$0xff] }
  0x22   :  { %248 = vmatpush.bf16.msra.mxu1 %v1292_v40  ;;  %v2019_v35 = vor.u32 %v1509_v32, %v1373_v33 }
  0x23   :  { %221 = vmatmul.bf16.vlgmr.msra.gmra.mxu0 %v1845_v20 }
  0x24   :  { %522 = vmatpush.bf16.msrb.mxu0 %v1820_v10  ;;  %504 = vmatmul.bf16.vlgmr.msra.gmra.mxu3 %v1616_v39 }
  0x25   :  { %509 = vmatpush.bf16.msrb.mxu3 %v1831_v15  ;;  %276 = vmatpush.bf16.msra.mxu2 %v1308_v61 }
  0x26   :  { %249 = vmatpush.bf16.msra.mxu1 %v1280_v54 }
  0x28   :  { %523 = vmatpush.bf16.msrb.mxu0 %v1855_v26 }
  0x29   :  { %510 = vmatpush.bf16.msrb.mxu3 %v1867_v30  ;;  %250 = vmatmul.bf16.vlgmr.msra.gmra.mxu1 %v1845_v20 }
  0x2a   :  { %590 = vmatpush.bf16.msrb.mxu1 %v1665_v7  ;;  %277 = vmatpush.bf16.msra.mxu2 %v1296_v5 }
  0x2c   :  { %524 = vmatpush.bf16.msrb.mxu0 %v1893_v42 }
  0x2d   :  { %511 = vmatpush.bf16.msrb.mxu3 %v1902_v45 }
  0x2e   :  { %591 = vmatpush.bf16.msrb.mxu1 %v1674_v11  ;;  %278 = vmatpush.bf16.msra.mxu2 %v1284_v25 }
  0x30   :  { %525 = vmatpush.bf16.msrb.mxu0 %v1923_v55 }
  0x31   :  { %512 = vmatpush.bf16.msrb.mxu3 %v1926_v56  ;;  %279 = vmatmul.bf16.vlgmr.msra.gmra.mxu2 %v1845_v20  ;;  %v1483_v20 = vld [vmem:[%s2320_s0 + $0x10] sm:$0xff] }
  0x32   :  { %592 = vmatpush.bf16.msrb.mxu1 %v1689_v17  ;;  %603 = vmatpush.bf16.msrb.mxu2 %v1831_v15 }
  0x33   :  { %226 = vmatmul.bf16.gmra.mxu0 %v1482_v6 }
  0x34   :  { %526 = vmatpush.bf16.msrb.mxu0 %v1947_v1 }
  0x35   :  { %513 = vmatpush.bf16.msrb.mxu3 %v1951_v2 }
  0x36   :  { %593 = vmatpush.bf16.msrb.mxu1 %v1707_v24  ;;  %604 = vmatpush.bf16.msrb.mxu2 %v1867_v30 }
  0x38   :  { %527 = vmatpush.bf16.msrb.mxu0 %v1970_v13 }
  0x39   :  { %514 = vmatpush.bf16.msrb.mxu3 %v1974_v14  ;;  %255 = vmatmul.bf16.gmra.mxu1 %v1482_v6 }
  0x3a   :  { %594 = vmatpush.bf16.msrb.mxu1 %v1734_v36  ;;  %605 = vmatpush.bf16.msrb.mxu2 %v1902_v45 }
  0x3c   :  { %528 = vmatpush.bf16.msrb.mxu0 %v1995_v27 }
  0x3d   :  { %515 = vmatpush.bf16.msrb.mxu3 %v1999_v28 }
  0x3e   :  { %595 = vmatpush.bf16.msrb.mxu1 %v1758_v46  ;;  %606 = vmatpush.bf16.msrb.mxu2 %v1926_v56 }
  0x40   :  { %529 = vmatpush.bf16.msrb.mxu0 %v2016_v34 }
  0x41   :  { %516 = vmatpush.bf16.msrb.mxu3 %v2019_v35  ;;  %284 = vmatmul.bf16.gmra.mxu2 %v1482_v6 }
  0x42   :  { %596 = vmatpush.bf16.msrb.mxu1 %v1788_v59  ;;  %607 = vmatpush.bf16.msrb.mxu2 %v1951_v2 }
  0x43   :  { %231 = vmatmul.bf16.gmra.mxu0 %v1483_v20 }
  0x44   :  { %684 = vmatpush.bf16.msra.mxu0 %v1665_v7  ;;  %517 = vmatmul.bf16.vlgmr.msrb.gmra.mxu3 %v1616_v39 }
  0x45   :  { %616 = vmatpush.bf16.msra.mxu3 %v1820_v10 }
  0x46   :  { %597 = vmatpush.bf16.msrb.mxu1 %v1818_v9  ;;  %608 = vmatpush.bf16.msrb.mxu2 %v1974_v14 }
  0x48   :  { %685 = vmatpush.bf16.msra.mxu0 %v1674_v11 }
  0x49   :  { %617 = vmatpush.bf16.msra.mxu3 %v1855_v26  ;;  %260 = vmatmul.bf16.gmra.mxu1 %v1483_v20 }
  0x4a   :  { %697 = vmatpush.bf16.msra.mxu1 %v1831_v15  ;;  %609 = vmatpush.bf16.msrb.mxu2 %v1999_v28 }
  0x4c   :  { %686 = vmatpush.bf16.msra.mxu0 %v1689_v17 }
  0x4d   :  { %618 = vmatpush.bf16.msra.mxu3 %v1893_v42 }
  0x4e   :  { %698 = vmatpush.bf16.msra.mxu1 %v1867_v30  ;;  %610 = vmatpush.bf16.msrb.mxu2 %v2019_v35 }
  0x50   :  { %687 = vmatpush.bf16.msra.mxu0 %v1707_v24 }
  0x51   :  { %619 = vmatpush.bf16.msra.mxu3 %v1923_v55  ;;  %289 = vmatmul.bf16.gmra.mxu2 %v1483_v20 }
  0x52   :  { %710 = vmatpush.bf16.msra.mxu2 %v1820_v10  ;;  %699 = vmatpush.bf16.msra.mxu1 %v1902_v45 }
  0x53   :  { %236 = vmatmul.bf16.gmra.mxu0 %v1484_v37 }
  0x54   :  { %688 = vmatpush.bf16.msra.mxu0 %v1734_v36 }
  0x55   :  { %620 = vmatpush.bf16.msra.mxu3 %v1947_v1 }
  0x56   :  { %711 = vmatpush.bf16.msra.mxu2 %v1855_v26  ;;  %700 = vmatpush.bf16.msra.mxu1 %v1926_v56 }
  0x58   :  { %689 = vmatpush.bf16.msra.mxu0 %v1758_v46 }
  0x59   :  { %621 = vmatpush.bf16.msra.mxu3 %v1970_v13  ;;  %265 = vmatmul.bf16.gmra.mxu1 %v1484_v37 }
  0x5a   :  { %712 = vmatpush.bf16.msra.mxu2 %v1893_v42  ;;  %701 = vmatpush.bf16.msra.mxu1 %v1951_v2 }
  0x5c   :  { %690 = vmatpush.bf16.msra.mxu0 %v1788_v59 }
  0x5d   :  { %622 = vmatpush.bf16.msra.mxu3 %v1995_v27 }
  0x5e   :  { %713 = vmatpush.bf16.msra.mxu2 %v1923_v55  ;;  %702 = vmatpush.bf16.msra.mxu1 %v1974_v14 }
  0x60   :  { %691 = vmatpush.bf16.msra.mxu0 %v1818_v9 }
  0x61   :  { %623 = vmatpush.bf16.msra.mxu3 %v2016_v34  ;;  %294 = vmatmul.bf16.gmra.mxu2 %v1484_v37 }
  0x62   :  { %714 = vmatpush.bf16.msra.mxu2 %v1947_v1  ;;  %703 = vmatpush.bf16.msra.mxu1 %v1999_v28 }
  0x63   :  { %530 = vmatmul.bf16.vlgmr.msrb.gmra.mxu0 %v1616_v39  ;;  %v77_v39 = vld [vmem:[%s2322_s2] sm:$0x7] }
  0x64   :  { %791 = vmatpush.bf16.msrb.mxu0 %v1831_v15  ;;  %v79_v40 = vperm.slane %v77_v39, 0  ;;  %v2100_v57 = vperm.slane %v77_v39, 1 }
  0x65   :  { %778 = vmatpush.bf16.msrb.mxu3 %v1665_v7 }
  0x66   :  { %715 = vmatpush.bf16.msra.mxu2 %v1970_v13  ;;  %704 = vmatpush.bf16.msra.mxu1 %v2019_v35 }
  0x68   :  { %792 = vmatpush.bf16.msrb.mxu0 %v1867_v30 }
  0x69   :  { %779 = vmatpush.bf16.msrb.mxu3 %v1674_v11 }
  0x6a   :  { %716 = vmatpush.bf16.msra.mxu2 %v1995_v27 }
  0x6c   :  { %793 = vmatpush.bf16.msrb.mxu0 %v1902_v45 }
  0x6d   :  { %780 = vmatpush.bf16.msrb.mxu3 %v1689_v17 }
  0x6e   :  { %717 = vmatpush.bf16.msra.mxu2 %v2016_v34 }
  0x70   :  { %794 = vmatpush.bf16.msrb.mxu0 %v1926_v56 }
  0x71   :  { %781 = vmatpush.bf16.msrb.mxu3 %v1707_v24 }
  0x74   :  { %795 = vmatpush.bf16.msrb.mxu0 %v1951_v2 }
  0x75   :  { %782 = vmatpush.bf16.msrb.mxu3 %v1734_v36 }
  0x78   :  { %796 = vmatpush.bf16.msrb.mxu0 %v1974_v14 }
  0x79   :  { %783 = vmatpush.bf16.msrb.mxu3 %v1758_v46 }
  0x7c   :  { %797 = vmatpush.bf16.msrb.mxu0 %v1999_v28 }
  0x7d   :  { %784 = vmatpush.bf16.msrb.mxu3 %v1788_v59 }
  0x80   :  { %798 = vmatpush.bf16.msrb.mxu0 %v2019_v35 }
  0x81   :  { %785 = vmatpush.bf16.msrb.mxu3 %v1818_v9 }
  0xa0   :  { %v222_v38 = vpop.f32.mrf.mxu0 }
  0xa1   :  { %v223_v47 = vadd.f32 %v222_v38, %v79_v40 }
  0xa6   :  { %v251_v58 = vpop.f32.mrf.mxu1 }
  0xa7   :  { %v505_v41 = vpop.f32.mrf.mxu3  ;;  %v252_v63 = vadd.f32 %v251_v58, %v2100_v57 }
  0xa8   :  { %v224_v43 = vpop.f32.mrf.mxu0  ;;  %v535_v50 = vadd.f32 %v505_v41, %v223_v47  ;;  %v2116_v47 = vld [vmem:[%s2321_s4] ss:$0 sm:$0xff] }
  0xa9   :  { %v2094_v44 = vadd.f32 %v224_v43, %v79_v40  ;;  %v2111_v43 = vperm.slane %v77_v39, 2 }
  0xaa   :  { %v1465_v52 = vmul.f32 -1.442695, %v535_v50 }
  0xac   :  { %1535 = vpow2.f32 %v1465_v52 }
  0xaf   :  { %v507_v48 = vpop.f32.mrf.mxu3 }
  0xb0   :  { %v227_v49 = vpop.f32.mrf.mxu0 }
  0xb1   :  { %v2096_v51 = vadd.f32 %v227_v49, %v79_v40 }
  0xb2   :  { %v1536_v60 = vpop.eup %1535 }
  0xb3   :  { %v539_v0 = vadd.f32 1.0, %v1536_v60 }
  0xb4   :  { %v280_v52 = vpop.f32.mrf.mxu2 }
  0xb5   :  { %1537 = vrcp.f32 %v539_v0  ;;  %v551_v41 = vand.u32 2147483648, %v539_v0  ;;  %vm545_vm1 = vweird.f32 %v539_v0  ;;  %v549_v48 = vand.u32 2147483647, %v539_v0 }
  0xb6   :  { %v281_v58 = vadd.f32 %v280_v52, %v2111_v43 }
  0xb7   :  { %vm550_vm3 = vcmp.eq.f32.partialorder %v549_v48, 8.507059e+37 }
  0xb8   :  { %v229_v53 = vpop.f32.mrf.mxu0 }
  0xb9   :  { %v2098_v54 = vadd.f32 %v229_v53, %v79_v40 }
  0xbb   :  { %v1538_v12 = vpop.eup %1537 }
  0xbc   :  { %v541_v19 = vmul.f32 %v1538_v12, %v539_v0  ;;  %vm546_vm0 = vweird.f32 %v1538_v12 }
  0xbd   :  { %vm547_vm2 = vmor %vm545_vm1, %vm546_vm0 }
  0xbe   :  { %v542_v25 = vsub.f32 1.0, %v541_v19 }
  0xc0   :  { %v232_v61 = vpop.f32.mrf.mxu0  ;;  %v543_v29 = vmul.f32 %v1538_v12, %v542_v25 }
  0xc1   :  { %v2102_v62 = vadd.f32 %v232_v61, %v79_v40 }
  0xc2   :  { %v544_v38 = vadd.f32 %v1538_v12, %v543_v29 }
  0xc4   :  { %v548_v50 = vsel %vm547_vm2, %v1538_v12, %v544_v38 }
  0xc7   :  { %v518_v3 = vpop.f32.mrf.mxu3 }
  0xc8   :  { %v555_v4 = vadd.f32 %v518_v3, %v252_v63  ;;  %v234_v6 = vpop.f32.mrf.mxu0 }
  0xc9   :  { %v2105_v8 = vadd.f32 %v234_v6, %v79_v40 }
  0xca   :  { %v1466_v5 = vmul.f32 -1.442695, %v555_v4 }
  0xcc   :  { %1539 = vpow2.f32 %v1466_v5 }
  0xcf   :  { %v520_v16 = vpop.f32.mrf.mxu3 }
  0xd0   :  { %v237_v22 = vpop.f32.mrf.mxu0 }
  0xd1   :  { %v2107_v23 = vadd.f32 %v237_v22, %v79_v40 }
  0xd2   :  { %v1540_v18 = vpop.eup %1539 }
  0xd3   :  { %v559_v21 = vadd.f32 1.0, %v1540_v18  ;;  %2324 = vst [vmem:[#allocation4_spill] sm:$0xff] %v2107_v23 }
  0xd5   :  { %1541 = vrcp.f32 %v559_v21  ;;  %vm565_vm4 = vweird.f32 %v559_v21  ;;  %v571_v3 = vand.u32 2147483648, %v559_v21  ;;  %v569_v4 = vand.u32 2147483647, %v559_v21 }
  0xd7   :  { %v572_v6 = vor.u32 1.1754944e-38, %v571_v3  ;;  %vm570_vm7 = vcmp.eq.f32.partialorder %v569_v4, 8.507059e+37 }
  0xd8   :  { %v239_v32 = vpop.f32.mrf.mxu0 }
  0xd9   :  { %v2109_v20 = vadd.f32 %v239_v32, %v79_v40  ;;  %v552_v40 = vor.u32 1.1754944e-38, %v551_v41 }
  0xdb   :  { %v1542_v31 = vpop.eup %1541  ;;  %2325 = vst [vmem:[#allocation5_spill] sm:$0xff] %v2109_v20  ;;  %v553_v39 = vsel %vm550_vm3, %v552_v40, %v548_v50 }
  0xdc   :  { %v561_v33 = vmul.f32 %v1542_v31, %v559_v21  ;;  %vm566_vm5 = vweird.f32 %v1542_v31  ;;  %v253_v21 = vpop.f32.mrf.mxu1 }
  0xdd   :  { %vm567_vm6 = vmor %vm565_vm4, %vm566_vm5  ;;  %v254_v3 = vadd.f32 %v253_v21, %v2100_v57 }
  0xde   :  { %v562_v37 = vsub.f32 1.0, %v561_v33 }
  0xe0   :  { %v563_v49 = vmul.f32 %v1542_v31, %v562_v37  ;;  %v531_v53 = vpop.f32.mrf.mxu0 }
  0xe1   :  { %v575_v60 = vadd.f32 %v2116_v47, %v531_v53 }
  0xe2   :  { %v564_v61 = vadd.f32 %v1542_v31, %v563_v49 }
  0xe3   :  { %v576_v63 = vmul.f32 %v575_v60, %v553_v39 }
  0xe4   :  { %v568_v0 = vsel %vm567_vm6, %v1542_v31, %v564_v61  ;;  %v282_v31 = vpop.f32.mrf.mxu2  ;;  %v2148_v33 = vpop.f32.mrf.mxu1 }
  0xe5   :  { %v577_v5 = vadd.f32 %v576_v63, %v281_v58  ;;  %v573_v16 = vsel %vm570_vm7, %v572_v6, %v568_v0 }
  0xe6   :  { %v579_v18 = vsub.f32 1.0, %v573_v16  ;;  %v581_v25 = vmul.f32 0.0, %v573_v16 }
  0xe7   :  { %1543 = vtanh.f32 %v577_v5 }
  0xe8   :  { %v533_v12 = vpop.f32.mrf.mxu0 }
  0xec   :  { %v2150_v37 = vpop.f32.mrf.mxu2  ;;  %v2152_v38 = vpop.f32.mrf.mxu1 }
  0xed   :  { %v1544_v19 = vpop.eup %1543 }
  0xee   :  { %v580_v22 = vmul.f32 %v1544_v19, %v579_v18 }
  0xf0   :  { %v2120_v29 = vadd.f32 %v581_v25, %v580_v22 }
  0xf2   :  { %v589_v32 = vpack.c.bf16 %v2120_v29, %v2120_v29 }
  0xf4   :  { %598 = vmatmul.bf16.vlgmr.msrb.gmra.mxu1 %v589_v32  ;;  %611 = vmatmul.bf16.vlgmr.msrb.gmra.mxu2 %v589_v32  ;;  %v2154_v41 = vpop.f32.mrf.mxu2  ;;  %v2156_v48 = vpop.f32.mrf.mxu1 }
  0xf5   :  { %624 = vmatmul.bf16.vlgmr.msra.gmra.mxu3 %v589_v32  ;;  %804 = vmatpush.bf16.msrb.mxu1 %v1820_v10 }
  0xf6   :  { %872 = vmatpush.bf16.msrb.mxu2 %v1665_v7  ;;  %885 = vmatpush.bf16.msra.mxu3 %v1831_v15 }
  0xf9   :  { %805 = vmatpush.bf16.msrb.mxu1 %v1855_v26 }
  0xfa   :  { %873 = vmatpush.bf16.msrb.mxu2 %v1674_v11  ;;  %886 = vmatpush.bf16.msra.mxu3 %v1867_v30 }
  0xfc   :  { %v2158_v49 = vpop.f32.mrf.mxu2  ;;  %v2160_v50 = vpop.f32.mrf.mxu1 }
  0xfd   :  { %806 = vmatpush.bf16.msrb.mxu1 %v1893_v42 }
  0xfe   :  { %874 = vmatpush.bf16.msrb.mxu2 %v1689_v17  ;;  %887 = vmatpush.bf16.msra.mxu3 %v1902_v45 }
 0x101   :  { %807 = vmatpush.bf16.msrb.mxu1 %v1923_v55 }
 0x102   :  { %875 = vmatpush.bf16.msrb.mxu2 %v1707_v24  ;;  %888 = vmatpush.bf16.msra.mxu3 %v1926_v56 }
 0x104   :  { %v2162_v52 = vpop.f32.mrf.mxu2  ;;  %v2164_v53 = vpop.f32.mrf.mxu1 }
 0x105   :  { %808 = vmatpush.bf16.msrb.mxu1 %v1947_v1 }
 0x106   :  { %876 = vmatpush.bf16.msrb.mxu2 %v1734_v36  ;;  %889 = vmatpush.bf16.msra.mxu3 %v1951_v2 }
 0x109   :  { %809 = vmatpush.bf16.msrb.mxu1 %v1970_v13 }
 0x10a   :  { %877 = vmatpush.bf16.msrb.mxu2 %v1758_v46  ;;  %890 = vmatpush.bf16.msra.mxu3 %v1974_v14 }
 0x10c   :  { %v2166_v40 = vpop.f32.mrf.mxu2  ;;  %v2168_v58 = vpop.f32.mrf.mxu1 }
 0x10d   :  { %810 = vmatpush.bf16.msrb.mxu1 %v1995_v27  ;;  %2326 = vst [vmem:[#allocation6_spill] sm:$0xff] %v2166_v40 }
 0x10e   :  { %878 = vmatpush.bf16.msrb.mxu2 %v1788_v59  ;;  %891 = vmatpush.bf16.msra.mxu3 %v1999_v28  ;;  %2327 = vst [vmem:[#allocation7_spill] sm:$0xff] %v2168_v58 }
 0x111   :  { %811 = vmatpush.bf16.msrb.mxu1 %v2016_v34 }
 0x112   :  { %879 = vmatpush.bf16.msrb.mxu2 %v1818_v9  ;;  %892 = vmatpush.bf16.msra.mxu3 %v2019_v35 }
 0x114   :  { %v2170_v60 = vpop.f32.mrf.mxu2 }
 0x115   :  { %2328 = vst [vmem:[#allocation8_spill] sm:$0xff] %v2170_v60 }
 0x171   :  { %v599_v39 = vpop.f32.mrf.mxu1 }
 0x172   :  { %v629_v61 = vadd.f32 %v599_v39, %v2094_v44 }
 0x174   :  { %v1467_v63 = vmul.f32 -1.442695, %v629_v61 }
 0x176   :  { %1545 = vpow2.f32 %v1467_v63 }
 0x177   :  { %v612_v4 = vpop.f32.mrf.mxu2 }
 0x178   :  { %v649_v5 = vadd.f32 %v612_v4, %v254_v3  ;;  %v625_v0 = vpop.f32.mrf.mxu3 }
 0x179   :  { %v601_v6 = vpop.f32.mrf.mxu1 }
 0x17a   :  { %v1468_v12 = vmul.f32 -1.442695, %v649_v5 }
 0x17c   :  { %v1546_v16 = vpop.eup %1545  ;;  %1547 = vpow2.f32 %v1468_v12 }
 0x17d   :  { %v633_v18 = vadd.f32 1.0, %v1546_v16 }
 0x17f   :  { %1549 = vrcp.f32 %v633_v18  ;;  %v614_v19 = vpop.f32.mrf.mxu2  ;;  %v645_v61 = vand.u32 2147483648, %v633_v18  ;;  %v643_v63 = vand.u32 2147483647, %v633_v18  ;;  %vm639_vm9 = vweird.f32 %v633_v18 }
 0x180   :  { %v627_v22 = vpop.f32.mrf.mxu3  ;;  %v669_v19 = vadd.f32 %v2116_v47, %v625_v0 }
 0x181   :  { %v646_v5 = vor.u32 1.1754944e-38, %v645_v61  ;;  %vm644_vm11 = vcmp.eq.f32.partialorder %v643_v63, 8.507059e+37  ;;  %v283_v22 = vadd.f32 %v282_v31, %v2111_v43 }
 0x182   :  { %v1548_v25 = vpop.eup %1547 }
 0x183   :  { %v653_v32 = vadd.f32 1.0, %v1548_v25 }
 0x185   :  { %v1550_v60 = vpop.eup %1549  ;;  %1551 = vrcp.f32 %v653_v32  ;;  %v663_v58 = vand.u32 2147483647, %v653_v32  ;;  %vm659_vm13 = vweird.f32 %v653_v32 }
 0x186   :  { %v635_v44 = vmul.f32 %v1550_v60, %v633_v18  ;;  %vm640_vm8 = vweird.f32 %v1550_v60 }
 0x187   :  { %vm641_vm10 = vmor %vm639_vm9, %vm640_vm8  ;;  %vm664_vm15 = vcmp.eq.f32.partialorder %v663_v58, 8.507059e+37 }
 0x188   :  { %v636_v39 = vsub.f32 1.0, %v635_v44  ;;  %v665_v44 = vand.u32 2147483648, %v653_v32 }
 0x18a   :  { %v637_v21 = vmul.f32 %v1550_v60, %v636_v39  ;;  %v666_v18 = vor.u32 1.1754944e-38, %v665_v44 }
 0x18b   :  { %v1552_v3 = vpop.eup %1551 }
 0x18c   :  { %v655_v4 = vmul.f32 %v1552_v3, %v653_v32  ;;  %v638_v6 = vadd.f32 %v1550_v60, %v637_v21  ;;  %vm660_vm12 = vweird.f32 %v1552_v3 }
 0x18d   :  { %vm661_vm14 = vmor %vm659_vm13, %vm660_vm12 }
 0x18e   :  { %v656_v12 = vsub.f32 1.0, %v655_v4  ;;  %v642_v16 = vsel %vm641_vm10, %v1550_v60, %v638_v6 }
 0x18f   :  { %v647_v25 = vsel %vm644_vm11, %v646_v5, %v642_v16 }
 0x190   :  { %v657_v20 = vmul.f32 %v1552_v3, %v656_v12  ;;  %v670_v39 = vmul.f32 %v669_v19, %v647_v25 }
 0x192   :  { %v671_v40 = vadd.f32 %v670_v39, %v283_v22  ;;  %v658_v23 = vadd.f32 %v1552_v3, %v657_v20 }
 0x194   :  { %1553 = vtanh.f32 %v671_v40  ;;  %v662_v61 = vsel %vm661_vm14, %v1552_v3, %v658_v23  ;;  %v257_v23 = vadd.f32 %v2148_v33, %v2100_v57 }
 0x195   :  { %v667_v60 = vsel %vm664_vm15, %v666_v18, %v662_v61 }
 0x196   :  { %v673_v21 = vsub.f32 1.0, %v667_v60  ;;  %v675_v31 = vmul.f32 %v667_v60, %v2120_v29 }
 0x19a   :  { %v1554_v63 = vpop.eup %1553 }
 0x19b   :  { %v674_v0 = vmul.f32 %v1554_v63, %v673_v21 }
 0x19d   :  { %v2177_v4 = vadd.f32 %v675_v31, %v674_v0 }
 0x19f   :  { %v683_v6 = vpack.c.bf16 %v2177_v4, %v2177_v4 }
 0x1a1   :  { %692 = vmatmul.bf16.vlgmr.msra.gmra.mxu0 %v683_v6  ;;  %705 = vmatmul.bf16.vlgmr.msra.gmra.mxu1 %v683_v6 }
 0x1a2   :  { %718 = vmatmul.bf16.vlgmr.msra.gmra.mxu2 %v683_v6  ;;  %898 = vmatpush.bf16.msra.mxu0 %v1820_v10 }
 0x1a3   :  { %966 = vmatpush.bf16.msra.mxu1 %v1665_v7  ;;  %979 = vmatpush.bf16.msra.mxu2 %v1831_v15 }
 0x1a6   :  { %899 = vmatpush.bf16.msra.mxu0 %v1855_v26 }
 0x1a7   :  { %967 = vmatpush.bf16.msra.mxu1 %v1674_v11  ;;  %980 = vmatpush.bf16.msra.mxu2 %v1867_v30 }
 0x1aa   :  { %900 = vmatpush.bf16.msra.mxu0 %v1893_v42 }
 0x1ab   :  { %968 = vmatpush.bf16.msra.mxu1 %v1689_v17  ;;  %981 = vmatpush.bf16.msra.mxu2 %v1902_v45 }
 0x1ae   :  { %901 = vmatpush.bf16.msra.mxu0 %v1923_v55 }
 0x1af   :  { %969 = vmatpush.bf16.msra.mxu1 %v1707_v24  ;;  %982 = vmatpush.bf16.msra.mxu2 %v1926_v56 }
 0x1b2   :  { %902 = vmatpush.bf16.msra.mxu0 %v1947_v1 }
 0x1b3   :  { %970 = vmatpush.bf16.msra.mxu1 %v1734_v36  ;;  %983 = vmatpush.bf16.msra.mxu2 %v1951_v2 }
 0x1b6   :  { %903 = vmatpush.bf16.msra.mxu0 %v1970_v13 }
 0x1b7   :  { %971 = vmatpush.bf16.msra.mxu1 %v1758_v46  ;;  %984 = vmatpush.bf16.msra.mxu2 %v1974_v14 }
 0x1ba   :  { %904 = vmatpush.bf16.msra.mxu0 %v1995_v27 }
 0x1bb   :  { %972 = vmatpush.bf16.msra.mxu1 %v1788_v59  ;;  %985 = vmatpush.bf16.msra.mxu2 %v1999_v28 }
 0x1be   :  { %905 = vmatpush.bf16.msra.mxu0 %v2016_v34 }
 0x1bf   :  { %973 = vmatpush.bf16.msra.mxu1 %v1818_v9  ;;  %986 = vmatpush.bf16.msra.mxu2 %v2019_v35 }
 0x21e   :  { %v693_v20 = vpop.f32.mrf.mxu0  ;;  %v706_v29 = vpop.f32.mrf.mxu1 }
 0x21f   :  { %v723_v40 = vadd.f32 %v693_v20, %v2096_v51  ;;  %v743_v58 = vadd.f32 %v706_v29, %v257_v23 }
 0x221   :  { %v1469_v32 = vmul.f32 -1.442695, %v723_v40  ;;  %v1470_v3 = vmul.f32 -1.442695, %v743_v58 }
 0x223   :  { %1555 = vpow2.f32 %v1469_v32 }
 0x224   :  { %1557 = vpow2.f32 %v1470_v3  ;;  %v286_v3 = vadd.f32 %v2150_v37, %v2111_v43 }
 0x225   :  { %v719_v5 = vpop.f32.mrf.mxu2 }
 0x226   :  { %v695_v12 = vpop.f32.mrf.mxu0  ;;  %v708_v16 = vpop.f32.mrf.mxu1  ;;  %v763_v40 = vadd.f32 %v2116_v47, %v719_v5 }
 0x229   :  { %v1556_v19 = vpop.eup %1555 }
 0x22a   :  { %v1558_v22 = vpop.eup %1557  ;;  %v727_v25 = vadd.f32 1.0, %v1556_v19 }
 0x22b   :  { %v747_v44 = vadd.f32 1.0, %v1558_v22 }
 0x22c   :  { %1559 = vrcp.f32 %v727_v25  ;;  %v739_v63 = vand.u32 2147483648, %v727_v25  ;;  %v737_v31 = vand.u32 2147483647, %v727_v25  ;;  %vm733_vm1 = vweird.f32 %v727_v25 }
 0x22d   :  { %1561 = vrcp.f32 %v747_v44  ;;  %v721_v39 = vpop.f32.mrf.mxu2  ;;  %v759_v12 = vand.u32 2147483648, %v747_v44  ;;  %vm753_vm5 = vweird.f32 %v747_v44  ;;  %v757_v19 = vand.u32 2147483647, %v747_v44 }
 0x22e   :  { %v740_v20 = vor.u32 1.1754944e-38, %v739_v63  ;;  %vm738_vm3 = vcmp.eq.f32.partialorder %v737_v31, 8.507059e+37 }
 0x22f   :  { %vm758_vm7 = vcmp.eq.f32.partialorder %v757_v19, 8.507059e+37 }
 0x232   :  { %v1560_v33 = vpop.eup %1559 }
 0x233   :  { %v1562_v18 = vpop.eup %1561  ;;  %v729_v61 = vmul.f32 %v1560_v33, %v727_v25  ;;  %vm734_vm0 = vweird.f32 %v1560_v33  ;;  %v760_v25 = vor.u32 1.1754944e-38, %v759_v12 }
 0x234   :  { %v749_v60 = vmul.f32 %v1562_v18, %v747_v44  ;;  %vm735_vm2 = vmor %vm733_vm1, %vm734_vm0  ;;  %vm754_vm4 = vweird.f32 %v1562_v18 }
 0x235   :  { %v730_v51 = vsub.f32 1.0, %v729_v61  ;;  %vm755_vm6 = vmor %vm753_vm5, %vm754_vm4 }
 0x236   :  { %v750_v21 = vsub.f32 1.0, %v749_v60 }
 0x237   :  { %v731_v0 = vmul.f32 %v1560_v33, %v730_v51 }
 0x238   :  { %v751_v6 = vmul.f32 %v1562_v18, %v750_v21 }
 0x239   :  { %v732_v23 = vadd.f32 %v1560_v33, %v731_v0 }
 0x23a   :  { %v752_v32 = vadd.f32 %v1562_v18, %v751_v6 }
 0x23b   :  { %v736_v29 = vsel %vm735_vm2, %v1560_v33, %v732_v23 }
 0x23c   :  { %v741_v58 = vsel %vm738_vm3, %v740_v20, %v736_v29  ;;  %v756_v39 = vsel %vm755_vm6, %v1562_v18, %v752_v32 }
 0x23d   :  { %v764_v16 = vmul.f32 %v763_v40, %v741_v58  ;;  %v761_v33 = vsel %vm758_vm7, %v760_v25, %v756_v39 }
 0x23e   :  { %v767_v61 = vsub.f32 1.0, %v761_v33  ;;  %v769_v51 = vmul.f32 %v761_v33, %v2177_v4  ;;  %v259_v4 = vadd.f32 %v2152_v38, %v2100_v57 }
 0x23f   :  { %v765_v22 = vadd.f32 %v764_v16, %v286_v3 }
 0x241   :  { %1563 = vtanh.f32 %v765_v22 }
 0x247   :  { %v1564_v60 = vpop.eup %1563 }
 0x248   :  { %v768_v5 = vmul.f32 %v1564_v60, %v767_v61 }
 0x24a   :  { %v2212_v21 = vadd.f32 %v769_v51, %v768_v5 }
 0x24c   :  { %v777_v37 = vpack.c.bf16 %v2212_v21, %v2212_v21 }
 0x24e   :  { %786 = vmatmul.bf16.vlgmr.msrb.gmra.mxu3 %v777_v37  ;;  %799 = vmatmul.bf16.vlgmr.msrb.gmra.mxu0 %v777_v37 }
 0x24f   :  { %812 = vmatmul.bf16.vlgmr.msrb.gmra.mxu1 %v777_v37  ;;  %992 = vmatpush.bf16.msrb.mxu3 %v1820_v10 }
 0x250   :  { %1060 = vmatpush.bf16.msrb.mxu0 %v1665_v7  ;;  %1073 = vmatpush.bf16.msrb.mxu1 %v1831_v15 }
 0x253   :  { %993 = vmatpush.bf16.msrb.mxu3 %v1855_v26 }
 0x254   :  { %1061 = vmatpush.bf16.msrb.mxu0 %v1674_v11  ;;  %1074 = vmatpush.bf16.msrb.mxu1 %v1867_v30 }
 0x257   :  { %994 = vmatpush.bf16.msrb.mxu3 %v1893_v42 }
 0x258   :  { %1062 = vmatpush.bf16.msrb.mxu0 %v1689_v17  ;;  %1075 = vmatpush.bf16.msrb.mxu1 %v1902_v45 }
 0x25b   :  { %995 = vmatpush.bf16.msrb.mxu3 %v1923_v55 }
 0x25c   :  { %1063 = vmatpush.bf16.msrb.mxu0 %v1707_v24  ;;  %1076 = vmatpush.bf16.msrb.mxu1 %v1926_v56 }
 0x25f   :  { %996 = vmatpush.bf16.msrb.mxu3 %v1947_v1 }
 0x260   :  { %1064 = vmatpush.bf16.msrb.mxu0 %v1734_v36  ;;  %1077 = vmatpush.bf16.msrb.mxu1 %v1951_v2 }
 0x263   :  { %997 = vmatpush.bf16.msrb.mxu3 %v1970_v13 }
 0x264   :  { %1065 = vmatpush.bf16.msrb.mxu0 %v1758_v46  ;;  %1078 = vmatpush.bf16.msrb.mxu1 %v1974_v14 }
 0x267   :  { %998 = vmatpush.bf16.msrb.mxu3 %v1995_v27 }
 0x268   :  { %1066 = vmatpush.bf16.msrb.mxu0 %v1788_v59  ;;  %1079 = vmatpush.bf16.msrb.mxu1 %v1999_v28 }
 0x26b   :  { %999 = vmatpush.bf16.msrb.mxu3 %v2016_v34 }
 0x26c   :  { %1067 = vmatpush.bf16.msrb.mxu0 %v1818_v9  ;;  %1080 = vmatpush.bf16.msrb.mxu1 %v2019_v35 }
 0x2cb   :  { %v800_v44 = vpop.f32.mrf.mxu0 }
 0x2cc   :  { %v837_v18 = vadd.f32 %v800_v44, %v259_v4  ;;  %v813_v63 = vpop.f32.mrf.mxu1 }
 0x2cd   :  { %v857_v37 = vadd.f32 %v2116_v47, %v813_v63 }
 0x2ce   :  { %v1472_v0 = vmul.f32 -1.442695, %v837_v18 }
 0x2d0   :  { %1565 = vpow2.f32 %v1472_v0  ;;  %v288_v0 = vadd.f32 %v2154_v41, %v2111_v43 }
 0x2d1   :  { %v787_v31 = vpop.f32.mrf.mxu3 }
 0x2d2   :  { %v817_v6 = vadd.f32 %v787_v31, %v2098_v54 }
 0x2d3   :  { %v802_v23 = vpop.f32.mrf.mxu0 }
 0x2d4   :  { %v1471_v20 = vmul.f32 -1.442695, %v817_v6  ;;  %v815_v29 = vpop.f32.mrf.mxu1 }
 0x2d6   :  { %v1566_v40 = vpop.eup %1565  ;;  %1567 = vpow2.f32 %v1471_v20 }
 0x2d7   :  { %v841_v58 = vadd.f32 1.0, %v1566_v40 }
 0x2d9   :  { %v789_v32 = vpop.f32.mrf.mxu3  ;;  %1569 = vrcp.f32 %v841_v58  ;;  %v853_v31 = vand.u32 2147483648, %v841_v58  ;;  %vm847_vm13 = vweird.f32 %v841_v58  ;;  %v851_v23 = vand.u32 2147483647, %v841_v58 }
 0x2db   :  { %v854_v40 = vor.u32 1.1754944e-38, %v853_v31  ;;  %vm852_vm15 = vcmp.eq.f32.partialorder %v851_v23, 8.507059e+37 }
 0x2dc   :  { %v1568_v3 = vpop.eup %1567 }
 0x2dd   :  { %v821_v12 = vadd.f32 1.0, %v1568_v3 }
 0x2df   :  { %1571 = vrcp.f32 %v821_v12  ;;  %v1570_v38 = vpop.eup %1569  ;;  %v833_v33 = vand.u32 2147483648, %v821_v12  ;;  %v831_v54 = vand.u32 2147483647, %v821_v12  ;;  %vm827_vm9 = vweird.f32 %v821_v12 }
 0x2e0   :  { %v843_v16 = vmul.f32 %v1570_v38, %v841_v58  ;;  %vm848_vm12 = vweird.f32 %v1570_v38 }
 0x2e1   :  { %v834_v51 = vor.u32 1.1754944e-38, %v833_v33  ;;  %vm832_vm11 = vcmp.eq.f32.partialorder %v831_v54, 8.507059e+37  ;;  %vm849_vm14 = vmor %vm847_vm13, %vm848_vm12 }
 0x2e2   :  { %v844_v39 = vsub.f32 1.0, %v843_v16 }
 0x2e4   :  { %v845_v60 = vmul.f32 %v1570_v38, %v844_v39 }
 0x2e5   :  { %v1572_v19 = vpop.eup %1571 }
 0x2e6   :  { %v823_v22 = vmul.f32 %v1572_v19, %v821_v12  ;;  %vm828_vm8 = vweird.f32 %v1572_v19  ;;  %v846_v18 = vadd.f32 %v1570_v38, %v845_v60 }
 0x2e7   :  { %vm829_vm10 = vmor %vm827_vm9, %vm828_vm8 }
 0x2e8   :  { %v824_v25 = vsub.f32 1.0, %v823_v22  ;;  %v850_v29 = vsel %vm849_vm14, %v1570_v38, %v846_v18 }
 0x2e9   :  { %v855_v32 = vsel %vm852_vm15, %v854_v40, %v850_v29 }
 0x2ea   :  { %v825_v61 = vmul.f32 %v1572_v19, %v824_v25  ;;  %v861_v63 = vsub.f32 1.0, %v855_v32  ;;  %v863_v16 = vmul.f32 %v855_v32, %v2212_v21 }
 0x2ec   :  { %v826_v5 = vadd.f32 %v1572_v19, %v825_v61 }
 0x2ee   :  { %v830_v4 = vsel %vm829_vm10, %v1572_v19, %v826_v5 }
 0x2ef   :  { %v835_v44 = vsel %vm832_vm11, %v834_v51, %v830_v4  ;;  %v291_v4 = vadd.f32 %v2158_v49, %v2111_v43 }
 0x2f0   :  { %v858_v6 = vmul.f32 %v857_v37, %v835_v44 }
 0x2f2   :  { %v859_v20 = vadd.f32 %v858_v6, %v288_v0 }
 0x2f4   :  { %1573 = vtanh.f32 %v859_v20 }
 0x2fa   :  { %v1574_v3 = vpop.eup %1573 }
 0x2fb   :  { %v862_v12 = vmul.f32 %v1574_v3, %v861_v63 }
 0x2fd   :  { %v2247_v19 = vadd.f32 %v863_v16, %v862_v12 }
 0x2ff   :  { %v871_v41 = vpack.c.bf16 %v2247_v19, %v2247_v19 }
 0x301   :  { %880 = vmatmul.bf16.vlgmr.msrb.gmra.mxu2 %v871_v41  ;;  %893 = vmatmul.bf16.vlgmr.msra.gmra.mxu3 %v871_v41 }
 0x302   :  { %906 = vmatmul.bf16.vlgmr.msra.gmra.mxu0 %v871_v41  ;;  %1086 = vmatpush.bf16.msrb.mxu2 %v1820_v10 }
 0x303   :  { %1154 = vmatpush.bf16.msra.mxu3 %v1665_v7  ;;  %1167 = vmatpush.bf16.msra.mxu0 %v1831_v15 }
 0x306   :  { %1087 = vmatpush.bf16.msrb.mxu2 %v1855_v26 }
 0x307   :  { %1155 = vmatpush.bf16.msra.mxu3 %v1674_v11  ;;  %1168 = vmatpush.bf16.msra.mxu0 %v1867_v30  ;;  %v262_v11 = vadd.f32 %v2156_v48, %v2100_v57 }
 0x30a   :  { %1088 = vmatpush.bf16.msrb.mxu2 %v1893_v42 }
 0x30b   :  { %1156 = vmatpush.bf16.msra.mxu3 %v1689_v17  ;;  %1169 = vmatpush.bf16.msra.mxu0 %v1902_v45 }
 0x30e   :  { %1089 = vmatpush.bf16.msrb.mxu2 %v1923_v55 }
 0x30f   :  { %1157 = vmatpush.bf16.msra.mxu3 %v1707_v24  ;;  %1170 = vmatpush.bf16.msra.mxu0 %v1926_v56 }
 0x312   :  { %1090 = vmatpush.bf16.msrb.mxu2 %v1947_v1 }
 0x313   :  { %1158 = vmatpush.bf16.msra.mxu3 %v1734_v36  ;;  %1171 = vmatpush.bf16.msra.mxu0 %v1951_v2 }
 0x316   :  { %1091 = vmatpush.bf16.msrb.mxu2 %v1970_v13 }
 0x317   :  { %1159 = vmatpush.bf16.msra.mxu3 %v1758_v46  ;;  %1172 = vmatpush.bf16.msra.mxu0 %v1974_v14 }
 0x31a   :  { %1092 = vmatpush.bf16.msrb.mxu2 %v1995_v27 }
 0x31b   :  { %1160 = vmatpush.bf16.msra.mxu3 %v1788_v59  ;;  %1173 = vmatpush.bf16.msra.mxu0 %v1999_v28 }
 0x31e   :  { %1093 = vmatpush.bf16.msrb.mxu2 %v2016_v34 }
 0x31f   :  { %1161 = vmatpush.bf16.msra.mxu3 %v1818_v9  ;;  %1174 = vmatpush.bf16.msra.mxu0 %v2019_v35 }
 0x37f   :  { %v907_v7 = vpop.f32.mrf.mxu0 }
 0x380   :  { %v951_v60 = vadd.f32 %v2116_v47, %v907_v7 }
 0x384   :  { %v881_v17 = vpop.f32.mrf.mxu2  ;;  %v894_v24 = vpop.f32.mrf.mxu3 }
 0x385   :  { %v911_v36 = vadd.f32 %v881_v17, %v2102_v62  ;;  %v931_v46 = vadd.f32 %v894_v24, %v262_v11 }
 0x387   :  { %v1473_v15 = vmul.f32 -1.442695, %v911_v36  ;;  %v1474_v30 = vmul.f32 -1.442695, %v931_v46  ;;  %v909_v59 = vpop.f32.mrf.mxu0 }
 0x389   :  { %1575 = vpow2.f32 %v1473_v15 }
 0x38a   :  { %1577 = vpow2.f32 %v1474_v30 }
 0x38c   :  { %v883_v45 = vpop.f32.mrf.mxu2  ;;  %v896_v56 = vpop.f32.mrf.mxu3 }
 0x38f   :  { %v1576_v2 = vpop.eup %1575 }
 0x390   :  { %v1578_v9 = vpop.eup %1577  ;;  %v915_v14 = vadd.f32 1.0, %v1576_v2 }
 0x391   :  { %v935_v28 = vadd.f32 1.0, %v1578_v9 }
 0x392   :  { %1579 = vrcp.f32 %v915_v14  ;;  %v927_v62 = vand.u32 2147483648, %v915_v14  ;;  %v925_v25 = vand.u32 2147483647, %v915_v14  ;;  %vm921_vm1 = vweird.f32 %v915_v14 }
 0x393   :  { %1581 = vrcp.f32 %v935_v28  ;;  %v947_v18 = vand.u32 2147483648, %v935_v28  ;;  %vm941_vm5 = vweird.f32 %v935_v28  ;;  %v945_v0 = vand.u32 2147483647, %v935_v28 }
 0x394   :  { %v928_v54 = vor.u32 1.1754944e-38, %v927_v62  ;;  %vm926_vm3 = vcmp.eq.f32.partialorder %v925_v25, 8.507059e+37 }
 0x395   :  { %v948_v23 = vor.u32 1.1754944e-38, %v947_v18  ;;  %vm946_vm7 = vcmp.eq.f32.partialorder %v945_v0, 8.507059e+37  ;;  %v2329_v18 = vld [vmem:[#allocation4_spill] sm:$0xff] }
 0x398   :  { %v1580_v35 = vpop.eup %1579 }
 0x399   :  { %v1582_v48 = vpop.eup %1581  ;;  %v917_v21 = vmul.f32 %v1580_v35, %v915_v14  ;;  %vm922_vm0 = vweird.f32 %v1580_v35 }
 0x39a   :  { %v937_v58 = vmul.f32 %v1582_v48, %v935_v28  ;;  %vm923_vm2 = vmor %vm921_vm1, %vm922_vm0  ;;  %vm942_vm4 = vweird.f32 %v1582_v48  ;;  %v293_v28 = vadd.f32 %v2162_v52, %v2111_v43 }
 0x39b   :  { %v918_v38 = vsub.f32 1.0, %v917_v21  ;;  %vm943_vm6 = vmor %vm941_vm5, %vm942_vm4 }
 0x39c   :  { %v938_v22 = vsub.f32 1.0, %v937_v58 }
 0x39d   :  { %v919_v39 = vmul.f32 %v1580_v35, %v918_v38 }
 0x39e   :  { %v939_v33 = vmul.f32 %v1582_v48, %v938_v22 }
 0x39f   :  { %v920_v61 = vadd.f32 %v1580_v35, %v919_v39 }
 0x3a0   :  { %v940_v37 = vadd.f32 %v1582_v48, %v939_v33 }
 0x3a1   :  { %v924_v5 = vsel %vm923_vm2, %v1580_v35, %v920_v61 }
 0x3a2   :  { %v929_v51 = vsel %vm926_vm3, %v928_v54, %v924_v5  ;;  %v944_v6 = vsel %vm943_vm6, %v1582_v48, %v940_v37  ;;  %v267_v37 = vadd.f32 %v2164_v53, %v2100_v57 }
 0x3a3   :  { %v952_v44 = vmul.f32 %v951_v60, %v929_v51  ;;  %v949_v20 = vsel %vm946_vm7, %v948_v23, %v944_v6 }
 0x3a4   :  { %v955_v29 = vsub.f32 1.0, %v949_v20  ;;  %v957_v63 = vmul.f32 %v949_v20, %v2247_v19 }
 0x3a5   :  { %v953_v31 = vadd.f32 %v952_v44, %v291_v4 }
 0x3a7   :  { %1583 = vtanh.f32 %v953_v31 }
 0x3ad   :  { %v1584_v40 = vpop.eup %1583 }
 0x3ae   :  { %v956_v32 = vmul.f32 %v1584_v40, %v955_v29 }
 0x3b0   :  { %v2282_v3 = vadd.f32 %v957_v63, %v956_v32 }
 0x3b2   :  { %v965_v49 = vpack.c.bf16 %v2282_v3, %v2282_v3 }
 0x3b4   :  { %974 = vmatmul.bf16.vlgmr.msra.gmra.mxu1 %v965_v49  ;;  %987 = vmatmul.bf16.vlgmr.msra.gmra.mxu2 %v965_v49 }
 0x3b5   :  { %1000 = vmatmul.bf16.vlgmr.msrb.gmra.mxu3 %v965_v49  ;;  %1180 = vmatpush.bf16.msra.mxu1 %v1820_v10  ;;  %v264_v10 = vadd.f32 %v2160_v50, %v2100_v57 }
 0x3b9   :  { %1181 = vmatpush.bf16.msra.mxu1 %v1855_v26 }
 0x3bd   :  { %1182 = vmatpush.bf16.msra.mxu1 %v1893_v42 }
 0x3c1   :  { %1183 = vmatpush.bf16.msra.mxu1 %v1923_v55 }
 0x3c5   :  { %1184 = vmatpush.bf16.msra.mxu1 %v1947_v1 }
 0x3c9   :  { %1185 = vmatpush.bf16.msra.mxu1 %v1970_v13 }
 0x3cd   :  { %1186 = vmatpush.bf16.msra.mxu1 %v1995_v27 }
 0x3d1   :  { %1187 = vmatpush.bf16.msra.mxu1 %v2016_v34 }
 0x431   :  { %v975_v12 = vpop.f32.mrf.mxu1 }
 0x432   :  { %v1005_v16 = vadd.f32 %v975_v12, %v2105_v8 }
 0x434   :  { %v1475_v19 = vmul.f32 -1.442695, %v1005_v16 }
 0x436   :  { %1585 = vpow2.f32 %v1475_v19 }
 0x437   :  { %v988_v26 = vpop.f32.mrf.mxu2 }
 0x438   :  { %v1025_v42 = vadd.f32 %v988_v26, %v264_v10  ;;  %v1001_v41 = vpop.f32.mrf.mxu3 }
 0x439   :  { %v977_v55 = vpop.f32.mrf.mxu1  ;;  %v1045_v14 = vadd.f32 %v2116_v47, %v1001_v41 }
 0x43a   :  { %v1476_v7 = vmul.f32 -1.442695, %v1025_v42 }
 0x43c   :  { %v1586_v1 = vpop.eup %1585  ;;  %1587 = vpow2.f32 %v1476_v7 }
 0x43d   :  { %v1009_v13 = vadd.f32 1.0, %v1586_v1 }
 0x43f   :  { %1589 = vrcp.f32 %v1009_v13  ;;  %v990_v27 = vpop.f32.mrf.mxu2  ;;  %v1021_v46 = vand.u32 2147483648, %v1009_v13  ;;  %v1019_v15 = vand.u32 2147483647, %v1009_v13  ;;  %vm1015_vm9 = vweird.f32 %v1009_v13 }
 0x440   :  { %v1003_v11 = vpop.f32.mrf.mxu3 }
 0x441   :  { %v1022_v56 = vor.u32 1.1754944e-38, %v1021_v46  ;;  %vm1020_vm11 = vcmp.eq.f32.partialorder %v1019_v15, 8.507059e+37 }
 0x442   :  { %v1588_v34 = vpop.eup %1587 }
 0x443   :  { %v1029_v17 = vadd.f32 1.0, %v1588_v34 }
 0x445   :  { %v1590_v24 = vpop.eup %1589  ;;  %1591 = vrcp.f32 %v1029_v17  ;;  %v1041_v21 = vand.u32 2147483648, %v1029_v17  ;;  %v1039_v38 = vand.u32 2147483647, %v1029_v17  ;;  %vm1035_vm13 = vweird.f32 %v1029_v17 }
 0x446   :  { %v1011_v8 = vmul.f32 %v1590_v24, %v1009_v13  ;;  %vm1016_vm8 = vweird.f32 %v1590_v24 }
 0x447   :  { %vm1017_vm10 = vmor %vm1015_vm9, %vm1016_vm8  ;;  %v1042_v39 = vor.u32 1.1754944e-38, %v1041_v21  ;;  %vm1040_vm15 = vcmp.eq.f32.partialorder %v1039_v38, 8.507059e+37 }
 0x448   :  { %v1012_v36 = vsub.f32 1.0, %v1011_v8  ;;  %v2330_v8 = vld [vmem:[#allocation6_spill] sm:$0xff] }
 0x44a   :  { %v1013_v50 = vmul.f32 %v1590_v24, %v1012_v36  ;;  %v296_v36 = vadd.f32 %v2330_v8, %v2111_v43 }
 0x44b   :  { %v1592_v30 = vpop.eup %1591 }
 0x44c   :  { %v1031_v59 = vmul.f32 %v1592_v30, %v1029_v17  ;;  %v1014_v45 = vadd.f32 %v1590_v24, %v1013_v50  ;;  %vm1036_vm12 = vweird.f32 %v1592_v30 }
 0x44d   :  { %vm1037_vm14 = vmor %vm1035_vm13, %vm1036_vm12 }
 0x44e   :  { %v1032_v2 = vsub.f32 1.0, %v1031_v59  ;;  %v1018_v9 = vsel %vm1017_vm10, %v1590_v24, %v1014_v45 }
 0x44f   :  { %v1023_v35 = vsel %vm1020_vm11, %v1022_v56, %v1018_v9 }
 0x450   :  { %v1033_v48 = vmul.f32 %v1592_v30, %v1032_v2  ;;  %v1046_v58 = vmul.f32 %v1045_v14, %v1023_v35 }
 0x452   :  { %v1047_v62 = vadd.f32 %v1046_v58, %v293_v28  ;;  %v1034_v22 = vadd.f32 %v1592_v30, %v1033_v48  ;;  %v2331_v48 = vld [vmem:[#allocation7_spill] sm:$0xff] }
 0x453   :  { %v269_v21 = vadd.f32 %v2331_v48, %v2100_v57 }
 0x454   :  { %1593 = vtanh.f32 %v1047_v62  ;;  %v1038_v25 = vsel %vm1037_vm14, %v1592_v30, %v1034_v22 }
 0x455   :  { %v1043_v33 = vsel %vm1040_vm15, %v1042_v39, %v1038_v25  ;;  %v2332_v25 = vld [vmem:[#allocation5_spill] sm:$0xff] }
 0x456   :  { %v1049_v61 = vsub.f32 1.0, %v1043_v33  ;;  %v1051_v52 = vmul.f32 %v1043_v33, %v2282_v3 }
 0x45a   :  { %v1594_v54 = vpop.eup %1593 }
 0x45b   :  { %v1050_v60 = vmul.f32 %v1594_v54, %v1049_v61 }
 0x45d   :  { %v1052_v5 = vadd.f32 %v1051_v52, %v1050_v60 }
 0x45f   :  { %v1059_v51 = vpack.c.bf16 %v1052_v5, %v1052_v5 }
 0x461   :  { %1068 = vmatmul.bf16.vlgmr.msrb.gmra.mxu0 %v1059_v51  ;;  %1081 = vmatmul.bf16.vlgmr.msrb.gmra.mxu1 %v1059_v51 }
 0x462   :  { %1094 = vmatmul.bf16.vlgmr.msrb.gmra.mxu2 %v1059_v51 }
 0x4de   :  { %v1069_v4 = vpop.f32.mrf.mxu0  ;;  %v1082_v44 = vpop.f32.mrf.mxu1 }
 0x4df   :  { %v1099_v0 = vadd.f32 %v1069_v4, %v2329_v18  ;;  %v1119_v31 = vadd.f32 %v1082_v44, %v267_v37 }
 0x4e1   :  { %v1477_v6 = vmul.f32 -1.442695, %v1099_v0  ;;  %v1478_v23 = vmul.f32 -1.442695, %v1119_v31 }
 0x4e3   :  { %1595 = vpow2.f32 %v1477_v6 }
 0x4e4   :  { %1597 = vpow2.f32 %v1478_v23 }
 0x4e5   :  { %v1095_v20 = vpop.f32.mrf.mxu2 }
 0x4e6   :  { %v1071_v29 = vpop.f32.mrf.mxu0  ;;  %v1084_v40 = vpop.f32.mrf.mxu1  ;;  %v1139_v34 = vadd.f32 %v2116_v47, %v1095_v20 }
 0x4e9   :  { %v1596_v32 = vpop.eup %1595 }
 0x4ea   :  { %v1598_v63 = vpop.eup %1597  ;;  %v1103_v3 = vadd.f32 1.0, %v1596_v32 }
 0x4eb   :  { %v1123_v49 = vadd.f32 1.0, %v1598_v63 }
 0x4ec   :  { %1599 = vrcp.f32 %v1103_v3  ;;  %v1115_v41 = vand.u32 2147483648, %v1103_v3  ;;  %v1113_v7 = vand.u32 2147483647, %v1103_v3  ;;  %vm1109_vm1 = vweird.f32 %v1103_v3 }
 0x4ed   :  { %1601 = vrcp.f32 %v1123_v49  ;;  %v1097_v12 = vpop.f32.mrf.mxu2  ;;  %v1135_v46 = vand.u32 2147483648, %v1123_v49  ;;  %vm1129_vm5 = vweird.f32 %v1123_v49  ;;  %v1133_v15 = vand.u32 2147483647, %v1123_v49 }
 0x4ee   :  { %v1116_v27 = vor.u32 1.1754944e-38, %v1115_v41  ;;  %vm1114_vm3 = vcmp.eq.f32.partialorder %v1113_v7, 8.507059e+37 }
 0x4ef   :  { %v1136_v45 = vor.u32 1.1754944e-38, %v1135_v46  ;;  %vm1134_vm7 = vcmp.eq.f32.partialorder %v1133_v15, 8.507059e+37 }
 0x4f2   :  { %v1600_v53 = vpop.eup %1599 }
 0x4f3   :  { %v1602_v16 = vpop.eup %1601  ;;  %v1105_v19 = vmul.f32 %v1600_v53, %v1103_v3  ;;  %vm1110_vm0 = vweird.f32 %v1600_v53  ;;  %v1615_v3 = vld [vmem:[%s2321_s4] ss:$0 sm:$0xff] }
 0x4f4   :  { %v1125_v10 = vmul.f32 %v1602_v16, %v1123_v49  ;;  %vm1111_vm2 = vmor %vm1109_vm1, %vm1110_vm0  ;;  %vm1130_vm4 = vweird.f32 %v1602_v16 }
 0x4f5   :  { %v1106_v26 = vsub.f32 1.0, %v1105_v19  ;;  %vm1131_vm6 = vmor %vm1129_vm5, %vm1130_vm4  ;;  %v2333_v19 = vld [vmem:[#allocation8_spill] sm:$0xff] }
 0x4f6   :  { %v1126_v42 = vsub.f32 1.0, %v1125_v10  ;;  %v298_v10 = vadd.f32 %v2333_v19, %v2111_v43 }
 0x4f7   :  { %v1107_v55 = vmul.f32 %v1600_v53, %v1106_v26 }
 0x4f8   :  { %v1127_v1 = vmul.f32 %v1602_v16, %v1126_v42 }
 0x4f9   :  { %v1108_v13 = vadd.f32 %v1600_v53, %v1107_v55 }
 0x4fa   :  { %v1128_v24 = vadd.f32 %v1602_v16, %v1127_v1 }
 0x4fb   :  { %v1112_v11 = vsel %vm1111_vm2, %v1600_v53, %v1108_v13 }
 0x4fc   :  { %v1117_v17 = vsel %vm1114_vm3, %v1116_v27, %v1112_v11  ;;  %v1132_v59 = vsel %vm1131_vm6, %v1602_v16, %v1128_v24 }
 0x4fd   :  { %v1140_v50 = vmul.f32 %v1139_v34, %v1117_v17  ;;  %v1137_v56 = vsel %vm1134_vm7, %v1136_v45, %v1132_v59 }
 0x4fe   :  { %v1143_v2 = vsub.f32 1.0, %v1137_v56  ;;  %v1145_v14 = vmul.f32 %v1137_v56, %v1052_v5 }
 0x4ff   :  { %v1141_v30 = vadd.f32 %v1140_v50, %v296_v36 }
 0x501   :  { %1603 = vtanh.f32 %v1141_v30 }
 0x507   :  { %v1604_v9 = vpop.eup %1603 }
 0x508   :  { %v1144_v47 = vmul.f32 %v1604_v9, %v1143_v2 }
 0x50a   :  { %v1146_v28 = vadd.f32 %v1145_v14, %v1144_v47 }
 0x50c   :  { %v1153_v35 = vpack.c.bf16 %v1146_v28, %v1146_v28 }
 0x50e   :  { %1162 = vmatmul.bf16.vlgmr.msra.gmra.mxu3 %v1153_v35  ;;  %1175 = vmatmul.bf16.vlgmr.msra.gmra.mxu0 %v1153_v35 }
 0x50f   :  { %1188 = vmatmul.bf16.vlgmr.msra.gmra.mxu1 %v1153_v35 }
 0x58b   :  { %v1176_v58 = vpop.f32.mrf.mxu0 }
 0x58c   :  { %v1213_v38 = vadd.f32 %v1176_v58, %v269_v21  ;;  %v1189_v62 = vpop.f32.mrf.mxu1 }
 0x58d   :  { %v1233_v49 = vadd.f32 %v1615_v3, %v1189_v62 }
 0x58e   :  { %v1480_v22 = vmul.f32 -1.442695, %v1213_v38 }
 0x590   :  { %1605 = vpow2.f32 %v1480_v22 }
 0x591   :  { %v1163_v39 = vpop.f32.mrf.mxu3 }
 0x592   :  { %v1193_v33 = vadd.f32 %v1163_v39, %v2332_v25 }
 0x593   :  { %v1178_v61 = vpop.f32.mrf.mxu0 }
 0x594   :  { %v1479_v54 = vmul.f32 -1.442695, %v1193_v33  ;;  %v1191_v60 = vpop.f32.mrf.mxu1 }
 0x596   :  { %v1606_v52 = vpop.eup %1605  ;;  %1607 = vpow2.f32 %v1479_v54 }
 0x597   :  { %v1217_v5 = vadd.f32 1.0, %v1606_v52 }
 0x599   :  { %v1165_v51 = vpop.f32.mrf.mxu3  ;;  %1609 = vrcp.f32 %v1217_v5  ;;  %v1229_v26 = vand.u32 2147483648, %v1217_v5  ;;  %vm1223_vm13 = vweird.f32 %v1217_v5  ;;  %v1227_v41 = vand.u32 2147483647, %v1217_v5 }
 0x59b   :  { %v1230_v1 = vor.u32 1.1754944e-38, %v1229_v26  ;;  %vm1228_vm15 = vcmp.eq.f32.partialorder %v1227_v41, 8.507059e+37 }
 0x59c   :  { %v1608_v37 = vpop.eup %1607 }
 0x59d   :  { %v1197_v4 = vadd.f32 1.0, %v1608_v37 }
 0x59f   :  { %1611 = vrcp.f32 %v1197_v4  ;;  %v1610_v57 = vpop.eup %1609  ;;  %v1209_v23 = vand.u32 2147483648, %v1197_v4  ;;  %v1207_v29 = vand.u32 2147483647, %v1197_v4  ;;  %vm1203_vm9 = vweird.f32 %v1197_v4 }
 0x5a0   :  { %v1219_v44 = vmul.f32 %v1610_v57, %v1217_v5  ;;  %vm1224_vm12 = vweird.f32 %v1610_v57 }
 0x5a1   :  { %v1210_v63 = vor.u32 1.1754944e-38, %v1209_v23  ;;  %vm1208_vm11 = vcmp.eq.f32.partialorder %v1207_v29, 8.507059e+37  ;;  %vm1225_vm14 = vmor %vm1223_vm13, %vm1224_vm12 }
 0x5a2   :  { %v1220_v31 = vsub.f32 1.0, %v1219_v44 }
 0x5a4   :  { %v1221_v40 = vmul.f32 %v1610_v57, %v1220_v31 }
 0x5a5   :  { %v1612_v18 = vpop.eup %1611 }
 0x5a6   :  { %v1199_v0 = vmul.f32 %v1612_v18, %v1197_v4  ;;  %vm1204_vm8 = vweird.f32 %v1612_v18  ;;  %v1222_v53 = vadd.f32 %v1610_v57, %v1221_v40 }
 0x5a7   :  { %vm1205_vm10 = vmor %vm1203_vm9, %vm1204_vm8 }
 0x5a8   :  { %v1200_v6 = vsub.f32 1.0, %v1199_v0  ;;  %v1226_v7 = vsel %vm1225_vm14, %v1610_v57, %v1222_v53 }
 0x5a9   :  { %v1231_v13 = vsel %vm1228_vm15, %v1230_v1, %v1226_v7 }
 0x5aa   :  { %v1201_v20 = vmul.f32 %v1612_v18, %v1200_v6  ;;  %v1237_v27 = vsub.f32 1.0, %v1231_v13  ;;  %v1239_v34 = vmul.f32 %v1231_v13, %v1146_v28 }
 0x5ac   :  { %v1202_v32 = vadd.f32 %v1612_v18, %v1201_v20 }
 0x5ae   :  { %v1206_v12 = vsel %vm1205_vm10, %v1612_v18, %v1202_v32 }
 0x5af   :  { %v1211_v16 = vsel %vm1208_vm11, %v1210_v63, %v1206_v12 }
 0x5b0   :  { %v1234_v42 = vmul.f32 %v1233_v49, %v1211_v16 }
 0x5b2   :  { %v1235_v55 = vadd.f32 %v1234_v42, %v298_v10 }
 0x5b4   :  { %1613 = vtanh.f32 %v1235_v55 }
 0x5ba   :  { %v1614_v11 = vpop.eup %1613 }
 0x5bb   :  { %v1238_v17 = vmul.f32 %v1614_v11, %v1237_v27 }
 0x5bd   :  { %v1240_v24 = vadd.f32 %v1239_v34, %v1238_v17 }
 0x5bf   :  { %1245 = vst [vmem:[%s2323_s5] sm:$0xff] %v1240_v24 }

</bundles_post_ra>
